<compile_context>
chip_gen: v6e
topology: v6e:2x2x1
jax: 0.10.0
libtpu: 0.0.40
codegen_flags: <defaults>
</compile_context>

<pallas_src>
import functools
import math

import jax
import jax.numpy as jnp
from jax.experimental import pallas as pl
from jax.experimental.pallas import tpu as pltpu

PI = math.pi
DEG2RAD = PI / 180.0
INIT_LAT = 23.8927795
INIT_LON = 121.5415863
LSM = 15.0 * 8.0              # localstandard_meridian
N_FEAT = 16                   # n_location_feature_levels
N_COLS = 2 + N_FEAT           # [dayofyr, hour_of_day, 16 location features]
PACK = 8                      # original rows packed per lane-dense packed row
PCOLS = PACK * N_COLS         # 144
N_Q = 6                       # quantities: day, hour, lat, lon, lum_y, lum_x


def _astronomy(zT, b_lat, b_lon, b_y, b_x):
    """zT: (48, c) rows grouped 8-per-quantity; returns lumination (8, c)."""
    day = zT[0:8, :]
    hour = zT[8:16, :]
    lat = jnp.maximum(zT[16:24, :] + b_lat, 0.0)       # ReLU(linear(lat*feat))
    lon = jnp.maximum(zT[24:32, :] + b_lon, 0.0)       # ReLU(linear(lon*feat))
    lum_y = jnp.maximum(zT[32:40, :] + b_y, 0.0)       # location_adjustments_y
    lum_x = jnp.maximum(zT[40:48, :] + b_x, 0.0)       # location_adjustments_x

    # get_lumination_with_astronomy, 7 transcendentals per row.
    ang = (2.0 * PI / 365.0) * (day - 81.0)            # deg2rad(360)/365*(d-81)
    sin_a = jnp.sin(ang)
    cos_a = jnp.cos(ang)
    decl_r = DEG2RAD * (23.45 * sin_a)                 # declination in radians
    decl_sin = jnp.sin(decl_r)
    decl_cos = jnp.cos(decl_r)
    # equation of time; sin(2a) = 2*sin(a)*cos(a) reuses sin_a/cos_a.
    eot = 9.87 * (2.0 * sin_a * cos_a) - 7.53 * cos_a - 1.5 * sin_a
    time_corrector = 4.0 * (lon - LSM) + eot
    local_solar_time = hour + time_corrector / 60.0
    hour_angle = 15.0 * (local_solar_time - 12.0)
    ha_cos = jnp.cos(DEG2RAD * hour_angle)
    lat_r = DEG2RAD * lat
    sin_elev = ha_cos * decl_cos * jnp.cos(lat_r) + decl_sin * jnp.sin(lat_r)
    # cos(pi/2 - arcsin(u)) == u; u is a dot product of two unit vectors.
    lum_factor = jnp.maximum(sin_elev, 0.0)
    return lum_factor * lum_y + lum_x


def _lumination_kernel(x_ref, s_ref, b_ref, o_ref, *, chunk8):
    """x_ref: (tile8, 144) packed rows, s_ref: (48, 144), b_ref: SMEM (4,),
    o_ref: (8, tile8) lane-dense output (o[k, p] -> original row 8p + k)."""
    tile8 = x_ref.shape[0]
    n_chunks = tile8 // chunk8

    s = s_ref[...]                       # (48, 144), ~12 vregs, loop-invariant
    b_lat = b_ref[0]                     # SMEM scalar reads, hoisted
    b_lon = b_ref[1]
    b_y = b_ref[2]
    b_x = b_ref[3]

    def compute(xc):
        # One matmul applies the four 16->1 linears AND de-interleaves the 8
        # packed rows back onto sublanes:  (48,144) x (c,144)^T -> (48, c).
        zT = jax.lax.dot_general(
            s, xc,
            dimension_numbers=(((1,), (1,)), ((), ())),
            preferred_element_type=jnp.float32,
            precision=jax.lax.Precision.HIGHEST)
        return _astronomy(zT, b_lat, b_lon, b_y, b_x)

    if n_chunks == 1:
        o_ref[...] = compute(x_ref[...])
    else:
        # Strip-mine so only ~10 (8, chunk8) intermediates are live at a time.
        def body(c, carry):
            r0 = pl.multiple_of(c * chunk8, chunk8)     # chunk8 % 128 == 0
            o_ref[:, pl.ds(r0, chunk8)] = compute(x_ref[pl.ds(r0, chunk8), :])
            return carry

        jax.lax.fori_loop(0, n_chunks, body, 0, unroll=(n_chunks <= 8))


def _tensorcores_per_chip():
    """Best effort: 2 TensorCores on v4/v5p/v7x, else 1 (safe fallback)."""
    try:
        kind = jax.devices()[0].device_kind.lower()
    except Exception:
        return 1
    if any(tag in kind for tag in ("v7", "7x", "v4", "v5p")):
        return 2
    return 1


def findlatitude_forward(x, w_lat, b_lat, w_lon, b_lon, w_y, b_y, w_x, b_x,
                         *, tm=65536, chunk=4096):
    """x: (N, 18) rows [dayofyr, hour_of_day, 16 features] -> (N, 1) float32.

    tm    : rows of x per grid step (big tiles amortize per-step overhead).
    chunk : rows per strip-mined compute chunk inside a tile (bounds live vregs).
    """
    n, ncols = x.shape
    assert ncols == N_COLS
    f32 = jnp.float32
    x = x.astype(f32)

    # ---- pack 8 rows per packed row: (N, 18) -> (N/8, 144) -------------------
    rem = (-n) % PACK
    if rem:
        # TODO(synk): tiny O(N) copy only when N % 8 != 0; feed batches that are
        # multiples of 8 to avoid it entirely.
        x = jnp.concatenate([x, jnp.zeros((rem, N_COLS), f32)], axis=0)
    n8 = (n + rem) // PACK
    xp = x.reshape(n8, PCOLS)            # contiguous row-major reshape: free

    # ---- tile / chunk selection (in packed-row units) -------------------------
    chunk8 = max(128, ((chunk // PACK) // 128) * 128)   # lane-aligned chunks
    tm8 = max(chunk8, ((tm // PACK) // chunk8) * chunk8)
    if n8 <= chunk8:
        tile8, ck8 = n8, n8              # single block == whole array, 1 chunk
    else:
        ck8 = chunk8
        tile8 = max(ck8, (min(tm8, n8) // ck8) * ck8)
        n_tc = _tensorcores_per_chip()
        if n_tc > 1:
            # keep >= 2 grid steps per TensorCore when the batch allows.
            want = 2 * n_tc
            cap = pl.cdiv(pl.cdiv(n8, want), ck8) * ck8
            tile8 = max(ck8, min(tile8, cap))
    grid = pl.cdiv(n8, tile8)            # ragged last block handled by clipping

    # ---- block-structured selector S (48, 144) --------------------------------
    # S[q*8+k, k*18+f] = W[q, f]; rows 0/1 select day/hour exactly, rows 2..5
    # are the four 16->1 linears with init_lat / init_lon folded in.
    w_all = jnp.zeros((N_Q, N_COLS), f32)
    w_all = w_all.at[0, 0].set(1.0)
    w_all = w_all.at[1, 1].set(1.0)
    w_all = w_all.at[2, 2:].set(INIT_LAT * w_lat.astype(f32))
    w_all = w_all.at[3, 2:].set(INIT_LON * w_lon.astype(f32))
    w_all = w_all.at[4, 2:].set(w_y.astype(f32))
    w_all = w_all.at[5, 2:].set(w_x.astype(f32))
    s_mat = (w_all[:, None, None, :] *
             jnp.eye(PACK, dtype=f32)[None, :, :, None]).reshape(N_Q * PACK, PCOLS)

    b_vec = jnp.stack([jnp.asarray(b_lat, f32), jnp.asarray(b_lon, f32),
                       jnp.asarray(b_y, f32), jnp.asarray(b_x, f32)])

    # ---- VMEM budget (lane-padded sizes) + scheduler cost hint ----------------
    vmem_need = (2 * tile8 * 256 * 4             # x: 144 lanes pad to 256, 2 bufs
                 + 2 * PACK * tile8 * 4          # output double buffer
                 + 2 * N_Q * PACK * 256 * 4)     # resident S
    vmem_limit = int(min(max(2 * vmem_need, 16 << 20), 56 << 20))
    cost = pl.CostEstimate(
        flops=int(n8 * (2 * N_Q * PACK * PCOLS + PACK * 40)),
        transcendentals=int(n8 * PACK * 7),
        bytes_accessed=int(xp.size * 4 + PACK * n8 * 4 + s_mat.size * 4))

    out = pl.pallas_call(
        functools.partial(_lumination_kernel, chunk8=ck8),
        out_shape=jax.ShapeDtypeStruct((PACK, n8), f32),
        grid_spec=pltpu.PrefetchScalarGridSpec(
            num_scalar_prefetch=0,
            grid=(grid,),
            in_specs=[
                pl.BlockSpec((tile8, PCOLS), lambda i: (i, 0)),        # packed x
                pl.BlockSpec((N_Q * PACK, PCOLS), lambda i: (0, 0)),   # S resident
                pl.BlockSpec(memory_space=pltpu.MemorySpace.SMEM),     # biases
            ],
            out_specs=pl.BlockSpec((PACK, tile8), lambda i: (0, i)),   # lane-dense
        ),
        compiler_params=pltpu.CompilerParams(
            dimension_semantics=("parallel",),
            vmem_limit_bytes=vmem_limit),
        cost_estimate=cost,
    )(xp, s_mat, b_vec)

    # out[k, p] is the result for original row 8p + k; tiny (4 B/row) transpose.
    return out.T.reshape(-1, 1)[:n]


def _reference_forward(x, w_lat, b_lat, w_lon, b_lon, w_y, b_y, w_x, b_x):
    """Plain-JAX transcription of the PyTorch forward (float32)."""
    x = x.astype(jnp.float32)
    feats = x[:, 2:2 + N_FEAT]
    day, hour = x[:, 0], x[:, 1]
    lat = jnp.maximum((INIT_LAT * feats * w_lat).sum(-1) + b_lat, 0.0)
    lon = jnp.maximum((INIT_LON * feats * w_lon).sum(-1) + b_lon, 0.0)
    ang = (2.0 * PI / 365.0) * (day - 81.0)
    decl = 23.45 * jnp.sin(ang)
    eot = 9.87 * jnp.sin(2 * ang) - 7.53 * jnp.cos(ang) - 1.5 * jnp.sin(ang)
    tc = 4.0 * (lon - LSM) + eot
    ha = 15.0 * (hour + tc / 60.0 - 12.0)
    sin_elev = (jnp.cos(DEG2RAD * ha) * jnp.cos(DEG2RAD * decl)
                * jnp.cos(DEG2RAD * lat)
                + jnp.sin(DEG2RAD * decl) * jnp.sin(DEG2RAD * lat))
    # clip guards the arcsin against f32 round-off above 1 (benign divergence).
    lum_factor = jnp.maximum(
        jnp.cos(PI / 2 - jnp.arcsin(jnp.clip(sin_elev, -1.0, 1.0))), 0.0)
    lum_y = jnp.maximum((feats * w_y).sum(-1) + b_y, 0.0)
    lum_x = jnp.maximum((feats * w_x).sum(-1) + b_x, 0.0)
    return (lum_factor * lum_y + lum_x)[:, None]


if __name__ == "__main__":
    root = jax.random.PRNGKey(0)
    kw1, kw2, kw3, kw4, kb, kx = jax.random.split(root, 6)

    # Deterministic LazyLinear(16 -> 1) params, uniform(-1/sqrt(16), 1/sqrt(16)).
    bound = 1.0 / math.sqrt(N_FEAT)
    w_lat = jax.random.uniform(kw1, (N_FEAT,), minval=-bound, maxval=bound)
    w_lon = jax.random.uniform(kw2, (N_FEAT,), minval=-bound, maxval=bound)
    w_y = jax.random.uniform(kw3, (N_FEAT,), minval=-bound, maxval=bound)
    w_x = jax.random.uniform(kw4, (N_FEAT,), minval=-bound, maxval=bound)
    b_lat, b_lon, b_y, b_x = jax.random.uniform(
        kb, (4,), minval=-bound, maxval=bound)

    def make_x(n, key):
        kd, kh, kf = jax.random.split(key, 3)
        day = jax.random.uniform(kd, (n, 1), minval=1.0, maxval=365.0)
        hr = jax.random.uniform(kh, (n, 1), minval=0.0, maxval=24.0)
        feats = jax.random.uniform(kf, (n, N_FEAT), minval=0.0, maxval=1.0)
        return jnp.concatenate([day, hr, feats], axis=1).astype(jnp.float32)

    configs = [
        (4096, dict(tm=2048, chunk=1024)),    # multi-step grid, unrolled chunks
        (5003, dict(tm=2048, chunk=1024)),    # N % 8 != 0 + clipped last block
        (40960, dict(tm=65536, chunk=1024)),  # rolled strip-mine loop (>8 chunks)
        (1024, dict()),                       # defaults: single block, one chunk
    ]
    for idx, (n, kw) in enumerate(configs):
        x = make_x(n, jax.random.fold_in(kx, idx))
        out = jax.block_until_ready(
            findlatitude_forward(x, w_lat, b_lat, w_lon, b_lon,
                                 w_y, b_y, w_x, b_x, **kw))
        ref = _reference_forward(x, w_lat, b_lat, w_lon, b_lon,
                                 w_y, b_y, w_x, b_x)
        assert out.shape == (n, 1), (out.shape, n)
        assert jnp.allclose(out, ref, atol=2e-4, rtol=1e-4), f"mismatch at N={n}"
    print("KERNEL_OK")
</pallas_src>

<mosaic_0001>
module attributes {stable_mosaic.version = 11 : i64} {
  func.func @_lumination_kernel(%arg0: i32, %arg1: memref<256x144xf32, #tpu.memory_space<vmem>>, %arg2: memref<48x144xf32, #tpu.memory_space<vmem>>, %arg3: memref<4xf32, #tpu.memory_space<smem>>, %arg4: memref<8x256xf32, #tpu.memory_space<vmem>>) attributes {dimension_semantics = [#tpu.dimension_semantics<parallel>], iteration_bounds = array<i64: 2>, scalar_prefetch = 0 : i64, scratch_operands = 0 : i64, tpu.core_type = #tpu.core_type<tc>, window_params = [{transform_indices = @transform_0, window_bounds = array<i64: 256, 144>}, {pipeline_mode = #tpu.pipeline_mode<synchronous>, transform_indices = @transform_1, window_bounds = array<i64: 48, 144>}, {transform_indices = @transform_2, window_bounds = array<i64: 4>}, {transform_indices = @transform_3, window_bounds = array<i64: 8, 256>}]} {
    %c0 = arith.constant 0 : index
    %c0_0 = arith.constant 0 : index
    %0 = vector.load %arg2[%c0, %c0_0] : memref<48x144xf32, #tpu.memory_space<vmem>>, vector<48x144xf32>
    %c0_1 = arith.constant 0 : index
    %1 = memref.load %arg3[%c0_1] : memref<4xf32, #tpu.memory_space<smem>>
    %c1 = arith.constant 1 : index
    %2 = memref.load %arg3[%c1] : memref<4xf32, #tpu.memory_space<smem>>
    %c2 = arith.constant 2 : index
    %3 = memref.load %arg3[%c2] : memref<4xf32, #tpu.memory_space<smem>>
    %c3 = arith.constant 3 : index
    %4 = memref.load %arg3[%c3] : memref<4xf32, #tpu.memory_space<smem>>
    %c0_i32 = arith.constant 0 : i32
    %c128_i32 = arith.constant 128 : i32
    %5 = arith.muli %c0_i32, %c128_i32 : i32
    %6 = tpu.assume_multiple %5, 128 : i32
    %7 = arith.index_cast %6 : i32 to index
    %c0_2 = arith.constant 0 : index
    %8 = vector.load %arg1[%7, %c0_2] : memref<256x144xf32, #tpu.memory_space<vmem>>, vector<128x144xf32>
    %cst = arith.constant dense<0.000000e+00> : vector<48x128xf32>
    %9 = tpu.matmul %0, %8, %cst {dimension_numbers = #tpu.dot_dimension_numbers<[1], [1], [0], [0], [0, 0, 1, 0], [], []>, precision = #tpu.contract_precision<fp32>} : vector<48x144xf32>, vector<128x144xf32>, vector<48x128xf32> -> vector<48x128xf32>
    %10 = vector.extract_strided_slice %9 {offsets = [0, 0], sizes = [8, 128], strides = [1, 1]} : vector<48x128xf32> to vector<8x128xf32>
    %11 = vector.extract_strided_slice %9 {offsets = [8, 0], sizes = [8, 128], strides = [1, 1]} : vector<48x128xf32> to vector<8x128xf32>
    %12 = vector.extract_strided_slice %9 {offsets = [16, 0], sizes = [8, 128], strides = [1, 1]} : vector<48x128xf32> to vector<8x128xf32>
    %13 = vector.broadcast %1 : f32 to vector<8x128xf32>
    %14 = arith.addf %12, %13 : vector<8x128xf32>
    %cst_3 = arith.constant 0.000000e+00 : f32
    %15 = vector.broadcast %cst_3 : f32 to vector<8x128xf32>
    %16 = arith.maximumf %14, %15 : vector<8x128xf32>
    %17 = vector.extract_strided_slice %9 {offsets = [24, 0], sizes = [8, 128], strides = [1, 1]} : vector<48x128xf32> to vector<8x128xf32>
    %18 = vector.broadcast %2 : f32 to vector<8x128xf32>
    %19 = arith.addf %17, %18 : vector<8x128xf32>
    %cst_4 = arith.constant 0.000000e+00 : f32
    %20 = vector.broadcast %cst_4 : f32 to vector<8x128xf32>
    %21 = arith.maximumf %19, %20 : vector<8x128xf32>
    %22 = vector.extract_strided_slice %9 {offsets = [32, 0], sizes = [8, 128], strides = [1, 1]} : vector<48x128xf32> to vector<8x128xf32>
    %23 = vector.broadcast %3 : f32 to vector<8x128xf32>
    %24 = arith.addf %22, %23 : vector<8x128xf32>
    %cst_5 = arith.constant 0.000000e+00 : f32
    %25 = vector.broadcast %cst_5 : f32 to vector<8x128xf32>
    %26 = arith.maximumf %24, %25 : vector<8x128xf32>
    %27 = vector.extract_strided_slice %9 {offsets = [40, 0], sizes = [8, 128], strides = [1, 1]} : vector<48x128xf32> to vector<8x128xf32>
    %28 = vector.broadcast %4 : f32 to vector<8x128xf32>
    %29 = arith.addf %27, %28 : vector<8x128xf32>
    %cst_6 = arith.constant 0.000000e+00 : f32
    %30 = vector.broadcast %cst_6 : f32 to vector<8x128xf32>
    %31 = arith.maximumf %29, %30 : vector<8x128xf32>
    %cst_7 = arith.constant 8.100000e+01 : f32
    %32 = vector.broadcast %cst_7 : f32 to vector<8x128xf32>
    %33 = arith.subf %10, %32 : vector<8x128xf32>
    %cst_8 = arith.constant 0.017214207 : f32
    %34 = vector.broadcast %cst_8 : f32 to vector<8x128xf32>
    %35 = arith.mulf %34, %33 : vector<8x128xf32>
    %36 = math.sin %35 : vector<8x128xf32>
    %37 = math.cos %35 : vector<8x128xf32>
    %cst_9 = arith.constant 2.345000e+01 : f32
    %38 = vector.broadcast %cst_9 : f32 to vector<8x128xf32>
    %39 = arith.mulf %38, %36 : vector<8x128xf32>
    %cst_10 = arith.constant 0.0174532924 : f32
    %40 = vector.broadcast %cst_10 : f32 to vector<8x128xf32>
    %41 = arith.mulf %40, %39 : vector<8x128xf32>
    %42 = math.sin %41 : vector<8x128xf32>
    %43 = math.cos %41 : vector<8x128xf32>
    %cst_11 = arith.constant 2.000000e+00 : f32
    %44 = vector.broadcast %cst_11 : f32 to vector<8x128xf32>
    %45 = arith.mulf %44, %36 : vector<8x128xf32>
    %46 = arith.mulf %45, %37 : vector<8x128xf32>
    %cst_12 = arith.constant 9.86999988 : f32
    %47 = vector.broadcast %cst_12 : f32 to vector<8x128xf32>
    %48 = arith.mulf %47, %46 : vector<8x128xf32>
    %cst_13 = arith.constant 7.530000e+00 : f32
    %49 = vector.broadcast %cst_13 : f32 to vector<8x128xf32>
    %50 = arith.mulf %49, %37 : vector<8x128xf32>
    %51 = arith.subf %48, %50 : vector<8x128xf32>
    %cst_14 = arith.constant 1.500000e+00 : f32
    %52 = vector.broadcast %cst_14 : f32 to vector<8x128xf32>
    %53 = arith.mulf %52, %36 : vector<8x128xf32>
    %54 = arith.subf %51, %53 : vector<8x128xf32>
    %cst_15 = arith.constant 1.200000e+02 : f32
    %55 = vector.broadcast %cst_15 : f32 to vector<8x128xf32>
    %56 = arith.subf %21, %55 : vector<8x128xf32>
    %cst_16 = arith.constant 4.000000e+00 : f32
    %57 = vector.broadcast %cst_16 : f32 to vector<8x128xf32>
    %58 = arith.mulf %57, %56 : vector<8x128xf32>
    %59 = arith.addf %58, %54 : vector<8x128xf32>
    %cst_17 = arith.constant 6.000000e+01 : f32
    %60 = vector.broadcast %cst_17 : f32 to vector<8x128xf32>
    %61 = arith.divf %59, %60 : vector<8x128xf32>
    %62 = arith.addf %11, %61 : vector<8x128xf32>
    %cst_18 = arith.constant 1.200000e+01 : f32
    %63 = vector.broadcast %cst_18 : f32 to vector<8x128xf32>
    %64 = arith.subf %62, %63 : vector<8x128xf32>
    %cst_19 = arith.constant 1.500000e+01 : f32
    %65 = vector.broadcast %cst_19 : f32 to vector<8x128xf32>
    %66 = arith.mulf %65, %64 : vector<8x128xf32>
    %cst_20 = arith.constant 0.0174532924 : f32
    %67 = vector.broadcast %cst_20 : f32 to vector<8x128xf32>
    %68 = arith.mulf %67, %66 : vector<8x128xf32>
    %69 = math.cos %68 : vector<8x128xf32>
    %cst_21 = arith.constant 0.0174532924 : f32
    %70 = vector.broadcast %cst_21 : f32 to vector<8x128xf32>
    %71 = arith.mulf %70, %16 : vector<8x128xf32>
    %72 = arith.mulf %69, %43 : vector<8x128xf32>
    %73 = math.cos %71 : vector<8x128xf32>
    %74 = arith.mulf %72, %73 : vector<8x128xf32>
    %75 = math.sin %71 : vector<8x128xf32>
    %76 = arith.mulf %42, %75 : vector<8x128xf32>
    %77 = arith.addf %74, %76 : vector<8x128xf32>
    %cst_22 = arith.constant 0.000000e+00 : f32
    %78 = vector.broadcast %cst_22 : f32 to vector<8x128xf32>
    %79 = arith.maximumf %77, %78 : vector<8x128xf32>
    %80 = arith.mulf %79, %26 : vector<8x128xf32>
    %81 = arith.addf %80, %31 : vector<8x128xf32>
    %c0_23 = arith.constant 0 : index
    %82 = arith.index_cast %6 : i32 to index
    %83 = vector.load %arg4[%c0_23, %82] : memref<8x256xf32, #tpu.memory_space<vmem>>, vector<8x128xf32>
    tpu.vector_store %arg4[%c0_23, %82], %81 {strides = array<i32>} : memref<8x256xf32, #tpu.memory_space<vmem>>, vector<8x128xf32>,
    %c1_i32 = arith.constant 1 : i32
    %c128_i32_24 = arith.constant 128 : i32
    %84 = arith.muli %c1_i32, %c128_i32_24 : i32
    %85 = tpu.assume_multiple %84, 128 : i32
    %86 = arith.index_cast %85 : i32 to index
    %c0_25 = arith.constant 0 : index
    %87 = vector.load %arg1[%86, %c0_25] : memref<256x144xf32, #tpu.memory_space<vmem>>, vector<128x144xf32>
    %cst_26 = arith.constant dense<0.000000e+00> : vector<48x128xf32>
    %88 = tpu.matmul %0, %87, %cst_26 {dimension_numbers = #tpu.dot_dimension_numbers<[1], [1], [0], [0], [0, 0, 1, 0], [], []>, precision = #tpu.contract_precision<fp32>} : vector<48x144xf32>, vector<128x144xf32>, vector<48x128xf32> -> vector<48x128xf32>
    %89 = vector.extract_strided_slice %88 {offsets = [0, 0], sizes = [8, 128], strides = [1, 1]} : vector<48x128xf32> to vector<8x128xf32>
    %90 = vector.extract_strided_slice %88 {offsets = [8, 0], sizes = [8, 128], strides = [1, 1]} : vector<48x128xf32> to vector<8x128xf32>
    %91 = vector.extract_strided_slice %88 {offsets = [16, 0], sizes = [8, 128], strides = [1, 1]} : vector<48x128xf32> to vector<8x128xf32>
    %92 = vector.broadcast %1 : f32 to vector<8x128xf32>
    %93 = arith.addf %91, %92 : vector<8x128xf32>
    %cst_27 = arith.constant 0.000000e+00 : f32
    %94 = vector.broadcast %cst_27 : f32 to vector<8x128xf32>
    %95 = arith.maximumf %93, %94 : vector<8x128xf32>
    %96 = vector.extract_strided_slice %88 {offsets = [24, 0], sizes = [8, 128], strides = [1, 1]} : vector<48x128xf32> to vector<8x128xf32>
    %97 = vector.broadcast %2 : f32 to vector<8x128xf32>
    %98 = arith.addf %96, %97 : vector<8x128xf32>
    %cst_28 = arith.constant 0.000000e+00 : f32
    %99 = vector.broadcast %cst_28 : f32 to vector<8x128xf32>
    %100 = arith.maximumf %98, %99 : vector<8x128xf32>
    %101 = vector.extract_strided_slice %88 {offsets = [32, 0], sizes = [8, 128], strides = [1, 1]} : vector<48x128xf32> to vector<8x128xf32>
    %102 = vector.broadcast %3 : f32 to vector<8x128xf32>
    %103 = arith.addf %101, %102 : vector<8x128xf32>
    %cst_29 = arith.constant 0.000000e+00 : f32
    %104 = vector.broadcast %cst_29 : f32 to vector<8x128xf32>
    %105 = arith.maximumf %103, %104 : vector<8x128xf32>
    %106 = vector.extract_strided_slice %88 {offsets = [40, 0], sizes = [8, 128], strides = [1, 1]} : vector<48x128xf32> to vector<8x128xf32>
    %107 = vector.broadcast %4 : f32 to vector<8x128xf32>
    %108 = arith.addf %106, %107 : vector<8x128xf32>
    %cst_30 = arith.constant 0.000000e+00 : f32
    %109 = vector.broadcast %cst_30 : f32 to vector<8x128xf32>
    %110 = arith.maximumf %108, %109 : vector<8x128xf32>
    %cst_31 = arith.constant 8.100000e+01 : f32
    %111 = vector.broadcast %cst_31 : f32 to vector<8x128xf32>
    %112 = arith.subf %89, %111 : vector<8x128xf32>
    %cst_32 = arith.constant 0.017214207 : f32
    %113 = vector.broadcast %cst_32 : f32 to vector<8x128xf32>
    %114 = arith.mulf %113, %112 : vector<8x128xf32>
    %115 = math.sin %114 : vector<8x128xf32>
    %116 = math.cos %114 : vector<8x128xf32>
    %cst_33 = arith.constant 2.345000e+01 : f32
    %117 = vector.broadcast %cst_33 : f32 to vector<8x128xf32>
    %118 = arith.mulf %117, %115 : vector<8x128xf32>
    %cst_34 = arith.constant 0.0174532924 : f32
    %119 = vector.broadcast %cst_34 : f32 to vector<8x128xf32>
    %120 = arith.mulf %119, %118 : vector<8x128xf32>
    %121 = math.sin %120 : vector<8x128xf32>
    %122 = math.cos %120 : vector<8x128xf32>
    %cst_35 = arith.constant 2.000000e+00 : f32
    %123 = vector.broadcast %cst_35 : f32 to vector<8x128xf32>
    %124 = arith.mulf %123, %115 : vector<8x128xf32>
    %125 = arith.mulf %124, %116 : vector<8x128xf32>
    %cst_36 = arith.constant 9.86999988 : f32
    %126 = vector.broadcast %cst_36 : f32 to vector<8x128xf32>
    %127 = arith.mulf %126, %125 : vector<8x128xf32>
    %cst_37 = arith.constant 7.530000e+00 : f32
    %128 = vector.broadcast %cst_37 : f32 to vector<8x128xf32>
    %129 = arith.mulf %128, %116 : vector<8x128xf32>
    %130 = arith.subf %127, %129 : vector<8x128xf32>
    %cst_38 = arith.constant 1.500000e+00 : f32
    %131 = vector.broadcast %cst_38 : f32 to vector<8x128xf32>
    %132 = arith.mulf %131, %115 : vector<8x128xf32>
    %133 = arith.subf %130, %132 : vector<8x128xf32>
    %cst_39 = arith.constant 1.200000e+02 : f32
    %134 = vector.broadcast %cst_39 : f32 to vector<8x128xf32>
    %135 = arith.subf %100, %134 : vector<8x128xf32>
    %cst_40 = arith.constant 4.000000e+00 : f32
    %136 = vector.broadcast %cst_40 : f32 to vector<8x128xf32>
    %137 = arith.mulf %136, %135 : vector<8x128xf32>
    %138 = arith.addf %137, %133 : vector<8x128xf32>
    %cst_41 = arith.constant 6.000000e+01 : f32
    %139 = vector.broadcast %cst_41 : f32 to vector<8x128xf32>
    %140 = arith.divf %138, %139 : vector<8x128xf32>
    %141 = arith.addf %90, %140 : vector<8x128xf32>
    %cst_42 = arith.constant 1.200000e+01 : f32
    %142 = vector.broadcast %cst_42 : f32 to vector<8x128xf32>
    %143 = arith.subf %141, %142 : vector<8x128xf32>
    %cst_43 = arith.constant 1.500000e+01 : f32
    %144 = vector.broadcast %cst_43 : f32 to vector<8x128xf32>
    %145 = arith.mulf %144, %143 : vector<8x128xf32>
    %cst_44 = arith.constant 0.0174532924 : f32
    %146 = vector.broadcast %cst_44 : f32 to vector<8x128xf32>
    %147 = arith.mulf %146, %145 : vector<8x128xf32>
    %148 = math.cos %147 : vector<8x128xf32>
    %cst_45 = arith.constant 0.0174532924 : f32
    %149 = vector.broadcast %cst_45 : f32 to vector<8x128xf32>
    %150 = arith.mulf %149, %95 : vector<8x128xf32>
    %151 = arith.mulf %148, %122 : vector<8x128xf32>
    %152 = math.cos %150 : vector<8x128xf32>
    %153 = arith.mulf %151, %152 : vector<8x128xf32>
    %154 = math.sin %150 : vector<8x128xf32>
    %155 = arith.mulf %121, %154 : vector<8x128xf32>
    %156 = arith.addf %153, %155 : vector<8x128xf32>
    %cst_46 = arith.constant 0.000000e+00 : f32
    %157 = vector.broadcast %cst_46 : f32 to vector<8x128xf32>
    %158 = arith.maximumf %156, %157 : vector<8x128xf32>
    %159 = arith.mulf %158, %105 : vector<8x128xf32>
    %160 = arith.addf %159, %110 : vector<8x128xf32>
    %c0_47 = arith.constant 0 : index
    %161 = arith.index_cast %85 : i32 to index
    %162 = vector.load %arg4[%c0_47, %161] : memref<8x256xf32, #tpu.memory_space<vmem>>, vector<8x128xf32>
    tpu.vector_store %arg4[%c0_47, %161], %160 {strides = array<i32>} : memref<8x256xf32, #tpu.memory_space<vmem>>, vector<8x128xf32>,
    %c2_i32 = arith.constant 2 : i32
    return
  }
  func.func @transform_0(%arg0: i32) -> (i32, i32) {
    %c0_i32 = arith.constant 0 : i32
    %c0_i32_0 = arith.constant 0 : i32
    return %arg0, %c0_i32 : i32, i32
  }
  func.func @transform_1(%arg0: i32) -> (i32, i32) {
    %c0_i32 = arith.constant 0 : i32
    %c0_i32_0 = arith.constant 0 : i32
    %c0_i32_1 = arith.constant 0 : i32
    return %c0_i32, %c0_i32_0 : i32, i32
  }
  func.func @transform_2(%arg0: i32) -> i32 {
    %c0_i32 = arith.constant 0 : i32
    %c0_i32_0 = arith.constant 0 : i32
    return %c0_i32 : i32
  }
  func.func @transform_3(%arg0: i32) -> (i32, i32) {
    %c0_i32 = arith.constant 0 : i32
    %c0_i32_0 = arith.constant 0 : i32
    return %c0_i32, %arg0 : i32, i32
  }
}

</mosaic_0001>

<bundles_post_ra>
// kernel: tpu_custom_call.1
= control target key start
LH: loop header
LB: loop body
LE: loop exit
PB: predicated region body
PF: predicated region fallthrough
CT: control target
= control target key end

     0   :  { %8 = vsyncpa [#allocation4], 0  ;;  %s6806_s0 = inlined_call_operand.vmem [shape: f32[512,144], index: 0, kind: input, shape index: {}]   ;;  %s6807_s1 = inlined_call_operand.vmem [shape: f32[48,144], index: 1, kind: input, shape index: {}]   ;;  %s6808_s2 = inlined_call_operand.vmem [shape: f32[4], index: 2, kind: input, shape index: {}]   ;;  %s6809_s3 = inlined_call_operand.hbm [shape: f32[8,512], index: 3, kind: output, shape index: {}]  }
   0x1   :  { %9 = vsyncpa [#allocation3], 0 }
   0x2   :  { %11 = vsyncpa [#allocation3 + $0x1], 0  ;;  %s4631_s12 = smov 0   ;;  %s4633_s13 = smov 0  }
   0x3   :  { %s4635_s14 = smov 0   ;;  %s4637_s15 = smov 0  }
   0x4 LB: > { %s4652_s16 = sadd.s32 4294967295, %s4601_s15   ;;  %s4287_s17 = sadd.s32 4294967294, %s4601_s15   ;;  %s4601_s15 = sphi %s4637_s15, %s7440_s15   ;;  %s4597_s14 = sphi %s4635_s14, %s7439_s14   ;;  %s4593_s13 = sphi %s4633_s13, %s7438_s13   ;;  %s4589_s12 = sphi %s4631_s12, %s7437_s12  }
   0x5   : > { %s4656_s18 = sadd.s32 1, %s4601_s15   ;;  %s92_s19 = sadd.s32 1, %s4597_s14 }
   0x6   : > { %s89_s20 = ssub.s32 %s4601_s15, %s4656_s18  ;;  %p102_p0 = scmp.ne.s32.totalorder %s4597_s14, %s4593_s13 }
   0x7   : > { %p90_p1 = scmp.eq.s32.totalorder %s89_s20, 0  ;;  %p103_p2 = scmp.eq.s32.totalorder %s4652_s16, 1 }
   0x8   : > { %p108_p3 = scmp.ne.s32.totalorder %s4593_s13, %s4589_s12  ;;  %p109_p4 = scmp.eq.s32.totalorder %s4287_s17, 1 }
   0x9   : > { %s4667_s21 = scalar_select %p90_p1, %s4597_s14, %s92_s19  }
   0xa   : > { %p4669_p5 = por %p103_p2, %p102_p0  ;;  %p4673_p6 = por %p109_p4, %p108_p3 }
   0xb   : > { %p4288_p7 = scmp.ge.s32.totalorder %s4601_s15, 1  ;;  %p116_p8 = scmp.lt.s32.totalorder %s4601_s15, 3 }
   0xc   : > { %p4448_p9 = scmp.eq.s32.totalorder %s4652_s16, 0  ;;  %s132_s27 = sshll.u32 %s6808_s2, 4  ;;  %s133_s27 = int_to_ptr.vmem [resolvable:$true] %s132_s27 }
   0xd   : > { %p4680_p10 = pnand %p4288_p7, %p116_p8  ;;  %s4522_s28 = scalar_lea.vmem %s133_s27, 16 }
   0xe   : > { %p4523_p13 = scmp.ne.s32.totalorder %s133_s27, %s4522_s28  ;;  %p4530_p3 = scmp.lt.s32.totalorder %s133_s27, %s133_s27 }
   0xf   : > { %p4440_p11 = pneg %p4680_p10  ;;  %p4531_p4 = scmp.lt.s32.totalorder %s4522_s28, %s4522_s28 }
  0x11   : > { %p4441_p12 = pnand %p4448_p9, %p4440_p11  ;;  %p4532_p7 = por %p4531_p4, %p4530_p3 }
  0x13   : > { %p4524_p0 = pneg %p4441_p12 }
  0x15   : > { %p4525_p1 = pnand %p4524_p0, %p4523_p13 }
  0x17   : > { %p4526_p2 = pneg %p4525_p1 }
  0x19   : > { %p4533_p8 = pnand %p4532_p7, %p4526_p2 }
  0x1b   : > { %4536 = shalt.err (!%p4533_p8)
}
  0x1c   : > { %s4603_s29 = smov [#allocation2]   ;;  %155 = sbr.rel (%p4680_p10) target bundleno = 848 (0x350), region = 32 }
  0x1d   : > { %4443 = dma.vmem_to_smem (!%p4441_p12), %s133_s27, 16, %s4603_s29, [#allocation4]  }
  0x21   : > { %4580 = dma.done.wait (%p4448_p9), [#allocation4], 16  }
  0x22   : > { %4582 = vsyncadd (%p4448_p9), [#allocation4], 4294967280 }
  0x23   : > { %161 = sfence }
  0x24   : > { %s4294_s30 = sshll.u32 %s4652_s16, 5  ;;  %vm240_vm0 = vcmask 130048   ;;  %v190_v0 = vld [vmem:[%s6807_s1 + $0x8] sm:$0xff]  ;;  %s6251_s24 = sld [smem:[#allocation2 + $0x1]] }
  0x25   : > { %p182_p11 = scmp.lt.s32.totalorder %s4294_s30, 63  ;;  %v4702_v1 = vsel %vm240_vm0, %v190_v0, 0  ;;  %s6471_s25 = sld [smem:[#allocation2 + $0x2]] }
  0x26   : > { %v4705_v2 = vand.u32 4294901760, %v4702_v1  ;;  %s6475_s26 = sld [smem:[#allocation2 + $0x3]]  ;;  %s178_s27 = sand.u32 1, %s4593_s13  }
  0x27   : > { %s7442_s30 = smov (!%p182_p11, %s4294_s30), 63  ;;  %s4293_s28 = sshll.u32 %s178_s27, 4 }
  0x28   : > { %7048 = vst [vmem:[#allocation8_spill] sm:$0xff] %v4705_v2  ;;  %719 = vmatprep.mubr.f32.mxu1 %v4705_v2  ;;  %s4400_s6 = sshll.u32 %s7442_s30, 4  ;;  %s6521_s29 = scalar_lea.vmem [#allocation5], %s4293_s28 }
  0x29   : > { %s4711_s9 = scalar_lea.vmem %s6806_s0, %s4400_s6  ;;  %s4401_s30 = sshll.u32 %s4652_s16, 8 }
  0x2a   : > { %v239_v3 = vld [vmem:[%s4711_s9 + $0xf8] sm:$0xff]  ;;  %v238_v4 = vld [vmem:[%s4711_s9 + $0xf0] sm:$0xff]  ;;  %v237_v5 = vld [vmem:[%s4711_s9 + $0xe8] sm:$0xff]  ;;  %s4215_s4 = sshll.u32 %s6521_s29, 4  ;;  %s4213_s7 = scalar_lea.hbm %s6809_s3, %s4401_s30  ;;  %s4216_s4 = int_to_ptr.vmem [resolvable:$true] %s4215_s4 }
  0x2b   : > { %v305_v6 = vsel %vm240_vm0, %v239_v3, 0  ;;  %v4717_v7 = vand.u32 4294901760, %v238_v4  ;;  %v302_v8 = vsel %vm240_vm0, %v237_v5, 0  ;;  %v236_v9 = vld [vmem:[%s4711_s9 + $0xe0] sm:$0xff]  ;;  %v235_v10 = vld [vmem:[%s4711_s9 + $0xd8] sm:$0xff]  ;;  %v234_v11 = vld [vmem:[%s4711_s9 + $0xd0] sm:$0xff] }
  0x2c   : > { %v4723_v12 = vand.u32 4294901760, %v305_v6  ;;  %v4725_v13 = vand.u32 4294901760, %v302_v8  ;;  %v4727_v14 = vand.u32 4294901760, %v236_v9  ;;  %v299_v15 = vsel %vm240_vm0, %v235_v10, 0  ;;  %v233_v16 = vld [vmem:[%s4711_s9 + $0xc8] sm:$0xff]  ;;  %v232_v21 = vld [vmem:[%s4711_s9 + $0xc0] sm:$0xff] }
  0x2d   : > { %v4731_v17 = vand.u32 4294901760, %v299_v15  ;;  %v4733_v18 = vand.u32 4294901760, %v234_v11  ;;  %v4736_v19 = vsub.f32 %v238_v4, %v4717_v7  ;;  %v296_v20 = vsel %vm240_vm0, %v233_v16, 0  ;;  %v231_v22 = vld [vmem:[%s4711_s9 + $0xb8] sm:$0xff]  ;;  %v229_v30 = vld [vmem:[%s4711_s9 + $0xa8] sm:$0xff]  ;;  %v230_v35 = vld [vmem:[%s4711_s9 + $0xb0] sm:$0xff] }
  0x2e   : > { %308 = vmatprep.subr.mxu0 %v4723_v12  ;;  %v4743_v23 = vsub.f32 %v305_v6, %v4723_v12  ;;  %v4745_v24 = vand.u32 4294901760, %v296_v20  ;;  %v4748_v25 = vsub.f32 %v302_v8, %v4725_v13  ;;  %v4753_v27 = vsub.f32 %v236_v9, %v4727_v14  ;;  %v228_v48 = vld [vmem:[%s4711_s9 + $0xa0] sm:$0xff]  ;;  %v227_v49 = vld [vmem:[%s4711_s9 + $0x98] sm:$0xff]  ;;  %v225_v60 = vld [vmem:[%s4711_s9 + $0x88] sm:$0xff]  ;;  %s4201_s8 = scalar_lea.sflag [#allocation3], %s178_s27  ;;  %s4537_s10 = scalar_lea.vmem %s4216_s4, 256 }
  0x2f   : > { %310 = vmatpush1.xpose.msra.mxu0 %v4717_v7  ;;  %v6823_v26 = vand.u32 4294901760, %v4736_v19  ;;  %v293_v28 = vsel %vm240_vm0, %v231_v22, 0  ;;  %v4757_v29 = vsub.f32 %v299_v15, %v4731_v17  ;;  %v4763_v33 = vand.u32 4294901760, %v232_v21  ;;  %v226_v6 = vld [vmem:[%s4711_s9 + $0x90] sm:$0xff]  ;;  %v223_v16 = vld [vmem:[%s4711_s9 + $0x78] sm:$0xff]  ;;  %p4538_p9 = scmp.ne.s32.totalorder %s4216_s4, %s4537_s10  ;;  %s4610_s11 = smov [#allocation5]  }
  0x30   : > { %312 = vmatprep.subr.mxu0 %v4725_v13  ;;  %v6826_v31 = vand.u32 4294901760, %v4743_v23  ;;  %v6822_v32 = vand.u32 4294901760, %v4748_v25  ;;  %v4765_v34 = vand.u32 4294901760, %v293_v28  ;;  %v6821_v37 = vand.u32 4294901760, %v4753_v27  ;;  %s4541_s17 = sshll.u32 %s4610_s11, 4  ;;  %s4542_s17 = int_to_ptr.vmem [resolvable:$false] %s4541_s17 }
  0x31   : > { %v503_v36 = vsub.f32 %v4736_v19, %v6823_v26  ;;  %v6820_v38 = vand.u32 4294901760, %v4757_v29  ;;  %v4774_v39 = vsub.f32 %v234_v11, %v4733_v18  ;;  %v290_v42 = vsel %vm240_vm0, %v229_v30, 0  ;;  %p4539_p10 = pnand %p4538_p9, %p4669_p5  ;;  %s4543_s16 = scalar_lea.vmem %s4542_s17, 512 }
  0x32   : > { %v497_v40 = vsub.f32 %v4743_v23, %v6826_v31  ;;  %v509_v41 = vsub.f32 %v4748_v25, %v6822_v32  ;;  %v4784_v43 = vsub.f32 %v296_v20, %v4745_v24  ;;  %v515_v45 = vsub.f32 %v4753_v27, %v6821_v37  ;;  %p4544_p13 = scmp.lt.s32.totalorder %s4216_s4, %s4542_s17  ;;  %p4545_p0 = scmp.lt.s32.totalorder %s4543_s16, %s4537_s10 }
  0x33   : > { %314 = vmatpush1.xpose.msra.mxu0 %v4727_v14  ;;  %v504_v44 = vand.u32 4294901760, %v503_v36  ;;  %v4790_v46 = vand.u32 4294901760, %v230_v35  ;;  %v6818_v47 = vand.u32 4294901760, %v4774_v39  ;;  %v521_v52 = vsub.f32 %v4757_v29, %v6820_v38  ;;  %p4540_p12 = pneg %p4539_p10 }
  0x34   : > { %316 = vmatprep.subr.mxu0 %v4731_v17  ;;  %v498_v50 = vand.u32 4294901760, %v497_v40  ;;  %v510_v51 = vand.u32 4294901760, %v509_v41  ;;  %v6817_v53 = vand.u32 4294901760, %v4784_v43  ;;  %v4803_v55 = vand.u32 4294901760, %v290_v42  ;;  %p4546_p1 = por %p4545_p0, %p4544_p13 }
  0x35   : > { %v527_v54 = vsub.f32 %v4774_v39, %v6818_v47  ;;  %v4805_v56 = vand.u32 4294901760, %v228_v48  ;;  %v4808_v57 = vsub.f32 %v232_v21, %v4763_v33  ;;  %v287_v58 = vsel %vm240_vm0, %v227_v49, 0 }
  0x36   : > { %499 = vmatprep.subr.mxu1 %v498_v50  ;;  %v4812_v59 = vsub.f32 %v293_v28, %v4765_v34  ;;  %v516_v61 = vand.u32 4294901760, %v515_v45  ;;  %v4816_v62 = vand.u32 4294901760, %v287_v58  ;;  %v4819_v63 = vsub.f32 %v230_v35, %v4790_v46  ;;  %v224_v28 = vld [vmem:[%s4711_s9 + $0x80] sm:$0xff]  ;;  %p4547_p2 = pnand %p4546_p1, %p4540_p12 }
  0x37   : > { %318 = vmatpush1.xpose.msra.mxu0 %v4733_v18  ;;  %505 = vmatpush1.xpose.msra.mxu1 %v504_v44  ;;  %v522_v0 = vand.u32 4294901760, %v521_v52  ;;  %v533_v3 = vsub.f32 %v4784_v43, %v6817_v53  ;;  %v6815_v4 = vand.u32 4294901760, %v4808_v57  ;;  %v284_v8 = vsel %vm240_vm0, %v225_v60, 0  ;;  %v222_v52 = vld [vmem:[%s4711_s9 + $0x70] sm:$0xff] }
  0x38   : > { %7049 = vst [vmem:[#allocation9_spill] sm:$0xff] %v4816_v62  ;;  %320 = vmatprep.subr.mxu0 %v4745_v24  ;;  %511 = vmatprep.subr.mxu1 %v510_v51  ;;  %v6814_v5 = vand.u32 4294901760, %v4812_v59  ;;  %v4830_v9 = vsub.f32 %v290_v42, %v4803_v55  ;;  %v528_v10 = vand.u32 4294901760, %v527_v54  ;;  %v6813_v11 = vand.u32 4294901760, %v4819_v63 }
  0x39   : > { %v4834_v15 = vsub.f32 %v228_v48, %v4805_v56  ;;  %v539_v20 = vsub.f32 %v4808_v57, %v6815_v4  ;;  %v4841_v21 = vand.u32 4294901760, %v226_v6  ;;  %v4846_v30 = vsub.f32 %v287_v58, %v4816_v62  ;;  %v221_v48 = vld [vmem:[%s4711_s9 + $0x68] sm:$0xff] }
  0x3a   : > { %v6812_v22 = vand.u32 4294901760, %v4830_v9  ;;  %v534_v35 = vand.u32 4294901760, %v533_v3  ;;  %v545_v36 = vsub.f32 %v4812_v59, %v6814_v5  ;;  %v4852_v40 = vand.u32 4294901760, %v284_v8  ;;  %v219_v3 = vld [vmem:[%s4711_s9 + $0x58] sm:$0xff] }
  0x3b   : > { %322 = vmatpush1.xpose.msra.mxu0 %v4763_v33  ;;  %517 = vmatpush1.xpose.msra.mxu1 %v516_v61  ;;  %7050 = vst [vmem:[#allocation10_spill] sm:$0xff] %v4841_v21  ;;  %v281_v41 = vsel %vm240_vm0, %v223_v16, 0  ;;  %v551_v42 = vsub.f32 %v4819_v63, %v6813_v11  ;;  %v4858_v44 = vand.u32 4294901760, %v224_v28  ;;  %v6810_v45 = vand.u32 4294901760, %v4834_v15 }
  0x3c   : > { %324 = vmatprep.subr.mxu0 %v4765_v34  ;;  %523 = vmatprep.subr.mxu1 %v522_v0  ;;  %7051 = vst [vmem:[#allocation11_spill] sm:$0xff] %v4852_v40  ;;  %v540_v49 = vand.u32 4294901760, %v539_v20  ;;  %v557_v50 = vsub.f32 %v4830_v9, %v6812_v22  ;;  %v6811_v51 = vand.u32 4294901760, %v4846_v30  ;;  %v4869_v54 = vsub.f32 %v226_v6, %v4841_v21 }
  0x3d   : > { %7052 = vst [vmem:[#allocation12_spill] sm:$0xff] %v4858_v44  ;;  %v546_v58 = vand.u32 4294901760, %v545_v36  ;;  %v4872_v60 = vand.u32 4294901760, %v281_v41  ;;  %v4875_v61 = vsub.f32 %v284_v8, %v4852_v40  ;;  %v278_v0 = vsel %vm240_vm0, %v221_v48, 0  ;;  %v220_v36 = vld [vmem:[%s4711_s9 + $0x60] sm:$0xff] }
  0x3e   : > { %v563_v6 = vsub.f32 %v4834_v15, %v6810_v45  ;;  %v4882_v16 = vand.u32 4294901760, %v222_v52  ;;  %v558_v20 = vand.u32 4294901760, %v557_v50  ;;  %v569_v8 = vsub.f32 %v4846_v30, %v6811_v51  ;;  %v217_v51 = vld [vmem:[%s4711_s9 + $0x48] sm:$0xff] }
  0x3f   : > { %326 = vmatpush1.xpose.msra.mxu0 %v4790_v46  ;;  %529 = vmatpush1.xpose.msra.mxu1 %v528_v10  ;;  %7053 = vst [vmem:[#allocation13_spill] sm:$0xff] %v4872_v60  ;;  %v552_v10 = vand.u32 4294901760, %v551_v42  ;;  %v4891_v42 = vsub.f32 %v224_v28, %v4858_v44  ;;  %v4894_v48 = vand.u32 4294901760, %v278_v0  ;;  %v6819_v45 = vand.u32 4294901760, %v4875_v61 }
  0x40   : > { %328 = vmatprep.subr.mxu0 %v4803_v55  ;;  %535 = vmatprep.subr.mxu1 %v534_v35  ;;  %7054 = vst [vmem:[#allocation14_spill] sm:$0xff] %v4882_v16  ;;  %v6816_v35 = vand.u32 4294901760, %v4869_v54  ;;  %v4899_v50 = vsub.f32 %v281_v41, %v4872_v60  ;;  %v4904_v22 = vsub.f32 %v4702_v1, %v4705_v2  ;;  %v564_v28 = vand.u32 4294901760, %v563_v6  ;;  %v218_v1 = vld [vmem:[%s4711_s9 + $0x50] sm:$0xff] }
  0x41   : > { %7055 = vst [vmem:[#allocation15_spill] sm:$0xff] %v4894_v48  ;;  %v4906_v11 = vand.u32 4294901760, %v220_v36  ;;  %v570_v5 = vand.u32 4294901760, %v569_v8  ;;  %v4926_v8 = vsub.f32 %v278_v0, %v4894_v48  ;;  %v4931_v53 = vand.u32 4294901760, %v218_v1 }
  0x42   : > { %7056 = vst [vmem:[#allocation16_spill] sm:$0xff] %v4899_v50  ;;  %7057 = vst [vmem:[#allocation17_spill] sm:$0xff] %v4904_v22  ;;  %v575_v41 = vsub.f32 %v4869_v54, %v6816_v35  ;;  %v6825_v6 = vand.u32 4294901760, %v4899_v50  ;;  %v4929_v35 = vand.u32 4294901760, %v4904_v22 }
  0x43   : > { %330 = vmatpush1.xpose.msra.mxu0 %v4805_v56  ;;  %541 = vmatpush1.xpose.msra.mxu1 %v540_v49  ;;  %v275_v49 = vsel %vm240_vm0, %v219_v3, 0  ;;  %7058 = vst [vmem:[#allocation18_spill] sm:$0xff] %v4906_v11  ;;  %v6824_v3 = vand.u32 4294901760, %v4891_v42  ;;  %7061 = vst [vmem:[#allocation21_spill] sm:$0xff] %v4926_v8  ;;  %v4942_v38 = vsub.f32 %v220_v36, %v4906_v11 }
  0x44   : > { %332 = vmatprep.subr.mxu0 %v4816_v62  ;;  %547 = vmatprep.subr.mxu1 %v546_v58  ;;  %v4909_v58 = vsub.f32 %v222_v52, %v4882_v16  ;;  %v4916_v4 = vand.u32 4294901760, %v275_v49  ;;  %v581_v52 = vsub.f32 %v4875_v61, %v6819_v45  ;;  %7062 = vst [vmem:[#allocation22_spill] sm:$0xff] %v4929_v35  ;;  %7063 = vst [vmem:[#allocation23_spill] sm:$0xff] %v4931_v53 }
  0x45   : > { %v576_v45 = vand.u32 4294901760, %v575_v41  ;;  %7065 = vst [vmem:[#allocation25_spill] sm:$0xff] %v4942_v38  ;;  %v593_v32 = vsub.f32 %v4899_v50, %v6825_v6  ;;  %v216_v41 = vld [vmem:[%s4711_s9 + $0x40] sm:$0xff]  ;;  %v406_v36 = vsub.f32 %v4904_v22, %v4929_v35  ;;  %v213_v6 = vld [vmem:[%s4711_s9 + $0x28] sm:$0xff] }
  0x46   : > { %7059 = vst [vmem:[#allocation19_spill] sm:$0xff] %v4909_v58  ;;  %7060 = vst [vmem:[#allocation20_spill] sm:$0xff] %v4916_v4  ;;  %v6827_v47 = vand.u32 4294901760, %v4909_v58  ;;  %v582_v37 = vand.u32 4294901760, %v581_v52  ;;  %v4951_v26 = vsub.f32 %v275_v49, %v4916_v4  ;;  %v4960_v52 = vsub.f32 %v218_v1, %v4931_v53  ;;  %v197_v50 = vld [vmem:[%s6807_s1 + $0x40] sm:$0xff] }
  0x47   : > { %334 = vmatpush1.xpose.msra.mxu0 %v4841_v21  ;;  %553 = vmatpush1.xpose.msra.mxu1 %v552_v10  ;;  %v272_v10 = vsel %vm240_vm0, %v217_v51, 0  ;;  %v587_v51 = vsub.f32 %v4891_v42, %v6824_v3  ;;  %v4964_v31 = vand.u32 4294901760, %v216_v41  ;;  %v7070_v1 = vand.u32 4294901760, %v4926_v8 }
  0x48   : > { %336 = vmatprep.subr.mxu0 %v4852_v40  ;;  %559 = vmatprep.subr.mxu1 %v558_v20  ;;  %v215_v20 = vld [vmem:[%s4711_s9 + $0x38] sm:$0xff]  ;;  %v4939_v0 = vand.u32 4294901760, %v272_v10  ;;  %7066 = vst [vmem:[#allocation26_spill] sm:$0xff] %v4951_v26  ;;  %7067 = vst [vmem:[#allocation27_spill] sm:$0xff] %v4960_v52  ;;  %v212_v40 = vld [vmem:[%s4711_s9 + $0x20] sm:$0xff] }
  0x49   : > { %v269_v3 = vsel %vm240_vm0, %v215_v20, 0  ;;  %v588_v49 = vand.u32 4294901760, %v587_v51  ;;  %7068 = vst [vmem:[#allocation28_spill] sm:$0xff] %v4964_v31  ;;  %v605_v2 = vsub.f32 %v4926_v8, %v7070_v1  ;;  %v214_v51 = vld [vmem:[%s4711_s9 + $0x30] sm:$0xff]  ;;  %v4979_v20 = vand.u32 4294901760, %v406_v36  ;;  %v192_v36 = vld [vmem:[%s6807_s1 + $0x18] sm:$0xff] }
  0x4a   : > { %7064 = vst [vmem:[#allocation24_spill] sm:$0xff] %v4939_v0  ;;  %v4987_v1 = vand.u32 4294901760, %v214_v51  ;;  %v194_v8 = vld [vmem:[%s6807_s1 + $0x28] sm:$0xff] }
  0x4b   : > { %338 = vmatpush1.xpose.msra.mxu0 %v4858_v44  ;;  %565 = vmatpush1.xpose.msra.mxu1 %v564_v28  ;;  %v4968_v28 = vsub.f32 %v272_v10, %v4939_v0  ;;  %7072 = vst [vmem:[#allocation31_spill] sm:$0xff] %v4979_v20 }
  0x4c   : > { %340 = vmatprep.subr.mxu0 %v4872_v60  ;;  %571 = vmatprep.subr.mxu1 %v570_v5  ;;  %v599_v5 = vsub.f32 %v4909_v58, %v6827_v47  ;;  %v594_v47 = vand.u32 4294901760, %v593_v32  ;;  %v266_v60 = vsel %vm240_vm0, %v213_v6, 0  ;;  %v7073_v32 = vand.u32 4294901760, %v4942_v38  ;;  %7074 = vst [vmem:[#allocation32_spill] sm:$0xff] %v4987_v1 }
  0x4d   : > { %7069 = vst [vmem:[#allocation29_spill] sm:$0xff] %v4968_v28  ;;  %v4992_v6 = vsub.f32 %v216_v41, %v4964_v31  ;;  %v5001_v44 = vand.u32 4294901760, %v266_v60  ;;  %408 = vmatprep.mubr.f32.mxu0 %v4979_v20 }
  0x4e   : > { %v600_v10 = vand.u32 4294901760, %v599_v5  ;;  %v606_v5 = vand.u32 4294901760, %v605_v2  ;;  %v209_v2 = vld [vmem:[%s4711_s9 + $0x8] sm:$0xff] }
  0x4f   : > { %342 = vmatpush1.xpose.msra.mxu0 %v4882_v16  ;;  %577 = vmatpush1.xpose.msra.mxu1 %v576_v45  ;;  %v4974_v16 = vand.u32 4294901760, %v269_v3  ;;  %7075 = vst [vmem:[#allocation33_spill] sm:$0xff] %v4992_v6  ;;  %7077 = vst [vmem:[#allocation34_spill] sm:$0xff] %v5001_v44 }
  0x50   : > { %344 = vmatprep.subr.mxu0 %v4894_v48  ;;  %583 = vmatprep.subr.mxu1 %v582_v37  ;;  %v211_v48 = vld [vmem:[%s4711_s9 + $0x18] sm:$0xff]  ;;  %v611_v37 = vsub.f32 %v4942_v38, %v7073_v32  ;;  %v260_v38 = vsel %vm240_vm0, %v209_v2, 0 }
  0x51   : > { %7071 = vst [vmem:[#allocation30_spill] sm:$0xff] %v4974_v16  ;;  %v5004_v45 = vsub.f32 %v269_v3, %v4974_v16  ;;  %v263_v41 = vsel %vm240_vm0, %v211_v48, 0  ;;  %v7081_v48 = vand.u32 4294901760, %v4968_v28 }
  0x52   : > { %v612_v3 = vand.u32 4294901760, %v611_v37  ;;  %v7088_v37 = vand.u32 4294901760, %v4992_v6 }
  0x53   : > { %346 = vmatpush1.xpose.msra.mxu0 %v4906_v11  ;;  %589 = vmatpush1.xpose.msra.mxu1 %v588_v49  ;;  %v7076_v49 = vand.u32 4294901760, %v4951_v26  ;;  %7078 = vst [vmem:[#allocation35_spill] sm:$0xff] %v5004_v45  ;;  %v7079_v11 = vand.u32 4294901760, %v4960_v52  ;;  %v629_v20 = vsub.f32 %v4968_v28, %v7081_v48  ;;  %v5035_v48 = vsub.f32 %v266_v60, %v5001_v44 }
  0x54   : > { %348 = vmatprep.subr.mxu0 %v4916_v4  ;;  %595 = vmatprep.subr.mxu1 %v594_v47  ;;  %v5011_v47 = vand.u32 4294901760, %v212_v40  ;;  %v635_v2 = vsub.f32 %v4992_v6, %v7088_v37  ;;  %v7090_v35 = vand.u32 4294901760, %v5004_v45 }
  0x55   : > { %v617_v32 = vsub.f32 %v4951_v26, %v7076_v49  ;;  %v623_v4 = vsub.f32 %v4960_v52, %v7079_v11  ;;  %v189_v49 = vld [vmem:[%s6807_s1] sm:$0xff]  ;;  %v245_v26 = vsel %vm240_vm0, %v192_v36, 0  ;;  %v210_v11 = vld [vmem:[%s4711_s9 + $0x10] sm:$0xff]  ;;  %v5025_v52 = vsub.f32 %v214_v51, %v4987_v1  ;;  %7084 = vst [vmem:[#allocation39_spill] sm:$0xff] %v5035_v48 }
  0x56   : > { %7080 = vst [vmem:[#allocation36_spill] sm:$0xff] %v5011_v47  ;;  %v5038_v51 = vand.u32 4294901760, %v189_v49  ;;  %v5040_v28 = vand.u32 4294901760, %v210_v11  ;;  %v5042_v21 = vand.u32 4294901760, %v245_v26  ;;  %v630_v60 = vand.u32 4294901760, %v629_v20 }
  0x57   : > { %350 = vmatpush1.xpose.msra.mxu0 %v4931_v53  ;;  %601 = vmatpush1.xpose.msra.mxu1 %v600_v10  ;;  %7082 = vst [vmem:[#allocation37_spill] sm:$0xff] %v5025_v52  ;;  %v618_v36 = vand.u32 4294901760, %v617_v32  ;;  %v5031_v10 = vand.u32 4294901760, %v263_v41  ;;  %v624_v53 = vand.u32 4294901760, %v623_v4  ;;  %v248_v32 = vsel %vm240_vm0, %v194_v8, 0 }
  0x58   : > { %352 = vmatprep.subr.mxu0 %v4939_v0  ;;  %607 = vmatprep.subr.mxu1 %v606_v5  ;;  %7085 = vst [vmem:[#allocation40_spill] sm:$0xff] %v5038_v51  ;;  %7086 = vst [vmem:[#allocation41_spill] sm:$0xff] %v5040_v28  ;;  %v191_v5 = vld [vmem:[%s6807_s1 + $0x10] sm:$0xff]  ;;  %v208_v0 = vld [vmem:[%s4711_s9] sm:$0xff]  ;;  %v5055_v58 = vsub.f32 %v212_v40, %v5011_v47  ;;  %v641_v8 = vsub.f32 %v5004_v45, %v7090_v35  ;;  %v7098_v20 = vand.u32 4294901760, %v5025_v52 }
  0x59   : > { %7083 = vst [vmem:[#allocation38_spill] sm:$0xff] %v5031_v10  ;;  %7087 = vst [vmem:[#allocation42_spill] sm:$0xff] %v5042_v21  ;;  %v5067_v37 = vand.u32 4294901760, %v191_v5  ;;  %v5069_v4 = vand.u32 4294901760, %v208_v0  ;;  %v5072_v40 = vsub.f32 %v189_v49, %v5038_v51  ;;  %v193_v35 = vld [vmem:[%s6807_s1 + $0x20] sm:$0xff]  ;;  %v5088_v6 = vsub.f32 %v210_v11, %v5040_v28 }
  0x5a   : > { %7089 = vst [vmem:[#allocation43_spill] sm:$0xff] %v5055_v58  ;;  %v647_v45 = vsub.f32 %v5025_v52, %v7098_v20  ;;  %v642_v62 = vand.u32 4294901760, %v641_v8  ;;  %v5104_v49 = vand.u32 4294901760, %v193_v35 }
  0x5b   : > { %354 = vmatpush1.xpose.msra.mxu0 %v4964_v31  ;;  %613 = vmatpush1.xpose.msra.mxu1 %v612_v3  ;;  %v5061_v31 = vand.u32 4294901760, %v260_v38  ;;  %v5065_v3 = vsub.f32 %v263_v41, %v5031_v10  ;;  %7093 = vst [vmem:[#allocation46_spill] sm:$0xff] %v5067_v37  ;;  %7094 = vst [vmem:[#allocation47_spill] sm:$0xff] %v5069_v4  ;;  %v636_v41 = vand.u32 4294901760, %v635_v2  ;;  %v5107_v52 = vand.u32 4294901760, %v5072_v40 }
  0x5c   : > { %356 = vmatprep.subr.mxu0 %v4974_v16  ;;  %619 = vmatprep.subr.mxu1 %v618_v36  ;;  %7095 = vst [vmem:[#allocation48_spill] sm:$0xff] %v5072_v40  ;;  %v5075_v36 = vsub.f32 %v245_v26, %v5042_v21  ;;  %v5077_v16 = vand.u32 4294901760, %v248_v32  ;;  %7099 = vst [vmem:[#allocation51_spill] sm:$0xff] %v5088_v6  ;;  %v196_v26 = vld [vmem:[%s6807_s1 + $0x38] sm:$0xff]  ;;  %v5102_v11 = vsub.f32 %v191_v5, %v5067_v37 }
  0x5d   : > { %7091 = vst [vmem:[#allocation44_spill] sm:$0xff] %v5061_v31  ;;  %7092 = vst [vmem:[#allocation45_spill] sm:$0xff] %v5065_v3  ;;  %v5099_v20 = vsub.f32 %v260_v38, %v5061_v31  ;;  %v251_v8 = vsel %vm240_vm0, %v196_v26, 0  ;;  %v7106_v38 = vand.u32 4294901760, %v5055_v58  ;;  %v198_v26 = vld [vmem:[%s6807_s1 + $0x48] sm:$0xff] }
  0x5e   : > { %7096 = vst [vmem:[#allocation49_spill] sm:$0xff] %v5075_v36  ;;  %7097 = vst [vmem:[#allocation50_spill] sm:$0xff] %v5077_v16 }
  0x5f   : > { %358 = vmatpush1.xpose.msra.mxu0 %v4987_v1  ;;  %625 = vmatpush1.xpose.msra.mxu1 %v624_v53  ;;  %v7100_v53 = vand.u32 4294901760, %v5035_v48  ;;  %7101 = vst [vmem:[#allocation52_spill] sm:$0xff] %v5099_v20  ;;  %7102 = vst [vmem:[#allocation53_spill] sm:$0xff] %v5102_v11  ;;  %v659_v1 = vsub.f32 %v5055_v58, %v7106_v38  ;;  %v5139_v58 = vsub.f32 %v193_v35, %v5104_v49 }
  0x60   : > { %360 = vmatprep.subr.mxu0 %v5001_v44  ;;  %631 = vmatprep.subr.mxu1 %v630_v60  ;;  %7103 = vst [vmem:[#allocation54_spill] sm:$0xff] %v5104_v49  ;;  %7104 = vst [vmem:[#allocation55_spill] sm:$0xff] %v5107_v52  ;;  %v5110_v60 = vsub.f32 %v248_v32, %v5077_v16  ;;  %v5119_v44 = vsub.f32 %v208_v0, %v5069_v4  ;;  %v195_v32 = vld [vmem:[%s6807_s1 + $0x30] sm:$0xff]  ;;  %v5133_v0 = vand.u32 4294901760, %v5075_v36 }
  0x61   : > { %v653_v2 = vsub.f32 %v5035_v48, %v7100_v53  ;;  %v648_v53 = vand.u32 4294901760, %v647_v45  ;;  %7111 = vst [vmem:[#allocation60_spill] sm:$0xff] %v5139_v58  ;;  %v5141_v48 = vand.u32 4294901760, %v251_v8  ;;  %v660_v5 = vand.u32 4294901760, %v659_v1 }
  0x62   : > { %7105 = vst [vmem:[#allocation56_spill] sm:$0xff] %v5110_v60  ;;  %7107 = vst [vmem:[#allocation57_spill] sm:$0xff] %v5119_v44  ;;  %v7115_v1 = vand.u32 4294901760, %v5099_v20  ;;  %v5166_v35 = vand.u32 4294901760, %v5110_v60 }
  0x63   : > { %362 = vmatpush1.xpose.msra.mxu0 %v5011_v47  ;;  %637 = vmatpush1.xpose.msra.mxu1 %v636_v41  ;;  %v654_v45 = vand.u32 4294901760, %v653_v2  ;;  %v7108_v41 = vand.u32 4294901760, %v5065_v3  ;;  %7109 = vst [vmem:[#allocation58_spill] sm:$0xff] %v5133_v0  ;;  %v5136_v47 = vand.u32 4294901760, %v5102_v11  ;;  %7112 = vst [vmem:[#allocation61_spill] sm:$0xff] %v5141_v48  ;;  %v5145_v2 = vand.u32 4294901760, %v195_v32 }
  0x64   : > { %364 = vmatprep.subr.mxu0 %v5031_v10  ;;  %643 = vmatprep.subr.mxu1 %v642_v62  ;;  %v412_v62 = vsub.f32 %v5072_v40, %v5107_v52  ;;  %v7114_v10 = vand.u32 4294901760, %v5088_v6  ;;  %v200_v52 = vld [vmem:[%s6807_s1 + $0x58] sm:$0xff]  ;;  %7116 = vst [vmem:[#allocation63_spill] sm:$0xff] %v5166_v35  ;;  %v5171_v40 = vand.u32 4294901760, %v5139_v58 }
  0x65   : > { %v665_v38 = vsub.f32 %v5065_v3, %v7108_v41  ;;  %7110 = vst [vmem:[#allocation59_spill] sm:$0xff] %v5136_v47  ;;  %7113 = vst [vmem:[#allocation62_spill] sm:$0xff] %v5145_v2  ;;  %v254_v41 = vsel %vm240_vm0, %v198_v26, 0 }
  0x66   : > { %v671_v3 = vsub.f32 %v5088_v6, %v7114_v10  ;;  %v421_v10 = vsub.f32 %v5075_v36, %v5133_v0  ;;  %7117 = vst [vmem:[#allocation64_spill] sm:$0xff] %v5171_v40  ;;  %v5183_v0 = vand.u32 4294901760, %v197_v50  ;;  %v257_v36 = vsel %vm240_vm0, %v200_v52, 0 }
  0x67   : > { %366 = vmatpush1.xpose.msra.mxu0 %v5040_v28  ;;  %649 = vmatpush1.xpose.msra.mxu1 %v648_v53  ;;  %v666_v26 = vand.u32 4294901760, %v665_v38  ;;  %v677_v53 = vsub.f32 %v5099_v20, %v7115_v1  ;;  %v427_v28 = vsub.f32 %v5102_v11, %v5136_v47  ;;  %v5178_v38 = vand.u32 4294901760, %v412_v62  ;;  %v199_v62 = vld [vmem:[%s6807_s1 + $0x50] sm:$0xff] }
  0x68   : > { %368 = vmatprep.subr.mxu0 %v5061_v31  ;;  %655 = vmatprep.subr.mxu1 %v654_v45  ;;  %v5174_v31 = vsub.f32 %v251_v8, %v5141_v48  ;;  %v5176_v45 = vand.u32 4294901760, %v254_v41  ;;  %v5181_v1 = vsub.f32 %v195_v32, %v5145_v2  ;;  %7122 = vst [vmem:[#allocation69_spill] sm:$0xff] %v5183_v0  ;;  %v672_v47 = vand.u32 4294901760, %v671_v3 }
  0x69   : > { %7120 = vst [vmem:[#allocation67_spill] sm:$0xff] %v5178_v38  ;;  %v7123_v11 = vand.u32 4294901760, %v5119_v44  ;;  %v678_v32 = vand.u32 4294901760, %v677_v53  ;;  %v5194_v20 = vand.u32 4294901760, %v421_v10  ;;  %v436_v52 = vsub.f32 %v5110_v60, %v5166_v35 }
  0x6a   : > { %7118 = vst [vmem:[#allocation65_spill] sm:$0xff] %v5174_v31  ;;  %7119 = vst [vmem:[#allocation66_spill] sm:$0xff] %v5176_v45  ;;  %v5201_v3 = vand.u32 4294901760, %v5174_v31  ;;  %v5212_v53 = vand.u32 4294901760, %v5181_v1  ;;  %v5215_v10 = vsub.f32 %v197_v50, %v5183_v0 }
  0x6b   : > { %7121 = vst [vmem:[#allocation68_spill] sm:$0xff] %v5181_v1  ;;  %370 = vmatpush1.xpose.msra.mxu0 %v5069_v4  ;;  %661 = vmatpush1.xpose.msra.mxu1 %v660_v5  ;;  %v683_v8 = vsub.f32 %v5119_v44, %v7123_v11  ;;  %7124 = vst [vmem:[#allocation70_spill] sm:$0xff] %v5194_v20  ;;  %v5198_v4 = vand.u32 4294901760, %v427_v28  ;;  %v5204_v11 = vsub.f32 %v254_v41, %v5176_v45 }
  0x6c   : > { %667 = vmatprep.subr.mxu1 %v666_v26  ;;  %763 = vmatprep.subr.mxu0 %v4743_v23  ;;  %7126 = vst [vmem:[#allocation72_spill] sm:$0xff] %v5201_v3  ;;  %v5206_v5 = vand.u32 4294901760, %v257_v36  ;;  %v442_v26 = vsub.f32 %v5139_v58, %v5171_v40  ;;  %7129 = vst [vmem:[#allocation75_spill] sm:$0xff] %v5212_v53  ;;  %v5217_v28 = vand.u32 4294901760, %v199_v62 }
  0x6d   : > { %7125 = vst [vmem:[#allocation71_spill] sm:$0xff] %v5198_v4  ;;  %7127 = vst [vmem:[#allocation73_spill] sm:$0xff] %v5204_v11  ;;  %v684_v41 = vand.u32 4294901760, %v683_v8  ;;  %v451_v40 = vsub.f32 %v5174_v31, %v5201_v3  ;;  %v5227_v35 = vand.u32 4294901760, %v5204_v11  ;;  %v457_v8 = vsub.f32 %v5181_v1, %v5212_v53 }
  0x6e   : > { %7128 = vst [vmem:[#allocation74_spill] sm:$0xff] %v5206_v5  ;;  %414 = vmatmul.mubr.f32.vlgmr.msra.gmra.mxu0 %v5178_v38  ;;  %7130 = vst [vmem:[#allocation76_spill] sm:$0xff] %v5215_v10  ;;  %v5222_v38 = vand.u32 4294901760, %v436_v52  ;;  %v5230_v50 = vsub.f32 %v257_v36, %v5206_v5  ;;  %v5241_v52 = vsub.f32 %v199_v62, %v5217_v28 }
  0x6f   : > { %7131 = vst [vmem:[#allocation77_spill] sm:$0xff] %v5217_v28  ;;  %673 = vmatpush1.xpose.msra.mxu1 %v672_v47  ;;  %766 = vmatpush1.xpose.msra.mxu0 %v4736_v19  ;;  %7133 = vst [vmem:[#allocation79_spill] sm:$0xff] %v5227_v35  ;;  %v5233_v47 = vand.u32 4294901760, %v442_v26  ;;  %v5247_v36 = vand.u32 4294901760, %v451_v40  ;;  %v466_v26 = vsub.f32 %v5204_v11, %v5227_v35  ;;  %v5256_v62 = vand.u32 4294901760, %v457_v8 }
  0x70   : > { %679 = vmatprep.subr.mxu1 %v678_v32  ;;  %769 = vmatprep.subr.mxu0 %v4748_v25  ;;  %7132 = vst [vmem:[#allocation78_spill] sm:$0xff] %v5222_v38  ;;  %7134 = vst [vmem:[#allocation80_spill] sm:$0xff] %v5230_v50  ;;  %v5238_v32 = vand.u32 4294901760, %v5215_v10 }
  0x71   : > { %423 = vmatprep.mubr.f32.mxu0 %v5194_v20  ;;  %7135 = vst [vmem:[#allocation81_spill] sm:$0xff] %v5233_v47  ;;  %7137 = vst [vmem:[#allocation83_spill] sm:$0xff] %v5241_v52  ;;  %v5261_v20 = vand.u32 4294901760, %v5241_v52  ;;  %v5269_v40 = vand.u32 4294901760, %v466_v26 }
  0x72   : > { %429 = vmatmul.mubr.f32.gmra.mxu0 %v5198_v4  ;;  %7136 = vst [vmem:[#allocation82_spill] sm:$0xff] %v5238_v32  ;;  %7138 = vst [vmem:[#allocation84_spill] sm:$0xff] %v5247_v36  ;;  %v5252_v4 = vand.u32 4294901760, %v5230_v50 }
  0x73   : > { %685 = vmatpush1.xpose.msra.mxu1 %v684_v41  ;;  %772 = vmatpush1.xpose.msra.mxu0 %v4753_v27  ;;  %7140 = vst [vmem:[#allocation86_spill] sm:$0xff] %v5256_v62  ;;  %v472_v41 = vsub.f32 %v5215_v10, %v5238_v32  ;;  %7141 = vst [vmem:[#allocation87_spill] sm:$0xff] %v5261_v20 }
  0x74   : > { %775 = vmatprep.subr.mxu0 %v4757_v29  ;;  %945 = vmatprep.subr.mxu1 %v4723_v12  ;;  %7139 = vst [vmem:[#allocation85_spill] sm:$0xff] %v5252_v4  ;;  %7142 = vst [vmem:[#allocation88_spill] sm:$0xff] %v5269_v40  ;;  %v481_v8 = vsub.f32 %v5230_v50, %v5252_v4 }
  0x75   : > { %438 = vmatprep.mubr.f32.mxu0 %v5222_v38  ;;  %v487_v38 = vsub.f32 %v5241_v52, %v5261_v20 }
  0x76   : > { %721 = vmatmul.mubr.f32.vlgmr.msra.gmra.mxu1 %v5038_v51  ;;  %444 = vmatmul.mubr.f32.gmra.mxu0 %v5233_v47  ;;  %v5275_v47 = vand.u32 4294901760, %v472_v41  ;;  %v5285_v26 = vand.u32 4294901760, %v481_v8  ;;  %v7147_v8 = vld [vmem:[#allocation9_spill] sm:$0xff]  ;;  %v7166_v51 = vld [vmem:[#allocation23_spill] sm:$0xff] }
  0x77   : > { %778 = vmatpush1.xpose.msra.mxu0 %v4774_v39  ;;  %947 = vmatpush1.xpose.msra.mxu1 %v4717_v7  ;;  %v5289_v41 = vand.u32 4294901760, %v487_v38  ;;  %v7146_v38 = vld [vmem:[#allocation16_spill] sm:$0xff] }
  0x78   : > { %781 = vmatprep.subr.mxu0 %v4784_v43  ;;  %949 = vmatprep.subr.mxu1 %v4725_v13  ;;  %7143 = vst [vmem:[#allocation89_spill] sm:$0xff] %v5275_v47  ;;  %7144 = vst [vmem:[#allocation90_spill] sm:$0xff] %v5285_v26 }
  0x79   : > { %726 = vmatprep.mubr.f32.mxu1 %v5042_v21  ;;  %453 = vmatprep.mubr.f32.mxu0 %v5247_v36  ;;  %7145 = vst [vmem:[#allocation91_spill] sm:$0xff] %v5289_v41  ;;  %v7154_v36 = vld [vmem:[#allocation12_spill] sm:$0xff]  ;;  %v7165_v21 = vld [vmem:[#allocation37_spill] sm:$0xff] }
  0x7a   : > { %728 = vmatmul.mubr.f32.gmra.mxu1 %v5067_v37  ;;  %459 = vmatmul.mubr.f32.gmra.mxu0 %v5256_v62  ;;  %v7153_v62 = vld [vmem:[#allocation25_spill] sm:$0xff]  ;;  %v7164_v37 = vld [vmem:[#allocation20_spill] sm:$0xff] }
  0x7b   : > { %784 = vmatpush1.xpose.msra.mxu0 %v4808_v57  ;;  %951 = vmatpush1.xpose.msra.mxu1 %v4727_v14 }
  0x7c   : > { %787 = vmatprep.subr.mxu0 %v4812_v59  ;;  %953 = vmatprep.subr.mxu1 %v4731_v17 }
  0x7d   : > { %733 = vmatprep.mubr.f32.mxu1 %v5077_v16  ;;  %468 = vmatprep.mubr.f32.mxu0 %v5269_v40  ;;  %v7152_v40 = vld [vmem:[#allocation11_spill] sm:$0xff] }
  0x7e   : > { %735 = vmatmul.mubr.f32.gmra.mxu1 %v5104_v49  ;;  %474 = vmatmul.mubr.f32.gmra.mxu0 %v5275_v47  ;;  %v7151_v47 = vld [vmem:[#allocation21_spill] sm:$0xff]  ;;  %v7162_v49 = vld [vmem:[#allocation18_spill] sm:$0xff]  ;;  %v7163_v16 = vld [vmem:[#allocation35_spill] sm:$0xff] }
  0x7f   : > { %790 = vmatpush1.xpose.msra.mxu0 %v4819_v63  ;;  %955 = vmatpush1.xpose.msra.mxu1 %v4733_v18 }
  0x80   : > { %793 = vmatprep.subr.mxu0 %v4830_v9  ;;  %957 = vmatprep.subr.mxu1 %v4745_v24 }
  0x81   : > { %740 = vmatprep.mubr.f32.mxu1 %v5141_v48  ;;  %483 = vmatprep.mubr.f32.mxu0 %v5285_v26  ;;  %v7150_v26 = vld [vmem:[#allocation10_spill] sm:$0xff]  ;;  %v7161_v48 = vld [vmem:[#allocation33_spill] sm:$0xff] }
  0x82   : > { %742 = vmatmul.mubr.f32.gmra.mxu1 %v5145_v2  ;;  %489 = vmatmul.mubr.f32.gmra.mxu0 %v5289_v41  ;;  %v7149_v41 = vld [vmem:[#allocation19_spill] sm:$0xff] }
  0x83   : > { %796 = vmatpush1.xpose.msra.mxu0 %v4834_v15  ;;  %959 = vmatpush1.xpose.msra.mxu1 %v4763_v33  ;;  %v7160_v2 = vld [vmem:[#allocation15_spill] sm:$0xff] }
  0x84   : > { %799 = vmatprep.subr.mxu0 %v4846_v30  ;;  %961 = vmatprep.subr.mxu1 %v4765_v34 }
  0x85   : > { %747 = vmatprep.mubr.f32.mxu1 %v5176_v45  ;;  %891 = vmatprep.mubr.f32.mxu0 %v4904_v22  ;;  %v7148_v22 = vld [vmem:[#allocation22_spill] sm:$0xff] }
  0x86   : > { %749 = vmatmul.mubr.f32.gmra.mxu1 %v5183_v0  ;;  %v7157_v0 = vld [vmem:[#allocation27_spill] sm:$0xff]  ;;  %v7158_v45 = vld [vmem:[#allocation14_spill] sm:$0xff] }
  0x87   : > { %802 = vmatpush1.xpose.msra.mxu0 %v4869_v54  ;;  %963 = vmatpush1.xpose.msra.mxu1 %v4790_v46 }
  0x88   : > { %805 = vmatprep.subr.mxu0 %v4875_v61  ;;  %965 = vmatprep.subr.mxu1 %v4803_v55 }
  0x89   : > { %754 = vmatprep.mubr.f32.mxu1 %v5206_v5  ;;  %v7156_v5 = vld [vmem:[#allocation13_spill] sm:$0xff] }
  0x8a   : > { %756 = vmatmul.mubr.f32.gmra.mxu1 %v5217_v28  ;;  %v7155_v28 = vld [vmem:[#allocation26_spill] sm:$0xff] }
  0x8b   : > { %808 = vmatpush1.xpose.msra.mxu0 %v4891_v42  ;;  %967 = vmatpush1.xpose.msra.mxu1 %v4805_v56 }
  0x8c   : > { %811 = vmatprep.subr.mxu0 %v7146_v38  ;;  %969 = vmatprep.subr.mxu1 %v7147_v8 }
  0x8d   : > { %1043 = vmatprep.mubr.f32.mxu1 %v7148_v22  ;;  %v7159_v22 = vld [vmem:[#allocation29_spill] sm:$0xff] }
  0x8f   : > { %814 = vmatpush1.xpose.msra.mxu0 %v7149_v41  ;;  %971 = vmatpush1.xpose.msra.mxu1 %v7150_v26 }
  0x90   : > { %817 = vmatprep.subr.mxu0 %v7151_v47  ;;  %973 = vmatprep.subr.mxu1 %v7152_v40 }
  0x93   : > { %820 = vmatpush1.xpose.msra.mxu0 %v7153_v62  ;;  %975 = vmatpush1.xpose.msra.mxu1 %v7154_v36 }
  0x94   : > { %823 = vmatprep.subr.mxu0 %v7155_v28  ;;  %977 = vmatprep.subr.mxu1 %v7156_v5  ;;  %v7167_v5 = vld [vmem:[#allocation39_spill] sm:$0xff] }
  0x97   : > { %826 = vmatpush1.xpose.msra.mxu0 %v7157_v0  ;;  %979 = vmatpush1.xpose.msra.mxu1 %v7158_v45  ;;  %v7168_v0 = vld [vmem:[#allocation24_spill] sm:$0xff]  ;;  %v7169_v45 = vld [vmem:[#allocation43_spill] sm:$0xff] }
  0x98   : > { %829 = vmatprep.subr.mxu0 %v7159_v22  ;;  %981 = vmatprep.subr.mxu1 %v7160_v2  ;;  %v7170_v22 = vld [vmem:[#allocation28_spill] sm:$0xff]  ;;  %v7171_v2 = vld [vmem:[#allocation45_spill] sm:$0xff] }
  0x9b   : > { %832 = vmatpush1.xpose.msra.mxu0 %v7161_v48  ;;  %983 = vmatpush1.xpose.msra.mxu1 %v7162_v49  ;;  %v7172_v48 = vld [vmem:[#allocation30_spill] sm:$0xff] }
  0x9c   : > { %835 = vmatprep.subr.mxu0 %v7163_v16  ;;  %985 = vmatprep.subr.mxu1 %v7164_v37  ;;  %v7173_v16 = vld [vmem:[#allocation32_spill] sm:$0xff] }
  0x9d   : > { %v7174_v37 = vld [vmem:[#allocation52_spill] sm:$0xff] }
  0x9f   : > { %838 = vmatpush1.xpose.msra.mxu0 %v7165_v21  ;;  %987 = vmatpush1.xpose.msra.mxu1 %v7166_v51  ;;  %v7175_v21 = vld [vmem:[#allocation34_spill] sm:$0xff] }
  0xa0   : > { %841 = vmatprep.subr.mxu0 %v7167_v5  ;;  %989 = vmatprep.subr.mxu1 %v7168_v0  ;;  %v7176_v5 = vld [vmem:[#allocation36_spill] sm:$0xff]  ;;  %v7177_v0 = vld [vmem:[#allocation38_spill] sm:$0xff] }
  0xa3   : > { %844 = vmatpush1.xpose.msra.mxu0 %v7169_v45  ;;  %991 = vmatpush1.xpose.msra.mxu1 %v7170_v22  ;;  %v7178_v22 = vand.u32 4294901760, %v4743_v23  ;;  %v7187_v23 = vand.u32 4294901760, %v4753_v27  ;;  %v7191_v27 = vld [vmem:[#allocation58_spill] sm:$0xff] }
  0xa4   : > { %847 = vmatprep.subr.mxu0 %v7171_v2  ;;  %993 = vmatprep.subr.mxu1 %v7172_v48  ;;  %v7179_v2 = vld [vmem:[#allocation48_spill] sm:$0xff]  ;;  %v7180_v48 = vld [vmem:[#allocation41_spill] sm:$0xff] }
  0xa7   : > { %850 = vmatpush1.xpose.msra.mxu0 %v5088_v6  ;;  %995 = vmatpush1.xpose.msra.mxu1 %v7173_v16  ;;  %v7181_v6 = vand.u32 4294901760, %v4736_v19  ;;  %v7182_v16 = vld [vmem:[#allocation49_spill] sm:$0xff]  ;;  %v7189_v19 = vld [vmem:[#allocation55_spill] sm:$0xff] }
  0xa8   : > { %853 = vmatprep.subr.mxu0 %v7174_v37  ;;  %997 = vmatprep.subr.mxu1 %v7175_v21  ;;  %v7183_v37 = vld [vmem:[#allocation44_spill] sm:$0xff] }
  0xab   : > { %856 = vmatpush1.xpose.msra.mxu0 %v5119_v44  ;;  %999 = vmatpush1.xpose.msra.mxu1 %v7176_v5  ;;  %v7184_v44 = vand.u32 4294901760, %v4748_v25  ;;  %v7185_v5 = vld [vmem:[#allocation53_spill] sm:$0xff]  ;;  %v7190_v25 = vand.u32 4294901760, %v4774_v39  ;;  %v7196_v39 = vand.u32 4294901760, %v4812_v59  ;;  %v7206_v59 = vand.u32 4294901760, %v7146_v38 }
  0xac   : > { %1001 = vmatprep.subr.mxu1 %v7177_v0  ;;  %1110 = vmatprep.subr.mxu0 %v7178_v22  ;;  %v7186_v0 = vld [vmem:[#allocation47_spill] sm:$0xff]  ;;  %v7188_v22 = vand.u32 4294901760, %v4757_v29  ;;  %v7194_v29 = vand.u32 4294901760, %v4808_v57  ;;  %v7202_v57 = vld [vmem:[#allocation8_spill] sm:$0xff]  ;;  %v4360_v38 = vld [vmem:[%s4711_s9 + $0x1e8] sm:$0xff] }
  0xae   : > { %894 = vmatmul.mubr.f32.vlgmr.msra.gmra.mxu0 %v7179_v2 }
  0xaf   : > { %1003 = vmatpush1.xpose.msra.mxu1 %v7180_v48  ;;  %1114 = vmatpush1.xpose.msra.mxu0 %v7181_v6  ;;  %v7217_v6 = vld [vmem:[#allocation15_spill] sm:$0xff] }
  0xb0   : > { %900 = vmatprep.mubr.f32.mxu0 %v7182_v16  ;;  %1005 = vmatprep.subr.mxu1 %v7183_v37  ;;  %v7269_v16 = vld [vmem:[#allocation31_spill] sm:$0xff] }
  0xb1   : > { %1118 = vmatprep.subr.mxu0 %v7184_v44  ;;  %v7192_v44 = vand.u32 4294901760, %v4784_v43  ;;  %v7198_v43 = vand.u32 4294901760, %v4819_v63  ;;  %v7210_v63 = vand.u32 4294901760, %v7155_v28  ;;  %v4362_v28 = vld [vmem:[%s4711_s9 + $0x1f8] sm:$0xff] }
  0xb2   : > { %903 = vmatmul.mubr.f32.gmra.mxu0 %v7185_v5 }
  0xb3   : > { %1007 = vmatpush1.xpose.msra.mxu1 %v7186_v0  ;;  %1122 = vmatpush1.xpose.msra.mxu0 %v7187_v23 }
  0xb4   : > { %909 = vmatprep.mubr.f32.mxu0 %v5110_v60  ;;  %1126 = vmatprep.subr.mxu0 %v7188_v22  ;;  %v4361_v22 = vld [vmem:[%s4711_s9 + $0x1f0] sm:$0xff] }
  0xb5   : > { %1311 = vmatprep.subr.mxu1 %v4723_v12  ;;  %v7193_v12 = vld [vmem:[#allocation59_spill] sm:$0xff] }
  0xb6   : > { %912 = vmatmul.mubr.f32.gmra.mxu0 %v5139_v58  ;;  %1047 = vmatmul.mubr.f32.vlgmr.msra.gmra.mxu1 %v7189_v19  ;;  %v4342_v58 = vld [vmem:[%s4711_s9 + $0x158] sm:$0xff] }
  0xb7   : > { %1130 = vmatpush1.xpose.msra.mxu0 %v7190_v25  ;;  %1313 = vmatpush1.xpose.msra.mxu1 %v4717_v7  ;;  %v7195_v7 = vld [vmem:[#allocation63_spill] sm:$0xff] }
  0xb8   : > { %918 = vmatprep.mubr.f32.mxu0 %v5174_v31  ;;  %1054 = vmatprep.mubr.f32.mxu1 %v7191_v27  ;;  %v7225_v25 = vld [vmem:[#allocation39_spill] sm:$0xff]  ;;  %v7263_v27 = vld [vmem:[#allocation77_spill] sm:$0xff] }
  0xb9   : > { %1134 = vmatprep.subr.mxu0 %v7192_v44  ;;  %1315 = vmatprep.subr.mxu1 %v4725_v13  ;;  %v7197_v13 = vld [vmem:[#allocation64_spill] sm:$0xff]  ;;  %v7226_v44 = vand.u32 4294901760, %v7225_v25 }
  0xba   : > { %921 = vmatmul.mubr.f32.gmra.mxu0 %v5181_v1  ;;  %1058 = vmatmul.mubr.f32.gmra.mxu1 %v7193_v12  ;;  %v4355_v25 = vld [vmem:[%s4711_s9 + $0x1c0] sm:$0xff] }
  0xbb   : > { %1138 = vmatpush1.xpose.msra.mxu0 %v7194_v29  ;;  %1317 = vmatpush1.xpose.msra.mxu1 %v4727_v14  ;;  %v7199_v14 = vand.u32 4294901760, %v4830_v9  ;;  %v7211_v9 = vld [vmem:[#allocation13_spill] sm:$0xff] }
  0xbc   : > { %927 = vmatprep.mubr.f32.mxu0 %v5204_v11  ;;  %1065 = vmatprep.mubr.f32.mxu1 %v7195_v7  ;;  %v4345_v7 = vld [vmem:[%s4711_s9 + $0x170] sm:$0xff] }
  0xbd   : > { %1142 = vmatprep.subr.mxu0 %v7196_v39  ;;  %1319 = vmatprep.subr.mxu1 %v4731_v17  ;;  %v7200_v17 = vand.u32 4294901760, %v4834_v15  ;;  %v7212_v15 = vld [vmem:[#allocation27_spill] sm:$0xff]  ;;  %v2292_v39 = vsel %vm240_vm0, %v4360_v38, 0  ;;  %v7240_v38 = vld [vmem:[#allocation36_spill] sm:$0xff]  ;;  %v5666_v60 = vand.u32 4294901760, %v4345_v7 }
  0xbe   : > { %930 = vmatmul.mubr.f32.gmra.mxu0 %v5215_v10  ;;  %1069 = vmatmul.mubr.f32.gmra.mxu1 %v7197_v13  ;;  %v7257_v13 = vld [vmem:[#allocation69_spill] sm:$0xff] }
  0xbf   : > { %1146 = vmatpush1.xpose.msra.mxu0 %v7198_v43  ;;  %1321 = vmatpush1.xpose.msra.mxu1 %v4733_v18  ;;  %v7201_v18 = vand.u32 4294901760, %v4846_v30  ;;  %v7213_v30 = vand.u32 4294901760, %v7212_v15  ;;  %v5459_v43 = vand.u32 4294901760, %v4361_v22  ;;  %v7235_v15 = vld [vmem:[#allocation32_spill] sm:$0xff]  ;;  %7266 = vst [vmem:[#allocation25_spill] sm:$0xff] %v5666_v60 }
  0xc0   : > { %936 = vmatprep.mubr.f32.mxu0 %v5230_v50  ;;  %1076 = vmatprep.mubr.f32.mxu1 %v5201_v3  ;;  %v4347_v50 = vld [vmem:[%s4711_s9 + $0x180] sm:$0xff] }
  0xc1   : > { %1150 = vmatprep.subr.mxu0 %v7199_v14  ;;  %1323 = vmatprep.subr.mxu1 %v4745_v24  ;;  %v7203_v24 = vand.u32 4294901760, %v4869_v54  ;;  %v7214_v54 = vld [vmem:[#allocation14_spill] sm:$0xff]  ;;  %v7228_v14 = vand.u32 4294901760, %v7169_v45  ;;  %v5637_v11 = vand.u32 4294901760, %v4347_v50 }
  0xc2   : > { %939 = vmatmul.mubr.f32.gmra.mxu0 %v5241_v52  ;;  %1080 = vmatmul.mubr.f32.gmra.mxu1 %v5212_v53 }
  0xc3   : > { %1154 = vmatpush1.xpose.msra.mxu0 %v7200_v17  ;;  %1325 = vmatpush1.xpose.msra.mxu1 %v4763_v33  ;;  %v7204_v33 = vand.u32 4294901760, %v4875_v61  ;;  %v7215_v61 = vld [vmem:[#allocation29_spill] sm:$0xff]  ;;  %v7229_v17 = vld [vmem:[#allocation28_spill] sm:$0xff]  ;;  %7259 = vst [vmem:[#allocation21_spill] sm:$0xff] %v5637_v11 }
  0xc4   : > { %1087 = vmatprep.mubr.f32.mxu1 %v5227_v35  ;;  %1158 = vmatprep.subr.mxu0 %v7201_v18  ;;  %v4358_v18 = vld [vmem:[%s4711_s9 + $0x1d8] sm:$0xff]  ;;  %v7251_v35 = vld [vmem:[#allocation62_spill] sm:$0xff] }
  0xc5   : > { %1327 = vmatprep.subr.mxu1 %v4765_v34  ;;  %1268 = vmatprep.mubr.f32.mxu0 %v7202_v57  ;;  %v7205_v34 = vand.u32 4294901760, %v4891_v42  ;;  %v7216_v42 = vand.u32 4294901760, %v7215_v61 }
  0xc6   : > { %1091 = vmatmul.mubr.f32.gmra.mxu1 %v5238_v32 }
  0xc7   : > { %1162 = vmatpush1.xpose.msra.mxu0 %v7203_v24  ;;  %1329 = vmatpush1.xpose.msra.mxu1 %v4790_v46  ;;  %v7207_v46 = vand.u32 4294901760, %v7149_v41  ;;  %v2295_v41 = vsel %vm240_vm0, %v4362_v28, 0  ;;  %v7230_v24 = vld [vmem:[#allocation45_spill] sm:$0xff] }
  0xc8   : > { %1098 = vmatprep.mubr.f32.mxu1 %v5252_v4  ;;  %1166 = vmatprep.subr.mxu0 %v7204_v33  ;;  %v5456_v29 = vand.u32 4294901760, %v2295_v41  ;;  %v7231_v33 = vand.u32 4294901760, %v7230_v24  ;;  %v7249_v4 = vld [vmem:[#allocation61_spill] sm:$0xff] }
  0xc9   : > { %1331 = vmatprep.subr.mxu1 %v4803_v55  ;;  %v7208_v55 = vand.u32 4294901760, %v7151_v47  ;;  %v7218_v47 = vld [vmem:[#allocation33_spill] sm:$0xff] }
  0xca   : > { %1102 = vmatmul.mubr.f32.gmra.mxu1 %v5261_v20  ;;  %v4349_v20 = vld [vmem:[%s4711_s9 + $0x190] sm:$0xff] }
  0xcb   : > { %1170 = vmatpush1.xpose.msra.mxu0 %v7205_v34  ;;  %1333 = vmatpush1.xpose.msra.mxu1 %v4805_v56  ;;  %v7209_v56 = vand.u32 4294901760, %v7153_v62  ;;  %v7219_v62 = vand.u32 4294901760, %v7218_v47  ;;  %v7232_v34 = vld [vmem:[#allocation30_spill] sm:$0xff]  ;;  %v5603_v53 = vand.u32 4294901760, %v4349_v20 }
  0xcc   : > { %1174 = vmatprep.subr.mxu0 %v7206_v59  ;;  %1335 = vmatprep.subr.mxu1 %v7147_v8  ;;  %v7223_v8 = vld [vmem:[#allocation37_spill] sm:$0xff]  ;;  %v5469_v59 = vand.u32 4294901760, %v2292_v39 }
  0xcd   : > { %1407 = vmatprep.mubr.f32.mxu1 %v7202_v57  ;;  %v7224_v23 = vand.u32 4294901760, %v7223_v8  ;;  %v4354_v8 = vld [vmem:[%s4711_s9 + $0x1b8] sm:$0xff]  ;;  %7252 = vst [vmem:[#allocation19_spill] sm:$0xff] %v5603_v53  ;;  %v5628_v10 = vsub.f32 %v4349_v20, %v5603_v53  ;;  %v7260_v20 = vld [vmem:[#allocation74_spill] sm:$0xff] }
  0xcf   : > { %1178 = vmatpush1.xpose.msra.mxu0 %v7207_v46  ;;  %1337 = vmatpush1.xpose.msra.mxu1 %v7150_v26  ;;  %v7222_v26 = vld [vmem:[#allocation20_spill] sm:$0xff]  ;;  %v5472_v46 = vsub.f32 %v2295_v41, %v5456_v29 }
  0xd0   : > { %1182 = vmatprep.subr.mxu0 %v7208_v55  ;;  %1339 = vmatprep.subr.mxu1 %v7152_v40  ;;  %v5475_v55 = vsub.f32 %v4361_v22, %v5459_v43 }
  0xd3   : > { %1186 = vmatpush1.xpose.msra.mxu0 %v7209_v56  ;;  %1341 = vmatpush1.xpose.msra.mxu1 %v7154_v36  ;;  %v7220_v36 = vld [vmem:[#allocation35_spill] sm:$0xff]  ;;  %v2289_v56 = vsel %vm240_vm0, %v4358_v18, 0  ;;  %v2283_v18 = vsel %vm240_vm0, %v4354_v8, 0 }
  0xd4   : > { %1190 = vmatprep.subr.mxu0 %v7210_v63  ;;  %1343 = vmatprep.subr.mxu1 %v7211_v9  ;;  %v7221_v40 = vand.u32 4294901760, %v7220_v36  ;;  %v7233_v63 = vld [vmem:[#allocation51_spill] sm:$0xff]  ;;  %v5491_v47 = vand.u32 4294901760, %v2289_v56  ;;  %v6955_v36 = vand.u32 4294901760, %v5475_v55 }
  0xd5   : > { %v7234_v9 = vand.u32 4294901760, %v7233_v63 }
  0xd7   : > { %1194 = vmatpush1.xpose.msra.mxu0 %v7213_v30  ;;  %1345 = vmatpush1.xpose.msra.mxu1 %v7214_v54  ;;  %v4356_v30 = vld [vmem:[%s4711_s9 + $0x1c8] sm:$0xff]  ;;  %v7236_v54 = vld [vmem:[#allocation52_spill] sm:$0xff] }
  0xd8   : > { %1198 = vmatprep.subr.mxu0 %v7216_v42  ;;  %1347 = vmatprep.subr.mxu1 %v7217_v6  ;;  %v7237_v61 = vand.u32 4294901760, %v7236_v54  ;;  %v4357_v42 = vld [vmem:[%s4711_s9 + $0x1d0] sm:$0xff]  ;;  %v5489_v6 = vsub.f32 %v2292_v39, %v5469_v59  ;;  %v5515_v39 = vsub.f32 %v2289_v56, %v5491_v47 }
  0xd9   : > { %v7243_v56 = vld [vmem:[#allocation42_spill] sm:$0xff] }
  0xda   : > { %v6954_v22 = vand.u32 4294901760, %v5489_v6  ;;  %v6957_v54 = vand.u32 4294901760, %v5515_v39 }
  0xdb   : > { %1202 = vmatpush1.xpose.msra.mxu0 %v7219_v62  ;;  %1349 = vmatpush1.xpose.msra.mxu1 %v7162_v49  ;;  %v7227_v49 = vld [vmem:[#allocation24_spill] sm:$0xff]  ;;  %v6956_v62 = vand.u32 4294901760, %v5472_v46 }
  0xdc   : > { %1206 = vmatprep.subr.mxu0 %v7221_v40  ;;  %1351 = vmatprep.subr.mxu1 %v7222_v26  ;;  %v2286_v40 = vsel %vm240_vm0, %v4356_v30, 0  ;;  %v7238_v26 = vld [vmem:[#allocation57_spill] sm:$0xff]  ;;  %v2499_v63 = vsub.f32 %v5489_v6, %v6954_v22  ;;  %v5539_v30 = vand.u32 4294901760, %v2283_v18 }
  0xdd   : > { %v7239_v41 = vand.u32 4294901760, %v7238_v26 }
  0xde   : > { %v5569_v22 = vsub.f32 %v2283_v18, %v5539_v30 }
  0xdf   : > { %1210 = vmatpush1.xpose.msra.mxu0 %v7224_v23  ;;  %1353 = vmatpush1.xpose.msra.mxu1 %v7166_v51  ;;  %v4359_v51 = vld [vmem:[%s4711_s9 + $0x1e0] sm:$0xff]  ;;  %v7241_v23 = vld [vmem:[#allocation38_spill] sm:$0xff] }
  0xe0   : > { %1214 = vmatprep.subr.mxu0 %v7226_v44  ;;  %1355 = vmatprep.subr.mxu1 %v7227_v49  ;;  %v5477_v45 = vand.u32 4294901760, %v4359_v51  ;;  %v2487_v44 = vsub.f32 %v5472_v46, %v6956_v62  ;;  %v5512_v49 = vand.u32 4294901760, %v2286_v40 }
  0xe2   : > { %v5495_v28 = vsub.f32 %v4359_v51, %v5477_v45 }
  0xe3   : > { %1218 = vmatpush1.xpose.msra.mxu0 %v7228_v14  ;;  %1357 = vmatpush1.xpose.msra.mxu1 %v7229_v17  ;;  %v7242_v14 = vld [vmem:[#allocation40_spill] sm:$0xff]  ;;  %v2493_v17 = vsub.f32 %v5475_v55, %v6955_v36  ;;  %v4348_v36 = vld [vmem:[%s4711_s9 + $0x188] sm:$0xff] }
  0xe4   : > { %1222 = vmatprep.subr.mxu0 %v7231_v33  ;;  %1359 = vmatprep.subr.mxu1 %v7232_v34  ;;  %v6953_v51 = vand.u32 4294901760, %v5495_v28  ;;  %v5528_v33 = vand.u32 4294901760, %v4355_v25  ;;  %v4352_v34 = vld [vmem:[%s4711_s9 + $0x1a8] sm:$0xff]  ;;  %v2274_v32 = vsel %vm240_vm0, %v4348_v36, 0 }
  0xe5   : > { %v5614_v3 = vand.u32 4294901760, %v2274_v32 }
  0xe6   : > { %v2505_v26 = vsub.f32 %v5495_v28, %v6953_v51 }
  0xe7   : > { %1226 = vmatpush1.xpose.msra.mxu0 %v7234_v9  ;;  %1361 = vmatpush1.xpose.msra.mxu1 %v7235_v15  ;;  %v4353_v9 = vld [vmem:[%s4711_s9 + $0x1b0] sm:$0xff]  ;;  %v4350_v15 = vld [vmem:[%s4711_s9 + $0x198] sm:$0xff]  ;;  %7254 = vst [vmem:[#allocation10_spill] sm:$0xff] %v5614_v3  ;;  %v5640_v12 = vsub.f32 %v2274_v32, %v5614_v3 }
  0xe8   : > { %1230 = vmatprep.subr.mxu0 %v7237_v61  ;;  %1363 = vmatprep.subr.mxu1 %v7175_v21  ;;  %v5502_v21 = vand.u32 4294901760, %v4357_v42  ;;  %v5543_v61 = vsub.f32 %v2286_v40, %v5512_v49  ;;  %v5555_v8 = vand.u32 4294901760, %v4353_v9 }
  0xea   : > { %v5526_v24 = vsub.f32 %v4357_v42, %v5502_v21  ;;  %v7244_v42 = vld [vmem:[#allocation46_spill] sm:$0xff] }
  0xeb   : > { %1234 = vmatpush1.xpose.msra.mxu0 %v7239_v41  ;;  %1365 = vmatpush1.xpose.msra.mxu1 %v7240_v38  ;;  %v2280_v41 = vsel %vm240_vm0, %v4352_v34, 0  ;;  %v5553_v38 = vsub.f32 %v4355_v25, %v5528_v33  ;;  %v2500_v34 = vand.u32 4294901760, %v2499_v63 }
  0xec   : > { %1367 = vmatprep.subr.mxu1 %v7241_v23  ;;  %2298 = vmatprep.subr.mxu0 %v5456_v29  ;;  %v6961_v40 = vand.u32 4294901760, %v5526_v24  ;;  %v4351_v23 = vld [vmem:[%s4711_s9 + $0x1a0] sm:$0xff]  ;;  %v5565_v25 = vand.u32 4294901760, %v2280_v41 }
  0xed   : > { %v5574_v62 = vand.u32 4294901760, %v4351_v23 }
  0xee   : > { %1270 = vmatmul.mubr.f32.vlgmr.msra.gmra.mxu0 %v7242_v14  ;;  %v2517_v18 = vsub.f32 %v5526_v24, %v6961_v40  ;;  %v5596_v51 = vsub.f32 %v2280_v41, %v5565_v25  ;;  %v7253_v41 = vand.u32 4294901760, %v5553_v38 }
  0xef   : > { %1369 = vmatpush1.xpose.msra.mxu1 %v7180_v48  ;;  %2300 = vmatpush1.xpose.msra.mxu0 %v5459_v43  ;;  %v2488_v48 = vand.u32 4294901760, %v2487_v44  ;;  %v2277_v44 = vsel %vm240_vm0, %v4350_v15, 0  ;;  %v7246_v15 = vld [vmem:[#allocation54_spill] sm:$0xff]  ;;  %7247 = vst [vmem:[#allocation16_spill] sm:$0xff] %v5574_v62  ;;  %v5601_v36 = vsub.f32 %v4351_v23, %v5574_v62 }
  0xf0   : > { %1275 = vmatprep.mubr.f32.mxu0 %v7243_v56  ;;  %1371 = vmatprep.subr.mxu1 %v7183_v37  ;;  %v2494_v37 = vand.u32 4294901760, %v2493_v17  ;;  %v7245_v17 = vld [vmem:[#allocation50_spill] sm:$0xff]  ;;  %v5576_v63 = vand.u32 4294901760, %v2277_v44  ;;  %v2529_v40 = vsub.f32 %v5553_v38, %v7253_v41 }
  0xf1   : > { %2302 = vmatprep.subr.mxu0 %v5469_v59  ;;  %v7255_v23 = vld [vmem:[#allocation66_spill] sm:$0xff]  ;;  %v7264_v32 = vand.u32 4294901760, %v5601_v36 }
  0xf2   : > { %1277 = vmatmul.mubr.f32.gmra.mxu0 %v7244_v42  ;;  %7248 = vst [vmem:[#allocation9_spill] sm:$0xff] %v5576_v63 }
  0xf3   : > { %1373 = vmatpush1.xpose.msra.mxu1 %v7186_v0  ;;  %2304 = vmatpush1.xpose.msra.mxu0 %v5477_v45  ;;  %v2511_v0 = vsub.f32 %v5515_v39, %v6957_v54  ;;  %v5580_v54 = vsub.f32 %v4353_v9, %v5555_v8  ;;  %v7250_v9 = vand.u32 4294901760, %v5543_v61  ;;  %v2553_v31 = vsub.f32 %v5601_v36, %v7264_v32  ;;  %v4343_v32 = vld [vmem:[%s4711_s9 + $0x160] sm:$0xff] }
  0xf4   : > { %1282 = vmatprep.mubr.f32.mxu0 %v7245_v17  ;;  %2306 = vmatprep.subr.mxu0 %v5491_v47 }
  0xf5   : > { %2489 = vmatprep.subr.mxu1 %v2488_v48  ;;  %v2506_v48 = vand.u32 4294901760, %v2505_v26  ;;  %v2523_v26 = vsub.f32 %v5543_v61, %v7250_v9  ;;  %v2518_v9 = vand.u32 4294901760, %v2517_v18  ;;  %v7258_v41 = vand.u32 4294901760, %v5580_v54 }
  0xf6   : > { %1284 = vmatmul.mubr.f32.gmra.mxu0 %v7246_v15  ;;  %1409 = vmatmul.mubr.f32.vlgmr.msra.gmra.mxu1 %v7242_v14  ;;  %v2554_v5 = vand.u32 4294901760, %v2553_v31 }
  0xf7   : > { %2308 = vmatpush1.xpose.msra.mxu0 %v5502_v21  ;;  %2495 = vmatpush1.xpose.msra.mxu1 %v2494_v37  ;;  %v2512_v37 = vand.u32 4294901760, %v2511_v0  ;;  %v5607_v0 = vsub.f32 %v2277_v44, %v5576_v63  ;;  %v2524_v44 = vand.u32 4294901760, %v2523_v26  ;;  %v4344_v26 = vld [vmem:[%s4711_s9 + $0x168] sm:$0xff] }
  0xf8   : > { %1289 = vmatprep.mubr.f32.mxu0 %v7249_v4  ;;  %1414 = vmatprep.mubr.f32.mxu1 %v7243_v56  ;;  %v2268_v1 = vsel %vm240_vm0, %v4344_v26, 0 }
  0xf9   : > { %2310 = vmatprep.subr.mxu0 %v5512_v49  ;;  %2501 = vmatprep.subr.mxu1 %v2500_v34  ;;  %v4346_v34 = vld [vmem:[%s4711_s9 + $0x178] sm:$0xff]  ;;  %v7265_v19 = vand.u32 4294901760, %v5607_v0 }
  0xfa   : > { %1291 = vmatmul.mubr.f32.gmra.mxu0 %v7251_v35  ;;  %1416 = vmatmul.mubr.f32.gmra.mxu1 %v7244_v42  ;;  %v2271_v52 = vsel %vm240_vm0, %v4346_v34, 0  ;;  %v2541_v34 = vsub.f32 %v5580_v54, %v7258_v41 }
  0xfb   : > { %2312 = vmatpush1.xpose.msra.mxu0 %v5528_v33  ;;  %2507 = vmatpush1.xpose.msra.mxu1 %v2506_v48  ;;  %v7256_v48 = vand.u32 4294901760, %v5569_v22 }
  0xfc   : > { %1296 = vmatprep.mubr.f32.mxu0 %v7255_v23  ;;  %1421 = vmatprep.mubr.f32.mxu1 %v7245_v17  ;;  %v2542_v26 = vand.u32 4294901760, %v2541_v34  ;;  %v4340_v34 = vld [vmem:[%s4711_s9 + $0x148] sm:$0xff] }
  0xfd   : > { %2314 = vmatprep.subr.mxu0 %v5539_v30  ;;  %2513 = vmatprep.subr.mxu1 %v2512_v37  ;;  %v2535_v18 = vsub.f32 %v5569_v22, %v7256_v48  ;;  %v2530_v48 = vand.u32 4294901760, %v2529_v40  ;;  %v5644_v37 = vand.u32 4294901760, %v2271_v52 }
  0xfe   : > { %1298 = vmatmul.mubr.f32.gmra.mxu0 %v7257_v13  ;;  %1423 = vmatmul.mubr.f32.gmra.mxu1 %v7246_v15 }
  0xff   : > { %2316 = vmatpush1.xpose.msra.mxu0 %v5555_v8  ;;  %2519 = vmatpush1.xpose.msra.mxu1 %v2518_v9  ;;  %7261 = vst [vmem:[#allocation11_spill] sm:$0xff] %v5644_v37  ;;  %v2536_v40 = vand.u32 4294901760, %v2535_v18  ;;  %v7262_v9 = vand.u32 4294901760, %v5596_v51  ;;  %v5675_v18 = vsub.f32 %v2271_v52, %v5644_v37  ;;  %v5686_v52 = vsub.f32 %v4345_v7, %v5666_v60 }
 0x100   : > { %1303 = vmatprep.mubr.f32.mxu0 %v7260_v20  ;;  %1428 = vmatprep.mubr.f32.mxu1 %v7249_v4  ;;  %v2262_v7 = vsel %vm240_vm0, %v4340_v34, 0 }
 0x101   : > { %2318 = vmatprep.subr.mxu0 %v5565_v25  ;;  %2525 = vmatprep.subr.mxu1 %v2524_v44  ;;  %v2547_v41 = vsub.f32 %v5596_v51, %v7262_v9  ;;  %v2559_v44 = vsub.f32 %v5607_v0, %v7265_v19  ;;  %v5664_v9 = vsub.f32 %v4347_v50, %v5637_v11  ;;  %v5671_v19 = vand.u32 4294901760, %v2268_v1 }
 0x102   : > { %1305 = vmatmul.mubr.f32.gmra.mxu0 %v7263_v27  ;;  %1430 = vmatmul.mubr.f32.gmra.mxu1 %v7251_v35  ;;  %7268 = vst [vmem:[#allocation26_spill] sm:$0xff] %v5675_v18  ;;  %v2265_v50 = vsel %vm240_vm0, %v4342_v58, 0  ;;  %7271 = vst [vmem:[#allocation18_spill] sm:$0xff] %v5686_v52  ;;  %v7272_v58 = vand.u32 4294901760, %v5640_v12 }
 0x103   : > { %2320 = vmatpush1.xpose.msra.mxu0 %v5574_v62  ;;  %2531 = vmatpush1.xpose.msra.mxu1 %v2530_v48  ;;  %7267 = vst [vmem:[#allocation12_spill] sm:$0xff] %v5671_v19  ;;  %v2548_v48 = vand.u32 4294901760, %v2547_v41  ;;  %v2560_v2 = vand.u32 4294901760, %v2559_v44  ;;  %v4341_v41 = vld [vmem:[%s4711_s9 + $0x150] sm:$0xff]  ;;  %v7278_v44 = vand.u32 4294901760, %v5664_v9 }
 0x104   : > { %1435 = vmatprep.mubr.f32.mxu1 %v7255_v23  ;;  %2322 = vmatprep.subr.mxu0 %v5576_v63  ;;  %v7270_v63 = vand.u32 4294901760, %v5628_v10  ;;  %v5705_v31 = vand.u32 4294901760, %v4341_v41 }
 0x105   : > { %2537 = vmatprep.subr.mxu1 %v2536_v40  ;;  %2398 = vmatprep.mubr.f32.mxu0 %v7269_v16  ;;  %v2571_v40 = vsub.f32 %v5640_v12, %v7272_v58  ;;  %v5691_v16 = vand.u32 4294901760, %v4343_v32  ;;  %v2577_v34 = vsub.f32 %v5664_v9, %v7278_v44 }
 0x106   : > { %1437 = vmatmul.mubr.f32.gmra.mxu1 %v7257_v13  ;;  %v2565_v62 = vsub.f32 %v5628_v10, %v7270_v63  ;;  %v5697_v63 = vand.u32 4294901760, %v2265_v50  ;;  %7276 = vst [vmem:[#allocation41_spill] sm:$0xff] %v5705_v31 }
 0x107   : > { %2324 = vmatpush1.xpose.msra.mxu0 %v5603_v53  ;;  %2543 = vmatpush1.xpose.msra.mxu1 %v2542_v26  ;;  %7273 = vst [vmem:[#allocation23_spill] sm:$0xff] %v5691_v16  ;;  %v5702_v26 = vsub.f32 %v2268_v1, %v5671_v19  ;;  %v4338_v53 = vld [vmem:[%s4711_s9 + $0x138] sm:$0xff]  ;;  %v5730_v1 = vsub.f32 %v4341_v41, %v5705_v31 }
 0x108   : > { %1442 = vmatprep.mubr.f32.mxu1 %v7260_v20  ;;  %2326 = vmatprep.subr.mxu0 %v5614_v3  ;;  %7274 = vst [vmem:[#allocation43_spill] sm:$0xff] %v5697_v63  ;;  %v2566_v58 = vand.u32 4294901760, %v2565_v62  ;;  %v5710_v3 = vsub.f32 %v4343_v32, %v5691_v16  ;;  %v2572_v62 = vand.u32 4294901760, %v2571_v40  ;;  %v5725_v20 = vsub.f32 %v2265_v50, %v5697_v63 }
 0x109   : > { %7275 = vst [vmem:[#allocation34_spill] sm:$0xff] %v5702_v26  ;;  %2549 = vmatprep.subr.mxu1 %v2548_v48  ;;  %v5716_v48 = vand.u32 4294901760, %v2262_v7  ;;  %v2259_v44 = vsel %vm240_vm0, %v4338_v53, 0  ;;  %7282 = vst [vmem:[#allocation27_spill] sm:$0xff] %v5730_v1  ;;  %v7284_v40 = vand.u32 4294901760, %v5686_v52 }
 0x10a   : > { %1444 = vmatmul.mubr.f32.gmra.mxu1 %v7263_v27  ;;  %7277 = vst [vmem:[#allocation44_spill] sm:$0xff] %v5710_v3  ;;  %v4339_v27 = vld [vmem:[%s4711_s9 + $0x140] sm:$0xff]  ;;  %7281 = vst [vmem:[#allocation13_spill] sm:$0xff] %v5725_v20 }
 0x10b   : > { %2328 = vmatpush1.xpose.msra.mxu0 %v5637_v11  ;;  %2555 = vmatpush1.xpose.msra.mxu1 %v2554_v5  ;;  %7279 = vst [vmem:[#allocation47_spill] sm:$0xff] %v5716_v48  ;;  %v7280_v11 = vand.u32 4294901760, %v5675_v18  ;;  %v2589_v50 = vsub.f32 %v5686_v52, %v7284_v40  ;;  %v5741_v32 = vsub.f32 %v2262_v7, %v5716_v48 }
 0x10c   : > { %2330 = vmatprep.subr.mxu0 %v5644_v37  ;;  %2561 = vmatprep.subr.mxu1 %v2560_v2  ;;  %v5732_v37 = vand.u32 4294901760, %v4339_v27  ;;  %v4336_v2 = vld [vmem:[%s4711_s9 + $0x128] sm:$0xff] }
 0x10d   : > { %v2583_v5 = vsub.f32 %v5675_v18, %v7280_v11  ;;  %2709 = vmatprep.mubr.f32.mxu1 %v7202_v57  ;;  %v2578_v11 = vand.u32 4294901760, %v2577_v34  ;;  %7285 = vst [vmem:[#allocation29_spill] sm:$0xff] %v5741_v32  ;;  %v7286_v57 = vand.u32 4294901760, %v5702_v26  ;;  %v5747_v18 = vand.u32 4294901760, %v2259_v44  ;;  %v4337_v34 = vld [vmem:[%s4711_s9 + $0x130] sm:$0xff] }
 0x10e   : > { %7283 = vst [vmem:[#allocation14_spill] sm:$0xff] %v5732_v37  ;;  %v2256_v40 = vsel %vm240_vm0, %v4336_v2, 0  ;;  %v5753_v53 = vsub.f32 %v4339_v27, %v5732_v37  ;;  %v7291_v2 = vand.u32 4294901760, %v5725_v20 }
 0x10f   : > { %2332 = vmatpush1.xpose.msra.mxu0 %v5666_v60  ;;  %2567 = vmatpush1.xpose.msra.mxu1 %v2566_v58  ;;  %v2584_v41 = vand.u32 4294901760, %v2583_v5  ;;  %v2595_v60 = vsub.f32 %v5702_v26, %v7286_v57  ;;  %7287 = vst [vmem:[#allocation15_spill] sm:$0xff] %v5747_v18  ;;  %v7289_v57 = vand.u32 4294901760, %v5710_v3  ;;  %v5761_v58 = vand.u32 4294901760, %v4337_v34 }
 0x110   : > { %2334 = vmatprep.subr.mxu0 %v5671_v19  ;;  %2573 = vmatprep.subr.mxu1 %v2572_v62  ;;  %7288 = vst [vmem:[#allocation33_spill] sm:$0xff] %v5753_v53  ;;  %v4334_v19 = vld [vmem:[%s4711_s9 + $0x118] sm:$0xff]  ;;  %v2590_v62 = vand.u32 4294901760, %v2589_v50  ;;  %v2607_v7 = vsub.f32 %v5725_v20, %v7291_v2  ;;  %v5772_v50 = vsub.f32 %v2259_v44, %v5747_v18  ;;  %v7295_v44 = vand.u32 4294901760, %v5741_v32 }
 0x111   : > { %v2601_v5 = vsub.f32 %v5710_v3, %v7289_v57  ;;  %7290 = vst [vmem:[#allocation35_spill] sm:$0xff] %v5761_v58  ;;  %v2596_v27 = vand.u32 4294901760, %v2595_v60  ;;  %v2253_v57 = vsel %vm240_vm0, %v4334_v19, 0  ;;  %v7294_v3 = vand.u32 4294901760, %v5730_v1  ;;  %v4332_v60 = vld [vmem:[%s4711_s9 + $0x108] sm:$0xff] }
 0x112   : > { %7293 = vst [vmem:[#allocation37_spill] sm:$0xff] %v5772_v50  ;;  %v2619_v20 = vsub.f32 %v5741_v32, %v7295_v44  ;;  %v5790_v19 = vand.u32 4294901760, %v2253_v57  ;;  %v7298_v44 = vand.u32 4294901760, %v5753_v53 }
 0x113   : > { %2336 = vmatpush1.xpose.msra.mxu0 %v5691_v16  ;;  %2579 = vmatpush1.xpose.msra.mxu1 %v2578_v11  ;;  %v5768_v16 = vand.u32 4294901760, %v2256_v40  ;;  %v4335_v11 = vld [vmem:[%s4711_s9 + $0x120] sm:$0xff]  ;;  %v2613_v26 = vsub.f32 %v5730_v1, %v7294_v3  ;;  %v2602_v2 = vand.u32 4294901760, %v2601_v5  ;;  %v2608_v3 = vand.u32 4294901760, %v2607_v7 }
 0x114   : > { %2338 = vmatprep.subr.mxu0 %v5697_v63  ;;  %2585 = vmatprep.subr.mxu1 %v2584_v41  ;;  %v5782_v63 = vsub.f32 %v4337_v34, %v5761_v58  ;;  %v5787_v52 = vand.u32 4294901760, %v4335_v11  ;;  %7297 = vst [vmem:[#allocation24_spill] sm:$0xff] %v5790_v19  ;;  %v2250_v34 = vsel %vm240_vm0, %v4332_v60, 0  ;;  %v2625_v32 = vsub.f32 %v5753_v53, %v7298_v44 }
 0x115   : > { %7292 = vst [vmem:[#allocation20_spill] sm:$0xff] %v5768_v16  ;;  %v2614_v5 = vand.u32 4294901760, %v2613_v26  ;;  %v2620_v7 = vand.u32 4294901760, %v2619_v20  ;;  %v7300_v26 = vand.u32 4294901760, %v5772_v50  ;;  %v5812_v60 = vand.u32 4294901760, %v2250_v34 }
 0x116   : > { %7296 = vst [vmem:[#allocation39_spill] sm:$0xff] %v5787_v52  ;;  %v5817_v20 = vsub.f32 %v2253_v57, %v5790_v19 }
 0x117   : > { %2340 = vmatpush1.xpose.msra.mxu0 %v5705_v31  ;;  %2591 = vmatpush1.xpose.msra.mxu1 %v2590_v62  ;;  %v4333_v31 = vld [vmem:[%s4711_s9 + $0x110] sm:$0xff]  ;;  %v5795_v62 = vsub.f32 %v2256_v40, %v5768_v16  ;;  %v2631_v40 = vsub.f32 %v5772_v50, %v7300_v26 }
 0x118   : > { %2342 = vmatprep.subr.mxu0 %v5716_v48  ;;  %2597 = vmatprep.subr.mxu1 %v2596_v27  ;;  %v5803_v27 = vsub.f32 %v4335_v11, %v5787_v52  ;;  %v5805_v41 = vand.u32 4294901760, %v4333_v31  ;;  %7301 = vst [vmem:[#allocation45_spill] sm:$0xff] %v5817_v20  ;;  %v2626_v11 = vand.u32 4294901760, %v2625_v32 }
 0x119   : > { %v7018_v44 = vand.u32 4294901760, %v5795_v62  ;;  %v2632_v57 = vand.u32 4294901760, %v2631_v40 }
 0x11a   : > { %7299 = vst [vmem:[#allocation28_spill] sm:$0xff] %v5803_v27  ;;  %v5821_v48 = vsub.f32 %v4333_v31, %v5805_v41  ;;  %v5835_v31 = vsub.f32 %v2250_v34, %v5812_v60 }
 0x11b   : > { %2344 = vmatpush1.xpose.msra.mxu0 %v5732_v37  ;;  %2603 = vmatpush1.xpose.msra.mxu1 %v2602_v2  ;;  %v4331_v2 = vld [vmem:[%s4711_s9 + $0x100] sm:$0xff]  ;;  %v7019_v37 = vand.u32 4294901760, %v5803_v27  ;;  %v2643_v32 = vsub.f32 %v5795_v62, %v7018_v44  ;;  %s6112_s9 = sld [smem:[#allocation2]] }
 0x11c   : > { %2346 = vmatprep.subr.mxu0 %v5747_v18  ;;  %2609 = vmatprep.subr.mxu1 %v2608_v3  ;;  %7302 = vst [vmem:[#allocation30_spill] sm:$0xff] %v5821_v48  ;;  %v7303_v3 = vand.u32 4294901760, %v5782_v63  ;;  %v5826_v26 = vand.u32 4294901760, %v4331_v2  ;;  %7305 = vst [vmem:[#allocation32_spill] sm:$0xff] %v5835_v31  ;;  %v7021_v40 = vand.u32 4294901760, %v5821_v48 }
 0x11d   : > { %v2644_v44 = vand.u32 4294901760, %v2643_v32 }
 0x11e   : > { %v2637_v18 = vsub.f32 %v5782_v63, %v7303_v3  ;;  %7304 = vst [vmem:[#allocation51_spill] sm:$0xff] %v5826_v26 }
 0x11f   : > { %2348 = vmatpush1.xpose.msra.mxu0 %v5761_v58  ;;  %2615 = vmatpush1.xpose.msra.mxu1 %v2614_v5  ;;  %v7020_v5 = vand.u32 4294901760, %v5817_v20  ;;  %v5839_v58 = vsub.f32 %v4331_v2, %v5826_v26  ;;  %v2661_v2 = vsub.f32 %v5821_v48, %v7021_v40  ;;  %v7306_v40 = vld [vmem:[#allocation67_spill] sm:$0xff] }
 0x120   : > { %2350 = vmatprep.subr.mxu0 %v5768_v16  ;;  %2621 = vmatprep.subr.mxu1 %v2620_v7  ;;  %v2638_v3 = vand.u32 4294901760, %v2637_v18  ;;  %v2649_v7 = vsub.f32 %v5803_v27, %v7019_v37 }
 0x121   : > { %v2655_v34 = vsub.f32 %v5817_v20, %v7020_v5  ;;  %v7025_v37 = vand.u32 4294901760, %v5839_v58  ;;  %v2662_v5 = vand.u32 4294901760, %v2661_v2  ;;  %v7307_v2 = vld [vmem:[#allocation70_spill] sm:$0xff] }
 0x122   : > { %v2650_v18 = vand.u32 4294901760, %v2649_v7 }
 0x123   : > { %2352 = vmatpush1.xpose.msra.mxu0 %v5787_v52  ;;  %2627 = vmatpush1.xpose.msra.mxu1 %v2626_v11  ;;  %v7022_v11 = vand.u32 4294901760, %v5835_v31 }
 0x124   : > { %2354 = vmatprep.subr.mxu0 %v5790_v19  ;;  %2633 = vmatprep.subr.mxu1 %v2632_v57  ;;  %v2656_v57 = vand.u32 4294901760, %v2655_v34 }
 0x125   : > { %v2667_v32 = vsub.f32 %v5835_v31, %v7022_v11 }
 0x127   : > { %2356 = vmatpush1.xpose.msra.mxu0 %v5805_v41  ;;  %2639 = vmatpush1.xpose.msra.mxu1 %v2638_v3  ;;  %v2673_v3 = vsub.f32 %v5839_v58, %v7025_v37  ;;  %v2668_v7 = vand.u32 4294901760, %v2667_v32  ;;  %v7316_v37 = vld [vmem:[#allocation91_spill] sm:$0xff] }
 0x128   : > { %2358 = vmatprep.subr.mxu0 %v5812_v60  ;;  %2645 = vmatprep.subr.mxu1 %v2644_v44 }
 0x129   : > { %v2674_v34 = vand.u32 4294901760, %v2673_v3  ;;  %v7310_v3 = vld [vmem:[#allocation81_spill] sm:$0xff] }
 0x12b   : > { %2360 = vmatpush1.xpose.msra.mxu0 %v5826_v26  ;;  %2651 = vmatpush1.xpose.msra.mxu1 %v2650_v18  ;;  %v7308_v26 = vld [vmem:[#allocation71_spill] sm:$0xff] }
 0x12c   : > { %2657 = vmatprep.subr.mxu1 %v2656_v57  ;;  %2753 = vmatprep.subr.mxu0 %v5472_v46 }
 0x12e   : > { %2404 = vmatmul.mubr.f32.vlgmr.msra.gmra.mxu0 %v7306_v40  ;;  %v415_v44 = vpop.f32.mrf.mxu0  ;;  %v7309_v40 = vld [vmem:[#allocation78_spill] sm:$0xff] }
 0x12f   : > { %2663 = vmatpush1.xpose.msra.mxu1 %v2662_v5  ;;  %2756 = vmatpush1.xpose.msra.mxu0 %v5475_v55 }
 0x130   : > { %2669 = vmatprep.subr.mxu1 %v2668_v7  ;;  %2759 = vmatprep.subr.mxu0 %v5489_v6  ;;  %v417_v18 = vpop.f32.mrf.mxu0 }
 0x131   : > { %2413 = vmatprep.mubr.f32.mxu0 %v7307_v2  ;;  %v7311_v18 = vld [vmem:[#allocation84_spill] sm:$0xff] }
 0x132   : > { %v430_v11 = vpop.f32.mrf.mxu0  ;;  %2419 = vmatmul.mubr.f32.gmra.mxu0 %v7308_v26 }
 0x133   : > { %2675 = vmatpush1.xpose.msra.mxu1 %v2674_v34  ;;  %2762 = vmatpush1.xpose.msra.mxu0 %v5495_v28 }
 0x134   : > { %2765 = vmatprep.subr.mxu0 %v5515_v39  ;;  %2935 = vmatprep.subr.mxu1 %v5456_v29  ;;  %v432_v5 = vpop.f32.mrf.mxu0 }
 0x135   : > { %2428 = vmatprep.mubr.f32.mxu0 %v7309_v40 }
 0x136   : > { %v722_v57 = vpop.f32.mrf.mxu1  ;;  %2711 = vmatmul.mubr.f32.vlgmr.msra.gmra.mxu1 %v7242_v14  ;;  %v445_v32 = vpop.f32.mrf.mxu0  ;;  %2434 = vmatmul.mubr.f32.gmra.mxu0 %v7310_v3  ;;  %v7336_v14 = vld [vmem:[#allocation43_spill] sm:$0xff] }
 0x137   : > { %v5875_v7 = vadd.f32 %v722_v57, %v415_v44  ;;  %2768 = vmatpush1.xpose.msra.mxu0 %v5526_v24  ;;  %2937 = vmatpush1.xpose.msra.mxu1 %v5459_v43  ;;  %v7312_v44 = vld [vmem:[#allocation86_spill] sm:$0xff] }
 0x138   : > { %v724_v26 = vpop.f32.mrf.mxu1  ;;  %2771 = vmatprep.subr.mxu0 %v5543_v61  ;;  %2939 = vmatprep.subr.mxu1 %v5469_v59  ;;  %v447_v34 = vpop.f32.mrf.mxu0 }
 0x139   : > { %2716 = vmatprep.mubr.f32.mxu1 %v7243_v56  ;;  %2443 = vmatprep.mubr.f32.mxu0 %v7311_v18  ;;  %v7313_v26 = vld [vmem:[#allocation88_spill] sm:$0xff]  ;;  %v7335_v56 = vld [vmem:[#allocation23_spill] sm:$0xff] }
 0x13a   : > { %v729_v2 = vpop.f32.mrf.mxu1  ;;  %2718 = vmatmul.mubr.f32.gmra.mxu1 %v7244_v42  ;;  %v460_v5 = vpop.f32.mrf.mxu0  ;;  %2449 = vmatmul.mubr.f32.gmra.mxu0 %v7312_v44  ;;  %v7314_v44 = vld [vmem:[#allocation89_spill] sm:$0xff]  ;;  %v7334_v42 = vld [vmem:[#allocation12_spill] sm:$0xff] }
 0x13b   : > { %2774 = vmatpush1.xpose.msra.mxu0 %v5553_v38  ;;  %2941 = vmatpush1.xpose.msra.mxu1 %v5477_v45  ;;  %v5887_v40 = vadd.f32 %v729_v2, %v430_v11 }
 0x13c   : > { %2777 = vmatprep.subr.mxu0 %v5569_v22  ;;  %2943 = vmatprep.subr.mxu1 %v5491_v47  ;;  %v731_v57 = vpop.f32.mrf.mxu1  ;;  %v462_v3 = vpop.f32.mrf.mxu0 }
 0x13d   : > { %2723 = vmatprep.mubr.f32.mxu1 %v7245_v17  ;;  %2458 = vmatprep.mubr.f32.mxu0 %v7313_v26  ;;  %v7315_v3 = vld [vmem:[#allocation90_spill] sm:$0xff]  ;;  %v7329_v17 = vld [vmem:[#allocation21_spill] sm:$0xff] }
 0x13e   : > { %v736_v34 = vpop.f32.mrf.mxu1  ;;  %2725 = vmatmul.mubr.f32.gmra.mxu1 %v7246_v15  ;;  %v475_v18 = vpop.f32.mrf.mxu0  ;;  %2464 = vmatmul.mubr.f32.gmra.mxu0 %v7314_v44  ;;  %v7328_v15 = vld [vmem:[#allocation44_spill] sm:$0xff] }
 0x13f   : > { %2780 = vmatpush1.xpose.msra.mxu0 %v5580_v54  ;;  %2945 = vmatpush1.xpose.msra.mxu1 %v5502_v21  ;;  %v5897_v11 = vadd.f32 %v736_v34, %v445_v32 }
 0x140   : > { %2783 = vmatprep.subr.mxu0 %v5596_v51  ;;  %2947 = vmatprep.subr.mxu1 %v5512_v49  ;;  %v738_v2 = vpop.f32.mrf.mxu1  ;;  %v477_v57 = vpop.f32.mrf.mxu0 }
 0x141   : > { %2730 = vmatprep.mubr.f32.mxu1 %v7249_v4  ;;  %2473 = vmatprep.mubr.f32.mxu0 %v7315_v3  ;;  %v7317_v57 = vld [vmem:[#allocation17_spill] sm:$0xff]  ;;  %v7324_v4 = vld [vmem:[#allocation18_spill] sm:$0xff] }
 0x142   : > { %v743_v26 = vpop.f32.mrf.mxu1  ;;  %2732 = vmatmul.mubr.f32.gmra.mxu1 %v7251_v35  ;;  %v490_v44 = vpop.f32.mrf.mxu0  ;;  %2479 = vmatmul.mubr.f32.gmra.mxu0 %v7316_v37  ;;  %v7323_v35 = vld [vmem:[#allocation22_spill] sm:$0xff] }
 0x143   : > { %2786 = vmatpush1.xpose.msra.mxu0 %v5601_v36  ;;  %2949 = vmatpush1.xpose.msra.mxu1 %v5528_v33  ;;  %v5907_v32 = vadd.f32 %v743_v26, %v460_v5  ;;  %v7318_v26 = vld [vmem:[#allocation74_spill] sm:$0xff] }
 0x144   : > { %2789 = vmatprep.subr.mxu0 %v5607_v0  ;;  %2951 = vmatprep.subr.mxu1 %v5539_v30  ;;  %v745_v34 = vpop.f32.mrf.mxu1  ;;  %v492_v2 = vpop.f32.mrf.mxu0 }
 0x145   : > { %2737 = vmatprep.mubr.f32.mxu1 %v7255_v23  ;;  %2881 = vmatprep.mubr.f32.mxu0 %v7317_v57  ;;  %v7319_v2 = vld [vmem:[#allocation77_spill] sm:$0xff]  ;;  %v7320_v57 = vld [vmem:[#allocation16_spill] sm:$0xff]  ;;  %v7321_v23 = vld [vmem:[#allocation26_spill] sm:$0xff] }
 0x146   : > { %v750_v3 = vpop.f32.mrf.mxu1  ;;  %2739 = vmatmul.mubr.f32.gmra.mxu1 %v7257_v13 }
 0x147   : > { %2792 = vmatpush1.xpose.msra.mxu0 %v5628_v10  ;;  %2953 = vmatpush1.xpose.msra.mxu1 %v5555_v8  ;;  %v5916_v37 = vadd.f32 %v750_v3, %v475_v18  ;;  %v7322_v18 = vld [vmem:[#allocation9_spill] sm:$0xff] }
 0x148   : > { %2795 = vmatprep.subr.mxu0 %v5640_v12  ;;  %2955 = vmatprep.subr.mxu1 %v5565_v25  ;;  %v752_v5 = vpop.f32.mrf.mxu1 }
 0x149   : > { %2744 = vmatprep.mubr.f32.mxu1 %v7318_v26  ;;  %v7325_v5 = vld [vmem:[#allocation19_spill] sm:$0xff]  ;;  %v7326_v26 = vld [vmem:[#allocation34_spill] sm:$0xff] }
 0x14a   : > { %v757_v34 = vpop.f32.mrf.mxu1  ;;  %2746 = vmatmul.mubr.f32.gmra.mxu1 %v7319_v2  ;;  %v7327_v2 = vld [vmem:[#allocation10_spill] sm:$0xff] }
 0x14b   : > { %2798 = vmatpush1.xpose.msra.mxu0 %v5664_v9  ;;  %2957 = vmatpush1.xpose.msra.mxu1 %v7320_v57  ;;  %v5924_v13 = vadd.f32 %v757_v34, %v490_v44  ;;  %v7330_v44 = vld [vmem:[#allocation13_spill] sm:$0xff]  ;;  %v7331_v34 = vld [vmem:[#allocation11_spill] sm:$0xff] }
 0x14c   : > { %2801 = vmatprep.subr.mxu0 %v7321_v23  ;;  %2959 = vmatprep.subr.mxu1 %v7322_v18  ;;  %v759_v3 = vpop.f32.mrf.mxu1 }
 0x14d   : > { %3033 = vmatprep.mubr.f32.mxu1 %v7323_v35  ;;  %v7332_v3 = vld [vmem:[#allocation25_spill] sm:$0xff] }
 0x14e   : > { %v7333_v35 = vld [vmem:[#allocation29_spill] sm:$0xff] }
 0x14f   : > { %2804 = vmatpush1.xpose.msra.mxu0 %v7324_v4  ;;  %2961 = vmatpush1.xpose.msra.mxu1 %v7325_v5 }
 0x150   : > { %2807 = vmatprep.subr.mxu0 %v7326_v26  ;;  %2963 = vmatprep.subr.mxu1 %v7327_v2 }
 0x153   : > { %2810 = vmatpush1.xpose.msra.mxu0 %v7328_v15  ;;  %2965 = vmatpush1.xpose.msra.mxu1 %v7329_v17 }
 0x154   : > { %2813 = vmatprep.subr.mxu0 %v7330_v44  ;;  %2967 = vmatprep.subr.mxu1 %v7331_v34  ;;  %v7337_v44 = vld [vmem:[#allocation41_spill] sm:$0xff] }
 0x157   : > { %2816 = vmatpush1.xpose.msra.mxu0 %v5730_v1  ;;  %2969 = vmatpush1.xpose.msra.mxu1 %v7332_v3  ;;  %v7338_v1 = vld [vmem:[#allocation47_spill] sm:$0xff] }
 0x158   : > { %2819 = vmatprep.subr.mxu0 %v7333_v35  ;;  %2971 = vmatprep.subr.mxu1 %v7334_v42  ;;  %v7339_v35 = vld [vmem:[#allocation14_spill] sm:$0xff] }
 0x15b   : > { %2822 = vmatpush1.xpose.msra.mxu0 %v5753_v53  ;;  %2973 = vmatpush1.xpose.msra.mxu1 %v7335_v56  ;;  %v7340_v53 = vld [vmem:[#allocation15_spill] sm:$0xff] }
 0x15c   : > { %2825 = vmatprep.subr.mxu0 %v5772_v50  ;;  %2975 = vmatprep.subr.mxu1 %v7336_v14  ;;  %v7341_v50 = vld [vmem:[#allocation35_spill] sm:$0xff] }
 0x15f   : > { %2828 = vmatpush1.xpose.msra.mxu0 %v5782_v63  ;;  %2977 = vmatpush1.xpose.msra.mxu1 %v7337_v44 }
 0x160   : > { %2831 = vmatprep.subr.mxu0 %v5795_v62  ;;  %2979 = vmatprep.subr.mxu1 %v7338_v1 }
 0x163   : > { %2834 = vmatpush1.xpose.msra.mxu0 %v5803_v27  ;;  %2981 = vmatpush1.xpose.msra.mxu1 %v7339_v35  ;;  %v7342_v35 = vand.u32 4294901760, %v5472_v46  ;;  %v7343_v27 = vld [vmem:[#allocation48_spill] sm:$0xff] }
 0x164   : > { %2837 = vmatprep.subr.mxu0 %v5817_v20  ;;  %2983 = vmatprep.subr.mxu1 %v7340_v53 }
 0x167   : > { %2840 = vmatpush1.xpose.msra.mxu0 %v5821_v48  ;;  %2985 = vmatpush1.xpose.msra.mxu1 %v7341_v50  ;;  %v7345_v50 = vld [vmem:[#allocation49_spill] sm:$0xff] }
 0x168   : > { %2843 = vmatprep.subr.mxu0 %v5835_v31  ;;  %2987 = vmatprep.subr.mxu1 %v5768_v16  ;;  %v7344_v31 = vand.u32 4294901760, %v5475_v55 }
 0x16b   : > { %2846 = vmatpush1.xpose.msra.mxu0 %v5839_v58  ;;  %2989 = vmatpush1.xpose.msra.mxu1 %v5787_v52  ;;  %v7348_v52 = vld [vmem:[#allocation51_spill] sm:$0xff] }
 0x16c   : > { %2991 = vmatprep.subr.mxu1 %v5790_v19  ;;  %3100 = vmatprep.subr.mxu0 %v7342_v35  ;;  %v7346_v19 = vand.u32 4294901760, %v5489_v6  ;;  %v7347_v35 = vld [vmem:[#allocation53_spill] sm:$0xff] }
 0x16e   : > { %v895_v20 = vpop.f32.mrf.mxu0  ;;  %2884 = vmatmul.mubr.f32.vlgmr.msra.gmra.mxu0 %v7343_v27 }
 0x16f   : > { %v896_v48 = vadd.f32 %v895_v20, %v5875_v7  ;;  %2993 = vmatpush1.xpose.msra.mxu1 %v5805_v41  ;;  %3104 = vmatpush1.xpose.msra.mxu0 %v7344_v31  ;;  %v7349_v20 = vand.u32 4294901760, %v5495_v28  ;;  %v7350_v31 = vld [vmem:[#allocation56_spill] sm:$0xff]  ;;  %v7353_v7 = vld [vmem:[#allocation55_spill] sm:$0xff]  ;;  %v7354_v28 = vand.u32 4294901760, %v5526_v24 }
 0x170   : > { %v897_v16 = vpop.f32.mrf.mxu0  ;;  %2890 = vmatprep.mubr.f32.mxu0 %v7345_v50  ;;  %2995 = vmatprep.subr.mxu1 %v5812_v60 }
 0x171   : > { %3108 = vmatprep.subr.mxu0 %v7346_v19  ;;  %v7351_v16 = vand.u32 4294901760, %v5515_v39  ;;  %v7352_v19 = vld [vmem:[#allocation60_spill] sm:$0xff] }
 0x172   : > { %v904_v46 = vpop.f32.mrf.mxu0  ;;  %2893 = vmatmul.mubr.f32.gmra.mxu0 %v7347_v35 }
 0x173   : > { %v905_v27 = vadd.f32 %v904_v46, %v5887_v40  ;;  %2997 = vmatpush1.xpose.msra.mxu1 %v7348_v52  ;;  %3112 = vmatpush1.xpose.msra.mxu0 %v7349_v20  ;;  %v7355_v20 = vld [vmem:[#allocation65_spill] sm:$0xff] }
 0x174   : > { %v906_v55 = vpop.f32.mrf.mxu0  ;;  %2899 = vmatprep.mubr.f32.mxu0 %v7350_v31  ;;  %3116 = vmatprep.subr.mxu0 %v7351_v16  ;;  %v7359_v16 = vld [vmem:[#allocation59_spill] sm:$0xff] }
 0x175   : > { %3301 = vmatprep.subr.mxu1 %v5456_v29  ;;  %v7356_v29 = vld [vmem:[#allocation58_spill] sm:$0xff]  ;;  %v7357_v55 = vand.u32 4294901760, %v5543_v61 }
 0x176   : > { %v913_v6 = vpop.f32.mrf.mxu0  ;;  %v1048_v50 = vpop.f32.mrf.mxu1  ;;  %2902 = vmatmul.mubr.f32.gmra.mxu0 %v7352_v19  ;;  %3037 = vmatmul.mubr.f32.vlgmr.msra.gmra.mxu1 %v7353_v7  ;;  %v7361_v19 = vld [vmem:[#allocation73_spill] sm:$0xff]  ;;  %v7363_v7 = vand.u32 4294901760, %v5569_v22 }
 0x177   : > { %v914_v40 = vadd.f32 %v913_v6, %v5897_v11  ;;  %v5983_v46 = vadd.f32 %v1048_v50, %v896_v48  ;;  %3120 = vmatpush1.xpose.msra.mxu0 %v7354_v28  ;;  %3303 = vmatpush1.xpose.msra.mxu1 %v5459_v43  ;;  %v7358_v48 = vld [vmem:[#allocation68_spill] sm:$0xff]  ;;  %v7360_v6 = vand.u32 4294901760, %v5553_v38 }
 0x178   : > { %v915_v35 = vpop.f32.mrf.mxu0  ;;  %v1050_v39 = vpop.f32.mrf.mxu1  ;;  %2908 = vmatprep.mubr.f32.mxu0 %v7355_v20  ;;  %3044 = vmatprep.mubr.f32.mxu1 %v7356_v29  ;;  %v7367_v29 = vld [vmem:[#allocation80_spill] sm:$0xff] }
 0x179   : > { %3124 = vmatprep.subr.mxu0 %v7357_v55  ;;  %3305 = vmatprep.subr.mxu1 %v5469_v59  ;;  %v7362_v59 = vld [vmem:[#allocation63_spill] sm:$0xff]  ;;  %v7365_v35 = vld [vmem:[#allocation64_spill] sm:$0xff]  ;;  %v7366_v39 = vand.u32 4294901760, %v5580_v54  ;;  %v7369_v55 = vand.u32 4294901760, %v5596_v51 }
 0x17a   : > { %v922_v31 = vpop.f32.mrf.mxu0  ;;  %v1059_v11 = vpop.f32.mrf.mxu1  ;;  %2911 = vmatmul.mubr.f32.gmra.mxu0 %v7358_v48  ;;  %3048 = vmatmul.mubr.f32.gmra.mxu1 %v7359_v16  ;;  %v7372_v48 = vand.u32 4294901760, %v5601_v36  ;;  %v7373_v51 = vld [vmem:[#allocation79_spill] sm:$0xff]  ;;  %v7377_v36 = vand.u32 4294901760, %v5628_v10  ;;  %v7382_v10 = vand.u32 4294901760, %v7321_v23  ;;  %v7386_v23 = vld [vmem:[#allocation13_spill] sm:$0xff] }
 0x17b   : > { %v923_v24 = vadd.f32 %v922_v31, %v5907_v32  ;;  %v5996_v43 = vadd.f32 %v1059_v11, %v905_v27  ;;  %3128 = vmatpush1.xpose.msra.mxu0 %v7360_v6  ;;  %3307 = vmatpush1.xpose.msra.mxu1 %v5477_v45  ;;  %v7364_v27 = vld [vmem:[#allocation76_spill] sm:$0xff]  ;;  %v7371_v11 = vld [vmem:[#allocation75_spill] sm:$0xff] }
 0x17c   : > { %v924_v50 = vpop.f32.mrf.mxu0  ;;  %v1061_v61 = vpop.f32.mrf.mxu1  ;;  %2917 = vmatprep.mubr.f32.mxu0 %v7361_v19  ;;  %3055 = vmatprep.mubr.f32.mxu1 %v7362_v59  ;;  %v7378_v19 = vld [vmem:[#allocation85_spill] sm:$0xff]  ;;  %v7380_v59 = vld [vmem:[#allocation87_spill] sm:$0xff] }
 0x17d   : > { %3132 = vmatprep.subr.mxu0 %v7363_v7  ;;  %3309 = vmatprep.subr.mxu1 %v5491_v47  ;;  %v7368_v47 = vld [vmem:[#allocation72_spill] sm:$0xff] }
 0x17e   : > { %v931_v28 = vpop.f32.mrf.mxu0  ;;  %v1070_v32 = vpop.f32.mrf.mxu1  ;;  %2920 = vmatmul.mubr.f32.gmra.mxu0 %v7364_v27  ;;  %3059 = vmatmul.mubr.f32.gmra.mxu1 %v7365_v35  ;;  %v7375_v50 = vld [vmem:[#allocation8_spill] sm:$0xff]  ;;  %v7400_v35 = vld [vmem:[#allocation14_spill] sm:$0xff] }
 0x17f   : > { %v932_v38 = vadd.f32 %v931_v28, %v5916_v37  ;;  %v6009_v45 = vadd.f32 %v1070_v32, %v914_v40  ;;  %3136 = vmatpush1.xpose.msra.mxu0 %v7366_v39  ;;  %3311 = vmatpush1.xpose.msra.mxu1 %v5502_v21  ;;  %v7370_v40 = vld [vmem:[#allocation83_spill] sm:$0xff]  ;;  %v7381_v28 = vand.u32 4294901760, %v5664_v9  ;;  %v7385_v9 = vand.u32 4294901760, %v7328_v15 }
 0x180   : > { %v933_v20 = vpop.f32.mrf.mxu0  ;;  %v1072_v22 = vpop.f32.mrf.mxu1  ;;  %2926 = vmatprep.mubr.f32.mxu0 %v7367_v29  ;;  %3066 = vmatprep.mubr.f32.mxu1 %v7368_v47  ;;  %v7405_v39 = vld [vmem:[#allocation35_spill] sm:$0xff]  ;;  %v7411_v29 = vld [vmem:[#allocation24_spill] sm:$0xff] }
 0x181   : > { %3140 = vmatprep.subr.mxu0 %v7369_v55  ;;  %3313 = vmatprep.subr.mxu1 %v5512_v49  ;;  %v7374_v49 = vand.u32 4294901760, %v5607_v0  ;;  %v7379_v0 = vand.u32 4294901760, %v5640_v12  ;;  %v7383_v12 = vand.u32 4294901760, %v7324_v4  ;;  %v7408_v20 = vld [vmem:[#allocation20_spill] sm:$0xff]  ;;  %v7410_v22 = vld [vmem:[#allocation39_spill] sm:$0xff] }
 0x182   : > { %v940_v31 = vpop.f32.mrf.mxu0  ;;  %v1081_v37 = vpop.f32.mrf.mxu1  ;;  %2929 = vmatmul.mubr.f32.gmra.mxu0 %v7370_v40  ;;  %3070 = vmatmul.mubr.f32.gmra.mxu1 %v7371_v11  ;;  %v7412_v55 = vld [vmem:[#allocation40_spill] sm:$0xff]  ;;  %v7414_v40 = vld [vmem:[#allocation46_spill] sm:$0xff] }
 0x183   : > { %v941_v54 = vadd.f32 %v940_v31, %v5924_v13  ;;  %v6022_v21 = vadd.f32 %v1081_v37, %v923_v24  ;;  %3144 = vmatpush1.xpose.msra.mxu0 %v7372_v48  ;;  %3315 = vmatpush1.xpose.msra.mxu1 %v5528_v33  ;;  %v7376_v13 = vld [vmem:[#allocation82_spill] sm:$0xff] }
 0x184   : > { %v1083_v16 = vpop.f32.mrf.mxu1  ;;  %3077 = vmatprep.mubr.f32.mxu1 %v7373_v51  ;;  %3148 = vmatprep.subr.mxu0 %v7374_v49  ;;  %v942_v6 = vpop.f32.mrf.mxu0  ;;  %v7415_v11 = vld [vmem:[#allocation50_spill] sm:$0xff] }
 0x185   : > { %3317 = vmatprep.subr.mxu1 %v5539_v30  ;;  %3258 = vmatprep.mubr.f32.mxu0 %v7375_v50  ;;  %v7417_v6 = vld [vmem:[#allocation61_spill] sm:$0xff] }
 0x186   : > { %v1092_v61 = vpop.f32.mrf.mxu1  ;;  %3081 = vmatmul.mubr.f32.gmra.mxu1 %v7376_v13  ;;  %v7418_v13 = vld [vmem:[#allocation62_spill] sm:$0xff] }
 0x187   : > { %v6033_v24 = vadd.f32 %v1092_v61, %v932_v38  ;;  %3152 = vmatpush1.xpose.msra.mxu0 %v7377_v36  ;;  %3319 = vmatpush1.xpose.msra.mxu1 %v5555_v8 }
 0x188   : > { %v1094_v33 = vpop.f32.mrf.mxu1  ;;  %3088 = vmatprep.mubr.f32.mxu1 %v7378_v19  ;;  %3156 = vmatprep.subr.mxu0 %v7379_v0  ;;  %v7419_v19 = vld [vmem:[#allocation66_spill] sm:$0xff] }
 0x189   : > { %3321 = vmatprep.subr.mxu1 %v5565_v25  ;;  %v7384_v25 = vand.u32 4294901760, %v7326_v26 }
 0x18a   : > { %v1103_v30 = vpop.f32.mrf.mxu1  ;;  %3092 = vmatmul.mubr.f32.gmra.mxu1 %v7380_v59 }
 0x18b   : > { %v6043_v7 = vadd.f32 %v1103_v30, %v941_v54  ;;  %3160 = vmatpush1.xpose.msra.mxu0 %v7381_v28  ;;  %3323 = vmatpush1.xpose.msra.mxu1 %v7320_v57  ;;  %v7387_v57 = vand.u32 4294901760, %v7386_v23  ;;  %v7421_v23 = vld [vmem:[#allocation74_spill] sm:$0xff] }
 0x18c   : > { %3164 = vmatprep.subr.mxu0 %v7382_v10  ;;  %3325 = vmatprep.subr.mxu1 %v7322_v18  ;;  %v1105_v8 = vpop.f32.mrf.mxu1  ;;  %v7388_v18 = vld [vmem:[#allocation27_spill] sm:$0xff] }
 0x18d   : > { %3397 = vmatprep.mubr.f32.mxu1 %v7375_v50  ;;  %v7389_v4 = vand.u32 4294901760, %v7388_v18 }
 0x18f   : > { %3168 = vmatpush1.xpose.msra.mxu0 %v7383_v12  ;;  %3327 = vmatpush1.xpose.msra.mxu1 %v7325_v5  ;;  %v7390_v5 = vld [vmem:[#allocation29_spill] sm:$0xff] }
 0x190   : > { %3172 = vmatprep.subr.mxu0 %v7384_v25  ;;  %3329 = vmatprep.subr.mxu1 %v7327_v2  ;;  %v7391_v26 = vand.u32 4294901760, %v7390_v5  ;;  %v7392_v2 = vld [vmem:[#allocation33_spill] sm:$0xff] }
 0x191   : > { %v7393_v15 = vand.u32 4294901760, %v7392_v2  ;;  %v7420_v12 = vld [vmem:[#allocation69_spill] sm:$0xff] }
 0x193   : > { %3176 = vmatpush1.xpose.msra.mxu0 %v7385_v9  ;;  %3331 = vmatpush1.xpose.msra.mxu1 %v7329_v17  ;;  %v7394_v17 = vld [vmem:[#allocation37_spill] sm:$0xff]  ;;  %v1449_v9 = vstv %s6112_s9 }
 0x194   : > { %3180 = vmatprep.subr.mxu0 %v7387_v57  ;;  %3333 = vmatprep.subr.mxu1 %v7331_v34  ;;  %v7395_v32 = vand.u32 4294901760, %v7394_v17  ;;  %v7396_v34 = vand.u32 4294901760, %v5782_v63 }
 0x197   : > { %3184 = vmatpush1.xpose.msra.mxu0 %v7389_v4  ;;  %3335 = vmatpush1.xpose.msra.mxu1 %v7332_v3  ;;  %v7397_v3 = vand.u32 4294901760, %v5795_v62 }
 0x198   : > { %3188 = vmatprep.subr.mxu0 %v7391_v26  ;;  %3337 = vmatprep.subr.mxu1 %v7334_v42  ;;  %v7398_v42 = vld [vmem:[#allocation28_spill] sm:$0xff] }
 0x199   : > { %v7399_v27 = vand.u32 4294901760, %v7398_v42 }
 0x19b   : > { %3192 = vmatpush1.xpose.msra.mxu0 %v7393_v15  ;;  %3339 = vmatpush1.xpose.msra.mxu1 %v7335_v56  ;;  %v7401_v56 = vld [vmem:[#allocation45_spill] sm:$0xff] }
 0x19c   : > { %3196 = vmatprep.subr.mxu0 %v7395_v32  ;;  %3341 = vmatprep.subr.mxu1 %v7336_v14  ;;  %v7402_v38 = vand.u32 4294901760, %v7401_v56  ;;  %v7403_v14 = vld [vmem:[#allocation30_spill] sm:$0xff]  ;;  %v7422_v32 = vld [vmem:[#allocation77_spill] sm:$0xff] }
 0x19d   : > { %v7404_v63 = vand.u32 4294901760, %v7403_v14 }
 0x19f   : > { %3200 = vmatpush1.xpose.msra.mxu0 %v7396_v34  ;;  %3343 = vmatpush1.xpose.msra.mxu1 %v7337_v44  ;;  %v7406_v44 = vld [vmem:[#allocation32_spill] sm:$0xff] }
 0x1a0   : > { %3204 = vmatprep.subr.mxu0 %v7397_v3  ;;  %3345 = vmatprep.subr.mxu1 %v7338_v1  ;;  %v7407_v62 = vand.u32 4294901760, %v7406_v44  ;;  %v7409_v1 = vand.u32 4294901760, %v5839_v58 }
 0x1a3   : > { %3208 = vmatpush1.xpose.msra.mxu0 %v7399_v27  ;;  %3347 = vmatpush1.xpose.msra.mxu1 %v7400_v35 }
 0x1a4   : > { %3212 = vmatprep.subr.mxu0 %v7402_v38  ;;  %3349 = vmatprep.subr.mxu1 %v7340_v53  ;;  %v7413_v53 = vld [vmem:[#allocation42_spill] sm:$0xff] }
 0x1a7   : > { %3216 = vmatpush1.xpose.msra.mxu0 %v7404_v63  ;;  %3351 = vmatpush1.xpose.msra.mxu1 %v7405_v39 }
 0x1a8   : > { %3220 = vmatprep.subr.mxu0 %v7407_v62  ;;  %3353 = vmatprep.subr.mxu1 %v7408_v20 }
 0x1ab   : > { %3224 = vmatpush1.xpose.msra.mxu0 %v7409_v1  ;;  %3355 = vmatpush1.xpose.msra.mxu1 %v7410_v22  ;;  %v4604_v1 = vmov 683565275  }
 0x1ac   : > { %3357 = vmatprep.subr.mxu1 %v7411_v29  ;;  %v4605_v29 = vmov 2475754826  }
 0x1ae   : > { %v1271_v47 = vpop.f32.mrf.mxu0  ;;  %3260 = vmatmul.mubr.f32.vlgmr.msra.gmra.mxu0 %v7412_v55 }
 0x1af   : > { %3359 = vmatpush1.xpose.msra.mxu1 %v5805_v41  ;;  %3265 = vmatprep.mubr.f32.mxu0 %v7413_v53  ;;  %v1272_v48 = vadd.f32 %v1271_v47, %v5983_v46  ;;  %v7416_v41 = vld [vmem:[#allocation54_spill] sm:$0xff] }
 0x1b0   : > { %v1273_v31 = vpop.f32.mrf.mxu0  ;;  %3361 = vmatprep.subr.mxu1 %v5812_v60 }
 0x1b2   : > { %v1278_v37 = vpop.f32.mrf.mxu0  ;;  %3267 = vmatmul.mubr.f32.gmra.mxu0 %v7414_v40 }
 0x1b3   : > { %v1279_v58 = vadd.f32 %v1278_v37, %v5996_v43  ;;  %3363 = vmatpush1.xpose.msra.mxu1 %v7348_v52  ;;  %3272 = vmatprep.mubr.f32.mxu0 %v7415_v11 }
 0x1b4   : > { %v1280_v54 = vpop.f32.mrf.mxu0 }
 0x1b5   : > { %v4607_v54 = vmov 2102212464  }
 0x1b6   : > { %v1285_v16 = vpop.f32.mrf.mxu0  ;;  %v1410_v51 = vpop.f32.mrf.mxu1  ;;  %3274 = vmatmul.mubr.f32.gmra.mxu0 %v7416_v41  ;;  %3399 = vmatmul.mubr.f32.vlgmr.msra.gmra.mxu1 %v7412_v55 }
 0x1b7   : > { %v1286_v60 = vadd.f32 %v1285_v16, %v6009_v45  ;;  %v1411_v49 = vadd.f32 %v1410_v51, %v1272_v48  ;;  %3279 = vmatprep.mubr.f32.mxu0 %v7417_v6  ;;  %3404 = vmatprep.mubr.f32.mxu1 %v7413_v53  ;;  %v4608_v51 = vmov 920167782  }
 0x1b8   : > { %v1287_v52 = vpop.f32.mrf.mxu0  ;;  %v1412_v43 = vpop.f32.mrf.mxu1 }
 0x1b9   : > { %v4300_v50 = vadd.f32 -81.0, %v1411_v49  ;;  %v4609_v49 = vmov 1326507024  }
 0x1ba   : > { %v1292_v61 = vpop.f32.mrf.mxu0  ;;  %v1417_v46 = vpop.f32.mrf.mxu1  ;;  %3281 = vmatmul.mubr.f32.gmra.mxu0 %v7418_v13  ;;  %3406 = vmatmul.mubr.f32.gmra.mxu1 %v7414_v40  ;;  %v4606_v40 = vmov 2131351028  }
 0x1bb   : > { %v6116_v36 = vmul.f32 0.017214207, %v4300_v50  ;;  %v1293_v45 = vadd.f32 %v1292_v61, %v6022_v21  ;;  %v6119_v33 = vadd.f32 %v1417_v46, %v1279_v58  ;;  %3286 = vmatprep.mubr.f32.mxu0 %v7419_v19  ;;  %3411 = vmatprep.mubr.f32.mxu1 %v7415_v11 }
 0x1bc   : > { %v1294_v0 = vpop.f32.mrf.mxu0  ;;  %v1419_v30 = vpop.f32.mrf.mxu1 }
 0x1bd   : > { %v1466_v59 = vand.u32 2139095040, %v6116_v36  ;;  %v1463_v28 = vand.u32 2147483647, %v6116_v36  ;;  %vm1465_vm14 = vcmp.lt.s32.totalorder %v6116_v36, 0 }
 0x1be   : > { %v1299_v10 = vpop.f32.mrf.mxu0  ;;  %v1424_v8 = vpop.f32.mrf.mxu1  ;;  %3288 = vmatmul.mubr.f32.gmra.mxu0 %v7420_v12  ;;  %3413 = vmatmul.mubr.f32.gmra.mxu1 %v7416_v41 }
 0x1bf   : > { %v1467_v21 = vshrl.u32 %v1466_v59, 23  ;;  %v1300_v25 = vadd.f32 %v1299_v10, %v6033_v24  ;;  %3293 = vmatprep.mubr.f32.mxu0 %v7421_v23  ;;  %3418 = vmatprep.mubr.f32.mxu1 %v7417_v6  ;;  %v1425_v57 = vadd.f32 %v1424_v8, %v1286_v60  ;;  %v1470_v26 = vand.u32 8388607, %v1463_v28 }
 0x1c0   : > { %v1301_v18 = vpop.f32.mrf.mxu0  ;;  %v1426_v4 = vpop.f32.mrf.mxu1  ;;  %vm6241_vm15 = vcmp.le.f32.partialorder %v1463_v28, 0.7853982 }
 0x1c1   : > { %v4301_v5 = vadd.s32 4294967169, %v1467_v21  ;;  %v1450_v2 = vadd.f32 %v1449_v9, %v1425_v57  ;;  %v1471_v56 = vor.u32 8388608, %v1470_v26 }
 0x1c2   : > { %v1306_v15 = vpop.f32.mrf.mxu0  ;;  %v1431_v17 = vpop.f32.mrf.mxu1  ;;  %3295 = vmatmul.mubr.f32.gmra.mxu0 %v7422_v32  ;;  %3420 = vmatmul.mubr.f32.gmra.mxu1 %v7418_v13 }
 0x1c3   : > { %v1473_v24 = vadd.s32 1, %v4301_v5  ;;  %v6138_v34 = vadd.f32 %v1306_v15, %v6043_v7  ;;  %v6140_v3 = vadd.f32 %v1431_v17, %v1293_v45  ;;  %3425 = vmatprep.mubr.f32.mxu1 %v7419_v19  ;;  %v1451_v42 = vmax.f32 %v1450_v2, 0.0 }
 0x1c4   : > { %v1433_v27 = vpop.f32.mrf.mxu1  ;;  %v1308_v35 = vpop.f32.mrf.mxu0  ;;  %v1511_v55 = vshll.u32 %v1471_v56, 8 }
 0x1c5   : > { %vm1474_vm1 = vcmp.gt.s32.totalorder %v1473_v24, 0  ;;  %v6143_v14 = vmul.f32 0.017453292, %v1451_v42 }
 0x1c6   : > { %v1475_v38 = vsel %vm1474_vm1, %v1473_v24, 0  ;;  %v1438_v63 = vpop.f32.mrf.mxu1  ;;  %3427 = vmatmul.mubr.f32.gmra.mxu1 %v7420_v12 }
 0x1c7   : > { %v1477_v39 = vand.u32 31, %v1475_v38  ;;  %v6146_v44 = vadd.f32 %v1438_v63, %v1300_v25  ;;  %3432 = vmatprep.mubr.f32.mxu1 %v7421_v23  ;;  %v1476_v62 = vshrl.u32 %v1475_v38, 5  ;;  %v2003_v53 = vand.u32 2139095040, %v6143_v14 }
 0x1c8   : > { %v1440_v7 = vpop.f32.mrf.mxu1 }
 0x1c9   : > { %v1478_v20 = vsub.s32 32, %v1477_v39  ;;  %v1480_v22 = vshll.u32 %v4604_v1, %v1477_v39  ;;  %v1483_v47 = vshll.u32 %v4605_v29, %v1477_v39  ;;  %v1486_v11 = vshll.u32 %v4606_v40, %v1477_v39 }
 0x1ca   : > { %v1445_v31 = vpop.f32.mrf.mxu1  ;;  %3434 = vmatmul.mubr.f32.gmra.mxu1 %v7422_v32  ;;  %v1489_v16 = vshll.u32 %v4607_v54, %v1477_v39  ;;  %v1492_v60 = vshll.u32 %v4608_v51, %v1477_v39  ;;  %vm1495_vm2 = vcmp.lt.s32.totalorder %v1476_v62, 1  ;;  %vm1498_vm3 = vcmp.lt.s32.totalorder %v1476_v62, 4 }
 0x1cb   : > { %v1481_v37 = vshrl.u32 %v4605_v29, %v1478_v20  ;;  %v1484_v58 = vshrl.u32 %v4606_v40, %v1478_v20  ;;  %v1487_v48 = vshrl.u32 %v4607_v54, %v1478_v20  ;;  %v1490_v41 = vshrl.u32 %v4608_v51, %v1478_v20 }
 0x1cc   : > { %v1493_v6 = vshrl.u32 %v4609_v49, %v1478_v20  ;;  %v1447_v52 = vpop.f32.mrf.mxu1  ;;  %v2004_v45 = vshrl.u32 %v2003_v53, 23  ;;  %v1479_v19 = vshrl.u32 %v4604_v1, %v1478_v20  ;;  %vm1497_vm4 = vcmp.lt.s32.totalorder %v1476_v62, 3 }
 0x1cd   : > { %v1482_v43 = vor.u32 %v1481_v37, %v1480_v22  ;;  %v1485_v50 = vor.u32 %v1484_v58, %v1483_v47  ;;  %v1488_v61 = vor.u32 %v1487_v48, %v1486_v11  ;;  %v1491_v46 = vor.u32 %v1490_v41, %v1489_v16 }
 0x1ce   : > { %v1494_v13 = vor.u32 %v1493_v6, %v1492_v60  ;;  %v4323_v12 = vadd.s32 4294967169, %v2004_v45  ;;  %vm1496_vm5 = vcmp.lt.s32.totalorder %v1476_v62, 2  ;;  %v6169_v42 = vadd.f32 %v1445_v31, %v6138_v34 }
 0x1cf   : > { %v1500_v0 = vsel %vm1498_vm3, %v1488_v61, 2102212464  ;;  %v1503_v30 = vsel %vm1495_vm2, %v1482_v43, %v1485_v50  ;;  %v1507_v59 = vsel %vm1495_vm2, %v1485_v50, %v1488_v61  ;;  %v1504_v10 = vsel %vm1498_vm3, %v1491_v46, 920167782 }
 0x1d0   : > { %v1508_v8 = vsel %vm1498_vm3, %v1494_v13, 1326507024  ;;  %v1499_v21 = vsel %vm1495_vm2, %v1479_v19, %v1482_v43  ;;  %v1505_v25 = vsel %vm1497_vm4, %v1488_v61, %v1504_v10  ;;  %v1501_v57 = vsel %vm1497_vm4, %v1485_v50, %v1500_v0 }
 0x1d1   : > { %v1509_v23 = vsel %vm1497_vm4, %v1491_v46, %v1508_v8  ;;  %v1506_v18 = vsel %vm1496_vm5, %v1503_v30, %v1505_v25  ;;  %v2010_v5 = vadd.s32 1, %v4323_v12  ;;  %v1502_v32 = vsel %vm1496_vm5, %v1499_v21, %v1501_v57 }
 0x1d2   : > { %v1510_v4 = vsel %vm1496_vm5, %v1507_v59, %v1509_v23  ;;  %v6165_v15 = vmul.u32.u64.low %v1511_v55, %v1506_v18  ;;  %v6166_v17 = vmul.u32.u64.high %v1511_v55, %v1506_v18, %v6165_v15  ;;  %v1518_v56 = vmul.u32 %v1511_v55, %v1502_v32 }
 0x1d3   : > { %v6162_v26 = vmul.u32.u64.low %v1511_v55, %v1510_v4  ;;  %v6163_v2 = vmul.u32.u64.high %v1511_v55, %v1510_v4, %v6162_v26  ;;  %vm2011_vm6 = vcmp.gt.s32.totalorder %v2010_v5, 0  ;;  %v2000_v47 = vand.u32 2147483647, %v6143_v14 }
 0x1d4   : > { %v2012_v24 = vsel %vm2011_vm6, %v2010_v5, 0  ;;  %v1521_v35 = vadd.s32 1, %v6166_v17  ;;  %vm1555_vm6 = vweird.f32 %v6116_v36 }
 0x1d5   : > { %v2014_v27 = vand.u32 31, %v2012_v24  ;;  %vm1520_vm7 = vc.u32 %v6163_v2, %v6165_v15  ;;  %v6182_v55 = vshrl.u32 %v2012_v24, 5  ;;  %v2007_v50 = vand.u32 8388607, %v2000_v47 }
 0x1d6   : > { %v1522_v38 = vsel %vm1520_vm7, %v1521_v35, %v6166_v17  ;;  %v1519_v5 = vadd.s32 %v6165_v15, %v6163_v2 }
 0x1d7   : > { %v1523_v63 = vadd.s32 %v1522_v38, %v1518_v56  ;;  %v2015_v39 = vsub.s32 32, %v2014_v27  ;;  %v2026_v53 = vshll.u32 %v4607_v54, %v2014_v27  ;;  %v2029_v31 = vshll.u32 %v4608_v51, %v2014_v27 }
 0x1d8   : > { %v2017_v60 = vshll.u32 %v4604_v1, %v2014_v27  ;;  %v2020_v6 = vshll.u32 %v4605_v29, %v2014_v27  ;;  %v2023_v52 = vshll.u32 %v4606_v40, %v2014_v27  ;;  %vm2035_vm8 = vcmp.lt.s32.totalorder %v6182_v55, 4 }
 0x1d9   : > { %v1524_v7 = vadd.s32 536870912, %v1523_v63  ;;  %v2027_v20 = vshrl.u32 %v4608_v51, %v2015_v39  ;;  %v2030_v22 = vshrl.u32 %v4609_v49, %v2015_v39  ;;  %v2018_v37 = vshrl.u32 %v4605_v29, %v2015_v39 }
 0x1da   : > { %v2021_v58 = vshrl.u32 %v4606_v40, %v2015_v39  ;;  %v2024_v11 = vshrl.u32 %v4607_v54, %v2015_v39  ;;  %v2008_v59 = vor.u32 8388608, %v2007_v50  ;;  %vm2032_vm9 = vcmp.lt.s32.totalorder %v6182_v55, 1 }
 0x1db   : > { %v6174_v62 = vshrl.u32 %v1524_v7, 30  ;;  %v2028_v16 = vor.u32 %v2027_v20, %v2026_v53  ;;  %v2031_v41 = vor.u32 %v2030_v22, %v2029_v31  ;;  %v2019_v61 = vor.u32 %v2018_v37, %v2017_v60 }
 0x1dc   : > { %v2022_v46 = vor.u32 %v2021_v58, %v2020_v6  ;;  %v2025_v13 = vor.u32 %v2024_v11, %v2023_v52  ;;  %vm2034_vm10 = vcmp.lt.s32.totalorder %v6182_v55, 3  ;;  %vm2033_vm11 = vcmp.lt.s32.totalorder %v6182_v55, 2 }
 0x1dd   : > { %v1526_v34 = vshll.u32 %v6174_v62, 30  ;;  %v2041_v19 = vsel %vm2035_vm8, %v2028_v16, 920167782  ;;  %v2045_v0 = vsel %vm2035_vm8, %v2031_v41, 1326507024  ;;  %v2048_v4 = vshll.u32 %v2008_v59, 8 }
 0x1de   : > { %v2040_v10 = vsel %vm2032_vm9, %v2019_v61, %v2022_v46  ;;  %v2042_v8 = vsel %vm2034_vm10, %v2025_v13, %v2041_v19  ;;  %v2044_v12 = vsel %vm2032_vm9, %v2022_v46, %v2025_v13  ;;  %v2046_v21 = vsel %vm2034_vm10, %v2028_v16, %v2045_v0 }
 0x1df   : > { %v1527_v48 = vsub.s32 %v1523_v63, %v1526_v34  ;;  %v2043_v23 = vsel %vm2033_vm11, %v2040_v10, %v2042_v8  ;;  %v2047_v57 = vsel %vm2033_vm11, %v2044_v12, %v2046_v21  ;;  %v2037_v2 = vsel %vm2035_vm8, %v2025_v13, 2102212464 }
 0x1e0   : > { %v6213_v24 = vmul.u32.u64.low %v2048_v4, %v2047_v57  ;;  %v6214_v27 = vmul.u32.u64.high %v2048_v4, %v2047_v57, %v6213_v24  ;;  %v6216_v35 = vmul.u32.u64.low %v2048_v4, %v2043_v23  ;;  %v6217_v56 = vmul.u32.u64.high %v2048_v4, %v2043_v23, %v6216_v35 }
 0x1e1   : > { %v1529_v43 = vsub.s32 0, %v1527_v48  ;;  %v2016_v31 = vshrl.u32 %v4604_v1, %v2015_v39 }
 0x1e2   : > { %v2058_v6 = vadd.s32 1, %v6217_v56  ;;  %vm2057_vm13 = vc.u32 %v6214_v27, %v6216_v35 }
 0x1e3   : > { %v4302_v45 = vmin.u32 %v1529_v43, %v1527_v48  ;;  %v2036_v16 = vsel %vm2032_vm9, %v2016_v31, %v2019_v61 }
 0x1e4   : > { %v2059_v0 = vsel %vm2057_vm13, %v2058_v6, %v6217_v56 }
 0x1e5   : > { %v1531_v30 = vclz %v4302_v45 }
 0x1e7   : > { %v4303_v25 = vadd.s32 4294967294, %v1531_v30 }
 0x1e9   : > { %vm4304_vm12 = vcmp.lt.s32.totalorder %v4303_v25, 0 }
 0x1ea   : > { %v1534_v18 = vsel %vm4304_vm12, 0, %v4303_v25 }
 0x1eb   : > { %v1535_v26 = vsub.s32 32, %v1534_v18  ;;  %v1539_v17 = vsub.s32 4294967266, %v1534_v18  ;;  %v1536_v38 = vshll.u32 %v1527_v48, %v1534_v18  ;;  %v2038_v48 = vsel %vm2034_vm10, %v2022_v46, %v2037_v2 }
 0x1ec   : > { %v2039_v13 = vsel %vm2033_vm11, %v2036_v16, %v2038_v48  ;;  %v1549_v46 = vsub.s32 4, %v6174_v62 }
 0x1ed   : > { %v1537_v63 = vshrl.u32 %v1519_v5, %v1535_v26  ;;  %v1540_v7 = vadd.s32 127, %v1539_v17  ;;  %v2055_v55 = vmul.u32 %v2048_v4, %v2039_v13 }
 0x1ee   : > { %v2405_v32 = vpop.f32.mrf.mxu0  ;;  %v1550_v18 = vsel %vm1465_vm14, %v1549_v46, %v6174_v62 }
 0x1ef   : > { %v1538_v22 = vor.u32 %v1537_v63, %v1536_v38  ;;  %v1541_v34 = vshll.u32 %v1540_v7, 23  ;;  %v2060_v25 = vadd.s32 %v2059_v0, %v2055_v55  ;;  %v1552_v4 = vsel %vm6241_vm15, 0, %v1550_v18 }
 0x1f0   : > { %v2407_v20 = vpop.f32.mrf.mxu0  ;;  %v1556_v62 = vadd.s32 3, %v1552_v4  ;;  %v1660_v2 = vand.u32 3, %v1552_v4 }
 0x1f1   : > { %v1542_v15 = vor.u32 4788187, %v1541_v34  ;;  %v1545_v11 = vcvt.s32.f32 %v1538_v22  ;;  %v2061_v17 = vadd.s32 536870912, %v2060_v25 }
 0x1f2   : > { %v2420_v53 = vpop.f32.mrf.mxu0  ;;  %vm1662_vm1 = vcmp.eq.s32.totalorder %v1660_v2, 0  ;;  %vm1665_vm2 = vcmp.eq.s32.totalorder %v1660_v2, 2  ;;  %vm1661_vm5 = vcmp.lt.s32.totalorder %v1660_v2, 2 }
 0x1f3   : > { %v1543_v58 = vand.u32 2147483647, %v1542_v15  ;;  %v6257_v7 = vshrl.u32 %v2061_v17, 30  ;;  %v1452_v15 = vstv %s6251_s24 }
 0x1f4   : > { %v2422_v37 = vpop.f32.mrf.mxu0  ;;  %v1453_v48 = vadd.f32 %v1452_v15, %v6140_v3 }
 0x1f5   : > { %v1546_v43 = vmul.f32 %v1545_v11, %v1543_v58  ;;  %v2063_v31 = vshll.u32 %v6257_v7, 30 }
 0x1f6   : > { %v2712_v41 = vpop.f32.mrf.mxu1  ;;  %v2435_v60 = vpop.f32.mrf.mxu0  ;;  %v1454_v3 = vmax.f32 %v1453_v48, 0.0 }
 0x1f7   : > { %v6228_v52 = vadd.f32 %v2712_v41, %v2405_v32  ;;  %v1547_v45 = vxor.u32 2147483648, %v1546_v43 }
 0x1f8   : > { %v2714_v39 = vpop.f32.mrf.mxu1  ;;  %v2437_v50 = vpop.f32.mrf.mxu0 }
 0x1f9   : > { %v1548_v10 = vsel %vm1465_vm14, %v1547_v45, %v1546_v43  ;;  %v6268_v43 = vsub.s32 %v2060_v25, %v2063_v31 }
 0x1fa   : > { %v2719_v61 = vpop.f32.mrf.mxu1  ;;  %v2450_v19 = vpop.f32.mrf.mxu0  ;;  %v1551_v21 = vsel %vm6241_vm15, %v6116_v36, %v1548_v10 }
 0x1fb   : > { %v6237_v30 = vadd.f32 %v2719_v61, %v2420_v53  ;;  %4490 = vcosq.f32 %v1551_v21  ;;  %v1557_v53 = vand.u32 3, %v1556_v62  ;;  %v2066_v59 = vsub.s32 0, %v6268_v43 }
 0x1fc   : > { %v2721_v8 = vpop.f32.mrf.mxu1  ;;  %v2452_v12 = vpop.f32.mrf.mxu0  ;;  %4492 = vsinq.f32 %v1551_v21  ;;  %v4317_v21 = vadd.f32 -120.0, %v1454_v3 }
 0x1fd   : > { %vm1562_vm0 = vcmp.eq.s32.totalorder %v1557_v53, 2  ;;  %vm1559_vm3 = vcmp.eq.s32.totalorder %v1557_v53, 0  ;;  %vm1558_vm4 = vcmp.lt.s32.totalorder %v1557_v53, 2  ;;  %v4324_v25 = vmin.u32 %v2066_v59, %v6268_v43 }
 0x1fe   : > { %v2726_v23 = vpop.f32.mrf.mxu1  ;;  %v2465_v57 = vpop.f32.mrf.mxu0 }
 0x1ff   : > { %v6249_v5 = vadd.f32 %v2726_v23, %v2435_v60  ;;  %v2068_v4 = vclz %v4324_v25 }
 0x200   : > { %v2728_v28 = vpop.f32.mrf.mxu1  ;;  %v2467_v26 = vpop.f32.mrf.mxu0 }
 0x201   : > { %v4325_v62 = vadd.s32 4294967294, %v2068_v4 }
 0x202   : > { %v2733_v32 = vpop.f32.mrf.mxu1  ;;  %v2480_v24 = vpop.f32.mrf.mxu0 }
 0x203   : > { %v6255_v56 = vadd.f32 %v2733_v32, %v2450_v19  ;;  %vm4326_vm8 = vcmp.lt.s32.totalorder %v4325_v62, 0 }
 0x204   : > { %v2735_v38 = vpop.f32.mrf.mxu1  ;;  %v2482_v63 = vpop.f32.mrf.mxu0 }
 0x206   : > { %v2740_v20 = vpop.f32.mrf.mxu1 }
 0x207   : > { %v6259_v22 = vadd.f32 %v2740_v20, %v2465_v57 }
 0x208   : > { %v2742_v34 = vpop.f32.mrf.mxu1  ;;  %v4491_v58 = vpop.eup %4490 }
 0x209   : > { %v4493_v16 = vpop.eup %4492  ;;  %v1563_v41 = vxor.u32 2147483648, %v4491_v58 }
 0x20a   : > { %v2747_v37 = vpop.f32.mrf.mxu1  ;;  %v1560_v6 = vxor.u32 2147483648, %v4493_v16 }
 0x20b   : > { %v6263_v11 = vadd.f32 %v2747_v37, %v2480_v24  ;;  %v1564_v39 = vsel %vm1562_vm0, %v1563_v41, %v4493_v16  ;;  %v1667_v50 = vsel %vm1665_vm2, %v1563_v41, %v4493_v16  ;;  %v1887_v24 = vmul.f32 4.0, %v4317_v21 }
 0x20c   : > { %v2749_v60 = vpop.f32.mrf.mxu1  ;;  %v1561_v13 = vsel %vm1559_vm3, %v4491_v58, %v1560_v6  ;;  %v1664_v45 = vsel %vm1662_vm1, %v4491_v58, %v1560_v6 }
 0x20d   : > { %v1565_v61 = vsel %vm1558_vm4, %v1561_v13, %v1564_v39  ;;  %v1668_v19 = vsel %vm1661_vm5, %v1664_v45, %v1667_v50  ;;  %vm2002_vm5 = vcmp.lt.s32.totalorder %v6143_v14, 0 }
 0x20e   : > { %v1566_v46 = vsel %vm1555_vm6, nan, %v1565_v61  ;;  %v1669_v0 = vsel %vm1555_vm6, nan, %v1668_v19 }
 0x20f   : > { %v1670_v10 = vmul.f32 23.45, %v1566_v46  ;;  %v1879_v55 = vmul.f32 2.0, %v1566_v46  ;;  %v1882_v18 = vmul.f32 7.53, %v1669_v0  ;;  %v1884_v26 = vmul.f32 1.5, %v1566_v46 }
 0x211   : > { %v6272_v8 = vmul.f32 0.017453292, %v1670_v10  ;;  %v1880_v12 = vmul.f32 %v1879_v55, %v1669_v0 }
 0x213   : > { %v1675_v23 = vand.u32 2139095040, %v6272_v8  ;;  %v1881_v57 = vmul.f32 9.87, %v1880_v12  ;;  %v1672_v34 = vand.u32 2147483647, %v6272_v8 }
 0x215   : > { %v1676_v36 = vshrl.u32 %v1675_v23, 23  ;;  %v1883_v28 = vsub.f32 %v1881_v57, %v1882_v18  ;;  %v1679_v16 = vand.u32 8388607, %v1672_v34 }
 0x217   : > { %v4309_v17 = vadd.s32 4294967169, %v1676_v36  ;;  %v1885_v32 = vsub.f32 %v1883_v28, %v1884_v26  ;;  %v1680_v0 = vor.u32 8388608, %v1679_v16 }
 0x219   : > { %v1682_v38 = vadd.s32 1, %v4309_v17  ;;  %v1888_v63 = vadd.f32 %v1887_v24, %v1885_v32  ;;  %v6298_v32 = vsel %vm4326_vm8, 0, %v4325_v62  ;;  %vm1674_vm8 = vcmp.lt.s32.totalorder %v6272_v8, 0 }
 0x21b   : > { %vm1683_vm7 = vcmp.gt.s32.totalorder %v1682_v38, 0  ;;  %v1890_v20 = vmul.f32 0.016666668, %v1888_v63  ;;  %v1720_v63 = vshll.u32 %v1680_v0, 8 }
 0x21c   : > { %v1684_v53 = vsel %vm1683_vm7, %v1682_v38, 0  ;;  %vm6408_vm7 = vcmp.le.f32.partialorder %v2000_v47, 0.7853982 }
 0x21d   : > { %v1686_v2 = vand.u32 31, %v1684_v53  ;;  %v1891_v31 = vadd.f32 %v1890_v20, %v6119_v33  ;;  %v1685_v48 = vshrl.u32 %v1684_v53, 5 }
 0x21f   : > { %v1687_v37 = vsub.s32 32, %v1686_v2  ;;  %v4318_v58 = vadd.f32 -12.0, %v1891_v31  ;;  %v1689_v41 = vshll.u32 %v4604_v1, %v1686_v2  ;;  %v1692_v60 = vshll.u32 %v4605_v29, %v1686_v2 }
 0x220   : > { %v1695_v6 = vshll.u32 %v4606_v40, %v1686_v2  ;;  %v1698_v33 = vshll.u32 %v4607_v54, %v1686_v2  ;;  %v1701_v19 = vshll.u32 %v4608_v51, %v1686_v2  ;;  %vm1704_vm9 = vcmp.lt.s32.totalorder %v1685_v48, 1 }
 0x221   : > { %v1893_v39 = vmul.f32 15.0, %v4318_v58  ;;  %v1690_v50 = vshrl.u32 %v4605_v29, %v1687_v37  ;;  %v1693_v13 = vshrl.u32 %v4606_v40, %v1687_v37  ;;  %v1696_v45 = vshrl.u32 %v4607_v54, %v1687_v37 }
 0x222   : > { %v1699_v61 = vshrl.u32 %v4608_v51, %v1687_v37  ;;  %v1702_v3 = vshrl.u32 %v4609_v49, %v1687_v37  ;;  %v1688_v57 = vshrl.u32 %v4604_v1, %v1687_v37  ;;  %vm1707_vm10 = vcmp.lt.s32.totalorder %v1685_v48, 4 }
 0x223   : > { %v6290_v46 = vmul.f32 0.017453292, %v1893_v39  ;;  %v1691_v59 = vor.u32 %v1690_v50, %v1689_v41  ;;  %v1694_v10 = vor.u32 %v1693_v13, %v1692_v60  ;;  %v1697_v55 = vor.u32 %v1696_v45, %v1695_v6 }
 0x224   : > { %v1700_v12 = vor.u32 %v1699_v61, %v1698_v33  ;;  %v1703_v21 = vor.u32 %v1702_v3, %v1701_v19  ;;  %vm1705_vm11 = vcmp.lt.s32.totalorder %v1685_v48, 2  ;;  %vm1706_vm12 = vcmp.lt.s32.totalorder %v1685_v48, 3 }
 0x225   : > { %v1895_v25 = vand.u32 2147483647, %v6290_v46  ;;  %v1898_v23 = vand.u32 2139095040, %v6290_v46  ;;  %v1712_v18 = vsel %vm1704_vm9, %v1691_v59, %v1694_v10  ;;  %v1709_v26 = vsel %vm1707_vm10, %v1697_v55, 2102212464 }
 0x226   : > { %v1713_v36 = vsel %vm1707_vm10, %v1700_v12, 920167782  ;;  %v1716_v17 = vsel %vm1704_vm9, %v1694_v10, %v1697_v55  ;;  %v1717_v38 = vsel %vm1707_vm10, %v1703_v21, 1326507024  ;;  %v1708_v2 = vsel %vm1704_vm9, %v1688_v57, %v1691_v59 }
 0x227   : > { %v1899_v28 = vshrl.u32 %v1898_v23, 23  ;;  %v1714_v4 = vsel %vm1706_vm12, %v1697_v55, %v1713_v36  ;;  %v1902_v53 = vand.u32 8388607, %v1895_v25  ;;  %v1718_v31 = vsel %vm1706_vm12, %v1700_v12, %v1717_v38 }
 0x228   : > { %v1715_v24 = vsel %vm1705_vm11, %v1712_v18, %v1714_v4  ;;  %v1710_v37 = vsel %vm1706_vm12, %v1694_v10, %v1709_v26  ;;  %v1719_v58 = vsel %vm1705_vm11, %v1716_v17, %v1718_v31  ;;  %v2076_v50 = vsub.s32 4294967266, %v6298_v32 }
 0x229   : > { %v4319_v20 = vadd.s32 4294967169, %v1899_v28  ;;  %v6305_v16 = vmul.u32.u64.low %v1720_v63, %v1715_v24  ;;  %v6306_v41 = vmul.u32.u64.high %v1720_v63, %v1715_v24, %v6305_v16  ;;  %v1903_v33 = vor.u32 8388608, %v1902_v53 }
 0x22a   : > { %v6309_v60 = vmul.u32.u64.low %v1720_v63, %v1719_v58  ;;  %v6310_v6 = vmul.u32.u64.high %v1720_v63, %v1719_v58, %v6309_v60  ;;  %v1711_v45 = vsel %vm1705_vm11, %v1708_v2, %v1710_v37  ;;  %v6320_v55 = vadd.s32 127, %v2076_v50 }
 0x22b   : > { %v1905_v62 = vadd.s32 1, %v4319_v20  ;;  %v1730_v3 = vadd.s32 1, %v6306_v41  ;;  %v1727_v12 = vmul.u32 %v1720_v63, %v1711_v45  ;;  %v6324_v23 = vshll.u32 %v1903_v33, 8 }
 0x22c   : > { %vm1729_vm14 = vc.u32 %v6310_v6, %v6305_v16  ;;  %vm6422_vm9 = vcmp.le.f32.partialorder %v1672_v34, 0.7853982  ;;  %vm1897_vm10 = vcmp.lt.s32.totalorder %v6290_v46, 0  ;;  %vm6444_vm11 = vcmp.le.f32.partialorder %v1895_v25, 0.7853982 }
 0x22d   : > { %vm1906_vm13 = vcmp.gt.s32.totalorder %v1905_v62, 0  ;;  %v1731_v57 = vsel %vm1729_vm14, %v1730_v3, %v6306_v41 }
 0x22e   : > { %v2885_v39 = vpop.f32.mrf.mxu0  ;;  %v1907_v19 = vsel %vm1906_vm13, %v1905_v62, 0  ;;  %v1732_v58 = vadd.s32 %v1731_v57, %v1727_v12 }
 0x22f   : > { %v2886_v13 = vadd.f32 %v2885_v39, %v6228_v52  ;;  %v6316_v0 = vshrl.u32 %v1907_v19, 5  ;;  %v1909_v59 = vand.u32 31, %v1907_v19 }
 0x230   : > { %v2887_v61 = vpop.f32.mrf.mxu0  ;;  %v1733_v12 = vadd.s32 536870912, %v1732_v58 }
 0x231   : > { %v1910_v21 = vsub.s32 32, %v1909_v59  ;;  %v1912_v48 = vshll.u32 %v4604_v1, %v1909_v59  ;;  %v1915_v36 = vshll.u32 %v4605_v29, %v1909_v59  ;;  %v1918_v28 = vshll.u32 %v4606_v40, %v1909_v59 }
 0x232   : > { %v2894_v10 = vpop.f32.mrf.mxu0  ;;  %v1921_v26 = vshll.u32 %v4607_v54, %v1909_v59  ;;  %v1924_v4 = vshll.u32 %v4608_v51, %v1909_v59  ;;  %vm1927_vm15 = vcmp.lt.s32.totalorder %v6316_v0, 1  ;;  %vm1928_vm0 = vcmp.lt.s32.totalorder %v6316_v0, 2 }
 0x233   : > { %v2895_v52 = vadd.f32 %v2894_v10, %v6237_v30  ;;  %v1913_v17 = vshrl.u32 %v4605_v29, %v1910_v21  ;;  %v1916_v30 = vshrl.u32 %v4606_v40, %v1910_v21  ;;  %v1919_v24 = vshrl.u32 %v4607_v54, %v1910_v21 }
 0x234   : > { %v2896_v18 = vpop.f32.mrf.mxu0  ;;  %v1922_v20 = vshrl.u32 %v4608_v51, %v1910_v21  ;;  %v1925_v53 = vshrl.u32 %v4609_v49, %v1910_v21  ;;  %vm1930_vm1 = vcmp.lt.s32.totalorder %v6316_v0, 4  ;;  %v1911_v45 = vshrl.u32 %v4604_v1, %v1910_v21 }
 0x235   : > { %v1914_v2 = vor.u32 %v1913_v17, %v1912_v48  ;;  %v1917_v31 = vor.u32 %v1916_v30, %v1915_v36  ;;  %v1920_v37 = vor.u32 %v1919_v24, %v1918_v28  ;;  %vm1929_vm2 = vcmp.lt.s32.totalorder %v6316_v0, 3 }
 0x236   : > { %v2903_v38 = vpop.f32.mrf.mxu0  ;;  %v3038_v63 = vpop.f32.mrf.mxu1  ;;  %v1923_v60 = vor.u32 %v1922_v20, %v1921_v26  ;;  %v1926_v39 = vor.u32 %v1925_v53, %v1924_v4  ;;  %v6361_v30 = vshrl.u32 %v1733_v12, 30 }
 0x237   : > { %v2904_v50 = vadd.f32 %v2903_v38, %v6249_v5  ;;  %v6340_v33 = vadd.f32 %v3038_v63, %v2886_v13  ;;  %v1932_v61 = vsel %vm1930_vm1, %v1920_v37, 2102212464  ;;  %v1935_v19 = vsel %vm1927_vm15, %v1914_v2, %v1917_v31 }
 0x238   : > { %v2905_v41 = vpop.f32.mrf.mxu0  ;;  %v3040_v62 = vpop.f32.mrf.mxu1  ;;  %v1939_v3 = vsel %vm1927_vm15, %v1917_v31, %v1920_v37  ;;  %v1936_v5 = vsel %vm1930_vm1, %v1923_v60, 920167782  ;;  %v1940_v13 = vsel %vm1930_vm1, %v1926_v39, 1326507024  ;;  %v1931_v21 = vsel %vm1927_vm15, %v1911_v45, %v1914_v2 }
 0x239   : > { %v1937_v48 = vsel %vm1929_vm2, %v1920_v37, %v1936_v5  ;;  %v1941_v57 = vsel %vm1929_vm2, %v1923_v60, %v1940_v13  ;;  %v1933_v26 = vsel %vm1929_vm2, %v1917_v31, %v1932_v61  ;;  %v1735_v2 = vshll.u32 %v6361_v30, 30 }
 0x23a   : > { %v2912_v59 = vpop.f32.mrf.mxu0  ;;  %v3049_v10 = vpop.f32.mrf.mxu1  ;;  %v1938_v4 = vsel %vm1928_vm0, %v1935_v19, %v1937_v48  ;;  %v1942_v17 = vsel %vm1928_vm0, %v1939_v3, %v1941_v57  ;;  %v2072_v41 = vsub.s32 32, %v6298_v32  ;;  %v1934_v62 = vsel %vm1928_vm0, %v1931_v21, %v1933_v26 }
 0x23b   : > { %v2913_v18 = vadd.f32 %v2912_v59, %v6255_v56  ;;  %v6364_v24 = vmul.u32.u64.low %v6324_v23, %v1942_v17  ;;  %v6365_v38 = vmul.u32.u64.high %v6324_v23, %v1942_v17, %v6364_v24  ;;  %v6373_v31 = vadd.f32 %v3049_v10, %v2895_v52 }
 0x23c   : > { %v2914_v36 = vpop.f32.mrf.mxu0  ;;  %v3051_v28 = vpop.f32.mrf.mxu1  ;;  %v6368_v63 = vmul.u32.u64.low %v6324_v23, %v1938_v4  ;;  %v6369_v20 = vmul.u32.u64.high %v6324_v23, %v1938_v4, %v6368_v63  ;;  %v1736_v61 = vsub.s32 %v1732_v58, %v1735_v2  ;;  %v2056_v19 = vadd.s32 %v6216_v35, %v6214_v27 }
 0x23d   : > { %v2078_v3 = vshll.u32 %v6320_v55, 23  ;;  %v1950_v0 = vmul.u32 %v6324_v23, %v1934_v62  ;;  %v2073_v21 = vshll.u32 %v6268_v43, %v6298_v32  ;;  %vm1764_vm2 = vweird.f32 %v6272_v8 }
 0x23e   : > { %v2921_v56 = vpop.f32.mrf.mxu0  ;;  %v3060_v53 = vpop.f32.mrf.mxu1  ;;  %vm1952_vm3 = vc.u32 %v6365_v38, %v6368_v63  ;;  %v1738_v10 = vsub.s32 0, %v1736_v61  ;;  %v2074_v5 = vshrl.u32 %v2056_v19, %v2072_v41  ;;  %v1728_v41 = vadd.s32 %v6305_v16, %v6310_v6 }
 0x23f   : > { %v2922_v37 = vadd.f32 %v2921_v56, %v6259_v22  ;;  %v6379_v60 = vadd.f32 %v3060_v53, %v2904_v50  ;;  %v1953_v22 = vadd.s32 1, %v6369_v20  ;;  %v2079_v48 = vor.u32 4788187, %v2078_v3 }
 0x240   : > { %v2923_v39 = vpop.f32.mrf.mxu0  ;;  %v3062_v45 = vpop.f32.mrf.mxu1  ;;  %v4310_v12 = vmin.u32 %v1738_v10, %v1736_v61  ;;  %v2075_v23 = vor.u32 %v2074_v5, %v2073_v21 }
 0x241   : > { %v1954_v58 = vsel %vm1952_vm3, %v1953_v22, %v6369_v20 }
 0x242   : > { %v2930_v52 = vpop.f32.mrf.mxu0  ;;  %v3071_v59 = vpop.f32.mrf.mxu1  ;;  %v1955_v55 = vadd.s32 %v1954_v58, %v1950_v0  ;;  %v1740_v28 = vclz %v4310_v12  ;;  %v2082_v53 = vcvt.s32.f32 %v2075_v23  ;;  %v1951_v12 = vadd.s32 %v6368_v63, %v6365_v38 }
 0x243   : > { %v2931_v50 = vadd.f32 %v2930_v52, %v6263_v11  ;;  %v6390_v13 = vadd.f32 %v3071_v59, %v2913_v18  ;;  %v2080_v18 = vand.u32 2147483647, %v2079_v48 }
 0x244   : > { %v3073_v27 = vpop.f32.mrf.mxu1  ;;  %v2932_v35 = vpop.f32.mrf.mxu0  ;;  %v1956_v36 = vadd.s32 536870912, %v1955_v55  ;;  %v4311_v17 = vadd.s32 4294967294, %v1740_v28 }
 0x245   : > { %v2083_v39 = vmul.f32 %v2082_v53, %v2080_v18 }
 0x246   : > { %v3082_v57 = vpop.f32.mrf.mxu1  ;;  %v6396_v4 = vshrl.u32 %v1956_v36, 30  ;;  %vm4312_vm4 = vcmp.lt.s32.totalorder %v4311_v17, 0 }
 0x247   : > { %v6394_v26 = vadd.f32 %v3082_v57, %v2922_v37  ;;  %v1743_v43 = vsel %vm4312_vm4, 0, %v4311_v17  ;;  %v2084_v10 = vxor.u32 2147483648, %v2083_v39  ;;  %vm1987_vm4 = vweird.f32 %v6290_v46 }
 0x248   : > { %v3084_v11 = vpop.f32.mrf.mxu1  ;;  %v1958_v20 = vshll.u32 %v6396_v4, 30  ;;  %v1744_v37 = vsub.s32 32, %v1743_v43  ;;  %v1748_v62 = vsub.s32 4294967266, %v1743_v43  ;;  %v1745_v19 = vshll.u32 %v1736_v61, %v1743_v43 }
 0x249   : > { %v2085_v16 = vsel %vm2002_vm5, %v2084_v10, %v2083_v39 }
 0x24a   : > { %v3093_v24 = vpop.f32.mrf.mxu1  ;;  %v1959_v2 = vsub.s32 %v1955_v55, %v1958_v20  ;;  %v1746_v3 = vshrl.u32 %v1728_v41, %v1744_v37  ;;  %v1749_v22 = vadd.s32 127, %v1748_v62  ;;  %v2088_v36 = vsel %vm6408_vm7, %v6143_v14, %v2085_v16 }
 0x24b   : > { %v6399_v56 = vadd.f32 %v3093_v24, %v2931_v50  ;;  %4494 = vcosq.f32 %v2088_v36  ;;  %v2086_v24 = vsub.s32 4, %v6257_v7 }
 0x24c   : > { %v3095_v32 = vpop.f32.mrf.mxu1  ;;  %v1961_v45 = vsub.s32 0, %v1959_v2  ;;  %v1747_v59 = vor.u32 %v1746_v3, %v1745_v19  ;;  %v1750_v0 = vshll.u32 %v1749_v22, 23  ;;  %4496 = vsinq.f32 %v2088_v36 }
 0x24d   : > { %v2087_v34 = vsel %vm2002_vm5, %v2086_v24, %v6257_v7  ;;  %v1981_v22 = vsub.s32 4, %v6396_v4 }
 0x24e   : > { %v4320_v52 = vmin.u32 %v1961_v45, %v1959_v2  ;;  %v1751_v5 = vor.u32 4788187, %v1750_v0  ;;  %v1754_v35 = vcvt.s32.f32 %v1747_v59  ;;  %v2089_v37 = vsel %vm6408_vm7, 0, %v2087_v34 }
 0x24f   : > { %v2197_v19 = vadd.s32 3, %v2089_v37  ;;  %v6454_v59 = vand.u32 3, %v2089_v37 }
 0x250   : > { %v1963_v50 = vclz %v4320_v52  ;;  %v1752_v27 = vand.u32 2147483647, %v1751_v5 }
 0x251   : > { %v6456_v0 = vand.u32 3, %v2197_v19  ;;  %vm2095_vm12 = vcmp.eq.s32.totalorder %v6454_v59, 0  ;;  %vm2094_vm13 = vcmp.lt.s32.totalorder %v6454_v59, 2  ;;  %vm2098_vm14 = vcmp.eq.s32.totalorder %v6454_v59, 2 }
 0x252   : > { %v4321_v58 = vadd.s32 4294967294, %v1963_v50  ;;  %v1755_v6 = vmul.f32 %v1754_v35, %v1752_v27  ;;  %v1982_v50 = vsel %vm1897_vm10, %v1981_v22, %v6396_v4 }
 0x253   : > { %vm2199_vm15 = vcmp.lt.s32.totalorder %v6456_v0, 2  ;;  %vm2200_vm0 = vcmp.eq.s32.totalorder %v6456_v0, 0  ;;  %vm2203_vm1 = vcmp.eq.s32.totalorder %v6456_v0, 2 }
 0x254   : > { %vm4322_vm6 = vcmp.lt.s32.totalorder %v4321_v58, 0  ;;  %v1756_v57 = vxor.u32 2147483648, %v1755_v6 }
 0x255   : > { %v1966_v55 = vsel %vm4322_vm6, 0, %v4321_v58 }
 0x256   : > { %v1967_v21 = vsub.s32 32, %v1966_v55  ;;  %v1971_v48 = vsub.s32 4294967266, %v1966_v55  ;;  %v1968_v28 = vshll.u32 %v1959_v2, %v1966_v55  ;;  %v1757_v47 = vsel %vm1674_vm8, %v1756_v57, %v1755_v6 }
 0x257   : > { %v1760_v63 = vsel %vm6422_vm9, %v6272_v8, %v1757_v47  ;;  %v1758_v2 = vsub.s32 4, %v6361_v30  ;;  %v1984_v55 = vsel %vm6444_vm11, 0, %v1982_v50 }
 0x258   : > { %v1969_v23 = vshrl.u32 %v1951_v12, %v1967_v21  ;;  %v1972_v11 = vadd.s32 127, %v1971_v48  ;;  %4498 = vcosq.f32 %v1760_v63  ;;  %v4495_v52 = vpop.eup %4494 }
 0x259   : > { %4500 = vsinq.f32 %v1760_v63  ;;  %v1759_v39 = vsel %vm1674_vm8, %v1758_v2, %v6361_v30  ;;  %v4497_v30 = vpop.eup %4496  ;;  %v2099_v35 = vxor.u32 2147483648, %v4495_v52 }
 0x25a   : > { %v1970_v17 = vor.u32 %v1969_v23, %v1968_v28  ;;  %v1973_v18 = vshll.u32 %v1972_v11, 23  ;;  %v1761_v3 = vsel %vm6422_vm9, 0, %v1759_v39  ;;  %v2096_v27 = vxor.u32 2147483648, %v4497_v30 }
 0x25b   : > { %v1765_v25 = vadd.s32 3, %v1761_v3  ;;  %v1869_v16 = vand.u32 3, %v1761_v3  ;;  %v2100_v57 = vsel %vm2098_vm14, %v2099_v35, %v4497_v30  ;;  %v1988_v23 = vand.u32 3, %v1984_v55 }
 0x25c   : > { %v1974_v20 = vor.u32 4788187, %v1973_v18  ;;  %v1977_v43 = vcvt.s32.f32 %v1970_v17  ;;  %v2097_v48 = vsel %vm2095_vm12, %v4495_v52, %v2096_v27  ;;  %v2202_v36 = vsel %vm2200_vm0, %v4495_v52, %v2096_v27 }
 0x25d   : > { %v1766_v61 = vand.u32 3, %v1765_v25  ;;  %vm1871_vm3 = vcmp.eq.s32.totalorder %v1869_v16, 0  ;;  %v2205_v11 = vsel %vm2203_vm1, %v2099_v35, %v4497_v30  ;;  %vm1874_vm7 = vcmp.eq.s32.totalorder %v1869_v16, 2 }
 0x25e   : > { %v1975_v53 = vand.u32 2147483647, %v1974_v20  ;;  %vm1870_vm8 = vcmp.lt.s32.totalorder %v1869_v16, 2  ;;  %vm1989_vm12 = vcmp.lt.s32.totalorder %v1988_v23, 2  ;;  %v2101_v3 = vsel %vm2094_vm13, %v2097_v48, %v2100_v57 }
 0x25f   : > { %vm1768_vm5 = vcmp.eq.s32.totalorder %v1766_v61, 0  ;;  %vm1771_vm6 = vcmp.eq.s32.totalorder %v1766_v61, 2  ;;  %vm1767_vm9 = vcmp.lt.s32.totalorder %v1766_v61, 2  ;;  %vm2092_vm13 = vweird.f32 %v6143_v14 }
 0x260   : > { %v1978_v32 = vmul.f32 %v1977_v43, %v1975_v53  ;;  %v1458_v55 = vstv %s6475_s26 }
 0x262   : > { %v1979_v41 = vxor.u32 2147483648, %v1978_v32 }
 0x264   : > { %v1980_v62 = vsel %vm1897_vm10, %v1979_v41, %v1978_v32  ;;  %vm1990_vm10 = vcmp.eq.s32.totalorder %v1988_v23, 0 }
 0x265   : > { %v1983_v45 = vsel %vm6444_vm11, %v6290_v46, %v1980_v62  ;;  %v4499_v10 = vpop.eup %4498  ;;  %vm1993_vm11 = vcmp.eq.s32.totalorder %v1988_v23, 2 }
 0x266   : > { %4502 = vcosq.f32 %v1983_v45  ;;  %v4501_v58 = vpop.eup %4500  ;;  %v1772_v4 = vxor.u32 2147483648, %v4499_v10 }
 0x267   : > { %4504 = vsinq.f32 %v1983_v45  ;;  %v1769_v12 = vxor.u32 2147483648, %v4501_v58 }
 0x268   : > { %v1773_v63 = vsel %vm1771_vm6, %v1772_v4, %v4501_v58  ;;  %v1876_v20 = vsel %vm1874_vm7, %v1772_v4, %v4501_v58 }
 0x269   : > { %v1770_v38 = vsel %vm1768_vm5, %v4499_v10, %v1769_v12  ;;  %v1873_v24 = vsel %vm1871_vm3, %v4499_v10, %v1769_v12 }
 0x26a   : > { %v1774_v62 = vsel %vm1767_vm9, %v1770_v38, %v1773_v63  ;;  %v1877_v39 = vsel %vm1870_vm8, %v1873_v24, %v1876_v20 }
 0x26b   : > { %v1775_v58 = vsel %vm1764_vm2, nan, %v1774_v62  ;;  %v1878_v59 = vsel %vm1764_vm2, nan, %v1877_v39 }
 0x26e   : > { %v3261_v5 = vpop.f32.mrf.mxu0 }
 0x26f   : > { %v3262_v17 = vadd.f32 %v3261_v5, %v6340_v33  ;;  %v1455_v5 = vstv %s6471_s25 }
 0x270   : > { %v3263_v6 = vpop.f32.mrf.mxu0  ;;  %v1456_v8 = vadd.f32 %v1455_v5, %v6146_v44 }
 0x271   : > { %v2102_v6 = vsel %vm2092_vm13, nan, %v2101_v3 }
 0x272   : > { %v3268_v21 = vpop.f32.mrf.mxu0  ;;  %v1457_v63 = vmax.f32 %v1456_v8, 0.0 }
 0x273   : > { %v3269_v28 = vadd.f32 %v3268_v21, %v6373_v31  ;;  %v4503_v18 = vpop.eup %4502 }
 0x274   : > { %v3270_v47 = vpop.f32.mrf.mxu0  ;;  %v4505_v43 = vpop.eup %4504  ;;  %v1994_v34 = vxor.u32 2147483648, %v4503_v18 }
 0x275   : > { %v1991_v41 = vxor.u32 2147483648, %v4505_v43 }
 0x276   : > { %v3275_v31 = vpop.f32.mrf.mxu0  ;;  %v3400_v53 = vpop.f32.mrf.mxu1  ;;  %v1995_v7 = vsel %vm1993_vm11, %v1994_v34, %v4505_v43 }
 0x277   : > { %v3276_v32 = vadd.f32 %v3275_v31, %v6379_v60  ;;  %v3401_v2 = vadd.f32 %v3400_v53, %v3262_v17  ;;  %v1992_v19 = vsel %vm1990_vm10, %v4503_v18, %v1991_v41  ;;  %v2206_v60 = vsel %vm2199_vm15, %v2202_v36, %v2205_v11 }
 0x278   : > { %v3277_v33 = vpop.f32.mrf.mxu0  ;;  %v3402_v37 = vpop.f32.mrf.mxu1  ;;  %v1996_v30 = vsel %vm1989_vm12, %v1992_v19, %v1995_v7  ;;  %v2207_v61 = vsel %vm2092_vm13, nan, %v2206_v60  ;;  %v1459_v11 = vadd.f32 %v1458_v55, %v6169_v42 }
 0x279   : > { %v4363_v45 = vadd.f32 -81.0, %v3401_v2  ;;  %v1997_v0 = vsel %vm1987_vm4, nan, %v1996_v30  ;;  %v2208_v21 = vmul.f32 %v2207_v61, %v1775_v58 }
 0x27a   : > { %v3282_v22 = vpop.f32.mrf.mxu0  ;;  %v3407_v52 = vpop.f32.mrf.mxu1  ;;  %v1999_v16 = vmul.f32 %v1997_v0, %v1878_v59 }
 0x27b   : > { %v6482_v25 = vmul.f32 0.017214207, %v4363_v45  ;;  %v3283_v10 = vadd.f32 %v3282_v22, %v6390_v13  ;;  %v6485_v50 = vadd.f32 %v3407_v52, %v3269_v28 }
 0x27c   : > { %v3284_v27 = vpop.f32.mrf.mxu0  ;;  %v3409_v35 = vpop.f32.mrf.mxu1  ;;  %v2103_v46 = vmul.f32 %v2102_v6, %v1999_v16 }
 0x27d   : > { %v3452_v13 = vand.u32 2139095040, %v6482_v25  ;;  %v3449_v17 = vand.u32 2147483647, %v6482_v25  ;;  %vm3451_vm10 = vcmp.lt.s32.totalorder %v6482_v25, 0 }
 0x27e   : > { %v3289_v12 = vpop.f32.mrf.mxu0  ;;  %v3414_v4 = vpop.f32.mrf.mxu1  ;;  %v2209_v23 = vadd.f32 %v2208_v21, %v2103_v46 }
 0x27f   : > { %v3453_v48 = vshrl.u32 %v3452_v13, 23  ;;  %v3290_v57 = vadd.f32 %v3289_v12, %v6394_v26  ;;  %v3415_v36 = vadd.f32 %v3414_v4, %v3276_v32  ;;  %v1460_v32 = vmax.f32 %v1459_v11, 0.0 }
 0x280   : > { %v3291_v14 = vpop.f32.mrf.mxu0  ;;  %v3416_v28 = vpop.f32.mrf.mxu1  ;;  %v2210_v24 = vmax.f32 %v2209_v23, 0.0  ;;  %vm3450_vm11 = vcmp.le.f32.partialorder %v3449_v17, 0.7853982 }
 0x281   : > { %v4364_v47 = vadd.s32 4294967169, %v3453_v48  ;;  %v3439_v18 = vadd.f32 %v3415_v36, %v1449_v9  ;;  %v3456_v9 = vand.u32 8388607, %v3449_v17 }
 0x282   : > { %v3296_v44 = vpop.f32.mrf.mxu0  ;;  %v3421_v38 = vpop.f32.mrf.mxu1  ;;  %v2211_v34 = vmul.f32 %v2210_v24, %v1457_v63 }
 0x283   : > { %v3459_v20 = vadd.s32 1, %v4364_v47  ;;  %v6509_v26 = vadd.f32 %v3296_v44, %v6399_v56  ;;  %v3440_v31 = vmax.f32 %v3439_v18, 0.0  ;;  %v6513_v53 = vadd.f32 %v3421_v38, %v3283_v10 }
 0x284   : > { %v3423_v43 = vpop.f32.mrf.mxu1  ;;  %v3298_v42 = vpop.f32.mrf.mxu0  ;;  %v2212_v37 = vadd.f32 %v2211_v34, %v1460_v32  ;;  %v3457_v19 = vor.u32 8388608, %v3456_v9 }
 0x285   : > { %vm3460_vm14 = vcmp.gt.s32.totalorder %v3459_v20, 0  ;;  %v6517_v41 = vmul.f32 0.017453292, %v3440_v31 }
 0x286   : > { %v3461_v2 = vsel %vm3460_vm14, %v3459_v20, 0  ;;  %v3428_v33 = vpop.f32.mrf.mxu1  ;;  %2213 = vst [vmem:[%s6521_s29] sm:$0xff] %v2212_v37  ;;  %v3497_v18 = vshll.u32 %v3457_v19, 8 }
 0x287   : > { %v3463_v56 = vand.u32 31, %v3461_v2  ;;  %v6519_v62 = vadd.f32 %v3428_v33, %v3290_v57  ;;  %v3462_v7 = vshrl.u32 %v3461_v2, 5  ;;  %v3988_v22 = vand.u32 2139095040, %v6517_v41 }
 0x288   : > { %v3430_v39 = vpop.f32.mrf.mxu1 }
 0x289   : > { %v3464_v45 = vsub.s32 32, %v3463_v56  ;;  %v3466_v3 = vshll.u32 %v4604_v1, %v3463_v56  ;;  %v3469_v60 = vshll.u32 %v4605_v29, %v3463_v56  ;;  %v3472_v58 = vshll.u32 %v4606_v40, %v3463_v56 }
 0x28a   : > { %v3435_v52 = vpop.f32.mrf.mxu1  ;;  %v3475_v0 = vshll.u32 %v4607_v54, %v3463_v56  ;;  %v3478_v35 = vshll.u32 %v4608_v51, %v3463_v56  ;;  %vm3481_vm15 = vcmp.lt.s32.totalorder %v3462_v7, 1  ;;  %vm3484_vm0 = vcmp.lt.s32.totalorder %v3462_v7, 4 }
 0x28b   : > { %v3467_v30 = vshrl.u32 %v4605_v29, %v3464_v45  ;;  %v3470_v10 = vshrl.u32 %v4606_v40, %v3464_v45  ;;  %v3473_v59 = vshrl.u32 %v4607_v54, %v3464_v45  ;;  %v3476_v27 = vshrl.u32 %v4608_v51, %v3464_v45 }
 0x28c   : > { %v3479_v16 = vshrl.u32 %v4609_v49, %v3464_v45  ;;  %v3437_v13 = vpop.f32.mrf.mxu1  ;;  %v3989_v46 = vshrl.u32 %v3988_v22, 23  ;;  %v3465_v21 = vshrl.u32 %v4604_v1, %v3464_v45  ;;  %vm3483_vm1 = vcmp.lt.s32.totalorder %v3462_v7, 3 }
 0x28d   : > { %v3468_v6 = vor.u32 %v3467_v30, %v3466_v3  ;;  %v3471_v61 = vor.u32 %v3470_v10, %v3469_v60  ;;  %v3474_v12 = vor.u32 %v3473_v59, %v3472_v58  ;;  %v3477_v4 = vor.u32 %v3476_v27, %v3475_v0 }
 0x28e   : > { %v3480_v8 = vor.u32 %v3479_v16, %v3478_v35  ;;  %v4386_v23 = vadd.s32 4294967169, %v3989_v46  ;;  %vm3482_vm2 = vcmp.lt.s32.totalorder %v3462_v7, 2  ;;  %v6546_v9 = vadd.f32 %v3435_v52, %v6509_v26 }
 0x28f   : > { %v3486_v48 = vsel %vm3484_vm0, %v3474_v12, 2102212464  ;;  %v3489_v57 = vsel %vm3481_vm15, %v3468_v6, %v3471_v61  ;;  %v3493_v36 = vsel %vm3481_vm15, %v3471_v61, %v3474_v12  ;;  %v3490_v14 = vsel %vm3484_vm0, %v3477_v4, 920167782 }
 0x290   : > { %v3494_v28 = vsel %vm3484_vm0, %v3480_v8, 1326507024  ;;  %v3491_v11 = vsel %vm3483_vm1, %v3474_v12, %v3490_v14  ;;  %v3485_v44 = vsel %vm3481_vm15, %v3465_v21, %v3468_v6  ;;  %v3487_v38 = vsel %vm3483_vm1, %v3471_v61, %v3486_v48 }
 0x291   : > { %v3495_v47 = vsel %vm3483_vm1, %v3477_v4, %v3494_v28  ;;  %v3492_v63 = vsel %vm3482_vm2, %v3489_v57, %v3491_v11  ;;  %v3995_v34 = vadd.s32 1, %v4386_v23  ;;  %v3488_v32 = vsel %vm3482_vm2, %v3485_v44, %v3487_v38 }
 0x292   : > { %v3496_v24 = vsel %vm3482_vm2, %v3493_v36, %v3495_v47  ;;  %v6542_v43 = vmul.u32.u64.low %v3497_v18, %v3492_v63  ;;  %v6543_v42 = vmul.u32.u64.high %v3497_v18, %v3492_v63, %v6542_v43  ;;  %v3504_v33 = vmul.u32 %v3497_v18, %v3488_v32 }
 0x293   : > { %v6539_v20 = vmul.u32.u64.low %v3497_v18, %v3496_v24  ;;  %v6540_v31 = vmul.u32.u64.high %v3497_v18, %v3496_v24, %v6539_v20  ;;  %vm3996_vm4 = vcmp.gt.s32.totalorder %v3995_v34, 0  ;;  %v3985_v59 = vand.u32 2147483647, %v6517_v41 }
 0x294   : > { %v3507_v2 = vadd.s32 1, %v6543_v42  ;;  %v3997_v39 = vsel %vm3996_vm4, %v3995_v34, 0 }
 0x295   : > { %vm3506_vm3 = vc.u32 %v6540_v31, %v6542_v43  ;;  %v3999_v19 = vand.u32 31, %v3997_v39  ;;  %v6559_v35 = vshrl.u32 %v3997_v39, 5  ;;  %v3992_v48 = vand.u32 8388607, %v3985_v59 }
 0x296   : > { %v3508_v37 = vsel %vm3506_vm3, %v3507_v2, %v6543_v42  ;;  %v3505_v23 = vadd.s32 %v6542_v43, %v6540_v31  ;;  %vm3541_vm3 = vweird.f32 %v6482_v25 }
 0x297   : > { %v3509_v56 = vadd.s32 %v3508_v37, %v3504_v33  ;;  %v4000_v22 = vsub.s32 32, %v3999_v19  ;;  %v4011_v27 = vshll.u32 %v4607_v54, %v3999_v19  ;;  %v4014_v6 = vshll.u32 %v4608_v51, %v3999_v19 }
 0x298   : > { %v4002_v12 = vshll.u32 %v4604_v1, %v3999_v19  ;;  %v4005_v8 = vshll.u32 %v4605_v29, %v3999_v19  ;;  %v4008_v46 = vshll.u32 %v4606_v40, %v3999_v19  ;;  %vm4020_vm6 = vcmp.lt.s32.totalorder %v6559_v35, 4 }
 0x299   : > { %v3510_v7 = vadd.s32 536870912, %v3509_v56  ;;  %v4012_v30 = vshrl.u32 %v4608_v51, %v4000_v22  ;;  %v4015_v10 = vshrl.u32 %v4609_v49, %v4000_v22  ;;  %v4003_v0 = vshrl.u32 %v4605_v29, %v4000_v22 }
 0x29a   : > { %v4006_v16 = vshrl.u32 %v4606_v40, %v4000_v22  ;;  %v4009_v13 = vshrl.u32 %v4607_v54, %v4000_v22  ;;  %vm4017_vm7 = vcmp.lt.s32.totalorder %v6559_v35, 1  ;;  %vm4019_vm8 = vcmp.lt.s32.totalorder %v6559_v35, 3 }
 0x29b   : > { %v6551_v45 = vshrl.u32 %v3510_v7, 30  ;;  %v4013_v4 = vor.u32 %v4012_v30, %v4011_v27  ;;  %v4016_v21 = vor.u32 %v4015_v10, %v4014_v6  ;;  %v4004_v57 = vor.u32 %v4003_v0, %v4002_v12 }
 0x29c   : > { %v4007_v14 = vor.u32 %v4006_v16, %v4005_v8  ;;  %v4010_v28 = vor.u32 %v4009_v13, %v4008_v46  ;;  %v3993_v20 = vor.u32 8388608, %v3992_v48  ;;  %vm4018_vm9 = vcmp.lt.s32.totalorder %v6559_v35, 2 }
 0x29d   : > { %v3512_v3 = vshll.u32 %v6551_v45, 30  ;;  %v4026_v18 = vsel %vm4020_vm6, %v4013_v4, 920167782  ;;  %v4030_v44 = vsel %vm4020_vm6, %v4016_v21, 1326507024  ;;  %v4001_v16 = vshrl.u32 %v4604_v1, %v4000_v22 }
 0x29e   : > { %v4025_v42 = vsel %vm4017_vm7, %v4004_v57, %v4007_v14  ;;  %v4027_v31 = vsel %vm4019_vm8, %v4010_v28, %v4026_v18  ;;  %v4029_v32 = vsel %vm4017_vm7, %v4007_v14, %v4010_v28  ;;  %v4031_v2 = vsel %vm4019_vm8, %v4013_v4, %v4030_v44 }
 0x29f   : > { %v3513_v60 = vsub.s32 %v3509_v56, %v3512_v3  ;;  %v4028_v37 = vsel %vm4018_vm9, %v4025_v42, %v4027_v31  ;;  %v4032_v56 = vsel %vm4018_vm9, %v4029_v32, %v4031_v2  ;;  %v4033_v39 = vshll.u32 %v3993_v20, 8 }
 0x2a0   : > { %v4022_v0 = vsel %vm4020_vm6, %v4010_v28, 2102212464  ;;  %v4021_v6 = vsel %vm4017_vm7, %v4001_v16, %v4004_v57 }
 0x2a1   : > { %v3515_v26 = vsub.s32 0, %v3513_v60 }
 0x2a3   : > { %v4365_v52 = vmin.u32 %v3515_v26, %v3513_v60 }
 0x2a5   : > { %v3517_v58 = vclz %v4365_v52  ;;  %v6594_v52 = vmul.u32.u64.low %v4033_v39, %v4032_v56  ;;  %v6595_v30 = vmul.u32.u64.high %v4033_v39, %v4032_v56, %v6594_v52 }
 0x2a7   : > { %v4366_v61 = vadd.s32 4294967294, %v3517_v58  ;;  %v3535_v58 = vsub.s32 4, %v6551_v45 }
 0x2a9   : > { %vm4367_vm5 = vcmp.lt.s32.totalorder %v4366_v61, 0  ;;  %v3536_v12 = vsel %vm3451_vm10, %v3535_v58, %v6551_v45 }
 0x2aa   : > { %v3520_v36 = vsel %vm4367_vm5, 0, %v4366_v61  ;;  %v4023_v61 = vsel %vm4019_vm8, %v4007_v14, %v4022_v0  ;;  %v3538_v22 = vsel %vm3450_vm11, 0, %v3536_v12 }
 0x2ab   : > { %v3521_v11 = vsub.s32 32, %v3520_v36  ;;  %v3525_v47 = vsub.s32 4294967266, %v3520_v36  ;;  %v3522_v38 = vshll.u32 %v3513_v60, %v3520_v36  ;;  %v4024_v17 = vsel %vm4018_vm9, %v4021_v6, %v4023_v61 }
 0x2ac   : > { %v6590_v3 = vmul.u32.u64.low %v4033_v39, %v4028_v37  ;;  %v6591_v60 = vmul.u32.u64.high %v4033_v39, %v4028_v37, %v6590_v3  ;;  %v4040_v46 = vmul.u32 %v4033_v39, %v4024_v17  ;;  %v3542_v21 = vadd.s32 3, %v3538_v22 }
 0x2ad   : > { %v3523_v63 = vshrl.u32 %v3505_v23, %v3521_v11  ;;  %v3526_v24 = vadd.s32 127, %v3525_v47  ;;  %v3646_v36 = vand.u32 3, %v3538_v22  ;;  %v3441_v23 = vadd.f32 %v6513_v53, %v1452_v15 }
 0x2ae   : > { %v4043_v4 = vadd.s32 1, %v6591_v60  ;;  %vm4042_vm12 = vc.u32 %v6595_v30, %v6590_v3  ;;  %v3543_v57 = vand.u32 3, %v3542_v21 }
 0x2af   : > { %v3524_v43 = vor.u32 %v3523_v63, %v3522_v38  ;;  %v3527_v34 = vshll.u32 %v3526_v24, 23  ;;  %vm3648_vm14 = vcmp.eq.s32.totalorder %v3646_v36, 0  ;;  %vm3651_vm15 = vcmp.eq.s32.totalorder %v3646_v36, 2 }
 0x2b0   : > { %v4044_v8 = vsel %vm4042_vm12, %v4043_v4, %v6591_v60  ;;  %vm3548_vm13 = vcmp.eq.s32.totalorder %v3543_v57, 2  ;;  %vm3545_vm0 = vcmp.eq.s32.totalorder %v3543_v57, 0  ;;  %vm3544_vm1 = vcmp.lt.s32.totalorder %v3543_v57, 2 }
 0x2b1   : > { %v3528_v33 = vor.u32 4788187, %v3527_v34  ;;  %v3531_v19 = vcvt.s32.f32 %v3524_v43  ;;  %v4045_v48 = vadd.s32 %v4044_v8, %v4040_v46  ;;  %vm3647_vm2 = vcmp.lt.s32.totalorder %v3646_v36, 2 }
 0x2b2   : > { %v3442_v42 = vmax.f32 %v3441_v23, 0.0 }
 0x2b3   : > { %v3529_v7 = vand.u32 2147483647, %v3528_v33  ;;  %v4046_v14 = vadd.s32 536870912, %v4045_v48 }
 0x2b4   : > { %v4380_v33 = vadd.f32 -120.0, %v3442_v42 }
 0x2b5   : > { %v3532_v26 = vmul.f32 %v3531_v19, %v3529_v7  ;;  %v6619_v35 = vshrl.u32 %v4046_v14, 30 }
 0x2b7   : > { %v3533_v10 = vxor.u32 2147483648, %v3532_v26  ;;  %v4048_v31 = vshll.u32 %v6619_v35, 30 }
 0x2b9   : > { %v3534_v27 = vsel %vm3451_vm10, %v3533_v10, %v3532_v26  ;;  %v6625_v37 = vsub.s32 %v4045_v48, %v4048_v31  ;;  %v3873_v26 = vmul.f32 4.0, %v4380_v33 }
 0x2ba   : > { %v3537_v13 = vsel %vm3450_vm11, %v6482_v25, %v3534_v27 }
 0x2bb   : > { %4506 = vcosq.f32 %v3537_v13  ;;  %v4051_v52 = vsub.s32 0, %v6625_v37 }
 0x2bc   : > { %4508 = vsinq.f32 %v3537_v13 }
 0x2bd   : > { %v4387_v13 = vmin.u32 %v4051_v52, %v6625_v37 }
 0x2bf   : > { %v4053_v22 = vclz %v4387_v13 }
 0x2c8   : > { %v4507_v28 = vpop.eup %4506 }
 0x2c9   : > { %v4509_v45 = vpop.eup %4508  ;;  %v3549_v11 = vxor.u32 2147483648, %v4507_v28 }
 0x2ca   : > { %v3546_v47 = vxor.u32 2147483648, %v4509_v45 }
 0x2cb   : > { %v3550_v18 = vsel %vm3548_vm13, %v3549_v11, %v4509_v45  ;;  %v3653_v44 = vsel %vm3651_vm15, %v3549_v11, %v4509_v45 }
 0x2cc   : > { %v3547_v38 = vsel %vm3545_vm0, %v4507_v28, %v3546_v47  ;;  %v3650_v63 = vsel %vm3648_vm14, %v4507_v28, %v3546_v47 }
 0x2cd   : > { %v3551_v24 = vsel %vm3544_vm1, %v3547_v38, %v3550_v18  ;;  %v3654_v20 = vsel %vm3647_vm2, %v3650_v63, %v3653_v44 }
 0x2ce   : > { %v3552_v15 = vsel %vm3541_vm3, nan, %v3551_v24  ;;  %v3655_v53 = vsel %vm3541_vm3, nan, %v3654_v20  ;;  %v4388_v20 = vadd.s32 4294967294, %v4053_v22  ;;  %vm3987_vm3 = vcmp.lt.s32.totalorder %v6517_v41, 0 }
 0x2cf   : > { %v3656_v43 = vmul.f32 23.45, %v3552_v15  ;;  %v3865_v34 = vmul.f32 2.0, %v3552_v15  ;;  %v3868_v7 = vmul.f32 7.53, %v3655_v53  ;;  %v3870_v60 = vmul.f32 1.5, %v3552_v15 }
 0x2d0   : > { %vm4389_vm9 = vcmp.lt.s32.totalorder %v4388_v20, 0 }
 0x2d1   : > { %v6623_v32 = vmul.f32 0.017453292, %v3656_v43  ;;  %v3866_v2 = vmul.f32 %v3865_v34, %v3655_v53 }
 0x2d3   : > { %v3661_v56 = vand.u32 2139095040, %v6623_v32  ;;  %v3867_v39 = vmul.f32 9.87, %v3866_v2  ;;  %v3658_v0 = vand.u32 2147483647, %v6623_v32 }
 0x2d5   : > { %v3662_v25 = vshrl.u32 %v3661_v56, 23  ;;  %v3869_v19 = vsub.f32 %v3867_v39, %v3868_v7  ;;  %v3665_v61 = vand.u32 8388607, %v3658_v0 }
 0x2d7   : > { %v4372_v10 = vadd.s32 4294967169, %v3662_v25  ;;  %v3871_v58 = vsub.f32 %v3869_v19, %v3870_v60  ;;  %v3666_v21 = vor.u32 8388608, %v3665_v61 }
 0x2d9   : > { %v3668_v27 = vadd.s32 1, %v4372_v10  ;;  %v3874_v16 = vadd.f32 %v3873_v26, %v3871_v58  ;;  %v3706_v33 = vshll.u32 %v3666_v21, 8 }
 0x2db   : > { %vm3669_vm4 = vcmp.gt.s32.totalorder %v3668_v27, 0  ;;  %v3875_v6 = vmul.f32 0.016666668, %v3874_v16 }
 0x2dc   : > { %v3670_v12 = vsel %vm3669_vm4, %v3668_v27, 0  ;;  %vm3660_vm4 = vcmp.lt.s32.totalorder %v6623_v32, 0 }
 0x2dd   : > { %v3672_v4 = vand.u32 31, %v3670_v12  ;;  %v3876_v17 = vadd.f32 %v3875_v6, %v6485_v50  ;;  %v3671_v48 = vshrl.u32 %v3670_v12, 5 }
 0x2df   : > { %v3673_v8 = vsub.s32 32, %v3672_v4  ;;  %v4381_v46 = vadd.f32 -12.0, %v3876_v17  ;;  %v3675_v57 = vshll.u32 %v4604_v1, %v3672_v4  ;;  %v3678_v36 = vshll.u32 %v4605_v29, %v3672_v4 }
 0x2e0   : > { %v3681_v14 = vshll.u32 %v4606_v40, %v3672_v4  ;;  %v3684_v11 = vshll.u32 %v4607_v54, %v3672_v4  ;;  %v3687_v18 = vshll.u32 %v4608_v51, %v3672_v4  ;;  %vm3690_vm5 = vcmp.lt.s32.totalorder %v3671_v48, 1 }
 0x2e1   : > { %v3878_v28 = vmul.f32 15.0, %v4381_v46  ;;  %v3676_v45 = vshrl.u32 %v4605_v29, %v3673_v8  ;;  %v3679_v23 = vshrl.u32 %v4606_v40, %v3673_v8  ;;  %v3682_v50 = vshrl.u32 %v4607_v54, %v3673_v8 }
 0x2e2   : > { %v3685_v47 = vshrl.u32 %v4608_v51, %v3673_v8  ;;  %v3688_v44 = vshrl.u32 %v4609_v49, %v3673_v8  ;;  %vm3693_vm6 = vcmp.lt.s32.totalorder %v3671_v48, 4  ;;  %vm3692_vm7 = vcmp.lt.s32.totalorder %v3671_v48, 3 }
 0x2e3   : > { %v6644_v38 = vmul.f32 0.017453292, %v3878_v28  ;;  %v3677_v63 = vor.u32 %v3676_v45, %v3675_v57  ;;  %v3680_v24 = vor.u32 %v3679_v23, %v3678_v36  ;;  %v3683_v42 = vor.u32 %v3682_v50, %v3681_v14 }
 0x2e4   : > { %v3686_v15 = vor.u32 %v3685_v47, %v3684_v11  ;;  %v3689_v53 = vor.u32 %v3688_v44, %v3687_v18  ;;  %vm3691_vm8 = vcmp.lt.s32.totalorder %v3671_v48, 2  ;;  %v3674_v25 = vshrl.u32 %v4604_v1, %v3673_v8 }
 0x2e5   : > { %v3880_v31 = vand.u32 2147483647, %v6644_v38  ;;  %v3883_v43 = vand.u32 2139095040, %v6644_v38  ;;  %v3698_v34 = vsel %vm3690_vm5, %v3677_v63, %v3680_v24  ;;  %v3702_v7 = vsel %vm3690_vm5, %v3680_v24, %v3683_v42 }
 0x2e6   : > { %v3699_v2 = vsel %vm3693_vm6, %v3686_v15, 920167782  ;;  %v3695_v19 = vsel %vm3693_vm6, %v3683_v42, 2102212464  ;;  %v3703_v26 = vsel %vm3693_vm6, %v3689_v53, 1326507024  ;;  %v3694_v27 = vsel %vm3690_vm5, %v3674_v25, %v3677_v63 }
 0x2e7   : > { %v3884_v56 = vshrl.u32 %v3883_v43, 23  ;;  %v3700_v39 = vsel %vm3692_vm7, %v3683_v42, %v3699_v2  ;;  %v3887_v10 = vand.u32 8388607, %v3880_v31  ;;  %v3704_v58 = vsel %vm3692_vm7, %v3686_v15, %v3703_v26 }
 0x2e8   : > { %v3701_v60 = vsel %vm3691_vm8, %v3698_v34, %v3700_v39  ;;  %v3705_v16 = vsel %vm3691_vm8, %v3702_v7, %v3704_v58  ;;  %v3696_v12 = vsel %vm3692_vm7, %v3680_v24, %v3695_v19  ;;  %v6666_v8 = vsel %vm4389_vm9, 0, %v4388_v20 }
 0x2e9   : > { %v4382_v52 = vadd.s32 4294967169, %v3884_v56  ;;  %v6658_v13 = vmul.u32.u64.low %v3706_v33, %v3701_v60  ;;  %v6659_v6 = vmul.u32.u64.high %v3706_v33, %v3701_v60, %v6658_v13  ;;  %v3888_v22 = vor.u32 8388608, %v3887_v10 }
 0x2ea   : > { %v6663_v4 = vmul.u32.u64.low %v3706_v33, %v3705_v16  ;;  %v6664_v17 = vmul.u32.u64.high %v3706_v33, %v3705_v16, %v6663_v4  ;;  %v3697_v21 = vsel %vm3691_vm8, %v3694_v27, %v3696_v12  ;;  %v4061_v14 = vsub.s32 4294967266, %v6666_v8 }
 0x2eb   : > { %v3890_v61 = vadd.s32 1, %v4382_v52  ;;  %v3716_v57 = vadd.s32 1, %v6659_v6  ;;  %v3928_v45 = vshll.u32 %v3888_v22, 8  ;;  %v3713_v23 = vmul.u32 %v3706_v33, %v3697_v21 }
 0x2ec   : > { %vm3715_vm11 = vc.u32 %v6664_v17, %v6658_v13  ;;  %vm6716_vm5 = vcmp.le.f32.partialorder %v3985_v59, 0.7853982  ;;  %vm6725_vm6 = vcmp.le.f32.partialorder %v3658_v0, 0.7853982  ;;  %vm3882_vm7 = vcmp.lt.s32.totalorder %v6644_v38, 0 }
 0x2ed   : > { %vm3891_vm10 = vcmp.gt.s32.totalorder %v3890_v61, 0  ;;  %v3717_v18 = vsel %vm3715_vm11, %v3716_v57, %v6659_v6  ;;  %vm6743_vm8 = vcmp.le.f32.partialorder %v3880_v31, 0.7853982 }
 0x2ee   : > { %v3892_v46 = vsel %vm3891_vm10, %v3890_v61, 0  ;;  %v3718_v33 = vadd.s32 %v3717_v18, %v3713_v23 }
 0x2ef   : > { %v3894_v36 = vand.u32 31, %v3892_v46  ;;  %v3893_v11 = vshrl.u32 %v3892_v46, 5  ;;  %v4062_v46 = vadd.s32 127, %v4061_v14 }
 0x2f0   : > { %v3719_v60 = vadd.s32 536870912, %v3718_v33 }
 0x2f1   : > { %v3895_v28 = vsub.s32 32, %v3894_v36  ;;  %v3897_v50 = vshll.u32 %v4604_v1, %v3894_v36  ;;  %v3900_v47 = vshll.u32 %v4605_v29, %v3894_v36  ;;  %v3903_v63 = vshll.u32 %v4606_v40, %v3894_v36 }
 0x2f2   : > { %v3906_v20 = vshll.u32 %v4607_v54, %v3894_v36  ;;  %v3909_v15 = vshll.u32 %v4608_v51, %v3894_v36  ;;  %vm3912_vm12 = vcmp.lt.s32.totalorder %v3893_v11, 1  ;;  %vm3915_vm13 = vcmp.lt.s32.totalorder %v3893_v11, 4 }
 0x2f3   : > { %v3898_v48 = vshrl.u32 %v4605_v29, %v3895_v28  ;;  %v3901_v44 = vshrl.u32 %v4606_v40, %v3895_v28  ;;  %v3904_v24 = vshrl.u32 %v4607_v54, %v3895_v28  ;;  %v3907_v42 = vshrl.u32 %v4608_v51, %v3895_v28 }
 0x2f4   : > { %v3910_v53 = vshrl.u32 %v4609_v49, %v3895_v28  ;;  %v3896_v40 = vshrl.u32 %v4604_v1, %v3895_v28  ;;  %vm3914_vm14 = vcmp.lt.s32.totalorder %v3893_v11, 3  ;;  %vm3913_vm15 = vcmp.lt.s32.totalorder %v3893_v11, 2 }
 0x2f5   : > { %v3899_v43 = vor.u32 %v3898_v48, %v3897_v50  ;;  %v3902_v34 = vor.u32 %v3901_v44, %v3900_v47  ;;  %v3905_v2 = vor.u32 %v3904_v24, %v3903_v63  ;;  %v3908_v56 = vor.u32 %v3907_v42, %v3906_v20 }
 0x2f6   : > { %v3911_v29 = vor.u32 %v3910_v53, %v3909_v15  ;;  %v6685_v27 = vshrl.u32 %v3719_v60, 30  ;;  %v4057_v28 = vsub.s32 32, %v6666_v8  ;;  %v4041_v47 = vadd.s32 %v6590_v3, %v6595_v30 }
 0x2f7   : > { %v3917_v39 = vsel %vm3915_vm13, %v3905_v2, 2102212464  ;;  %v3920_v7 = vsel %vm3912_vm12, %v3899_v43, %v3902_v34  ;;  %v3924_v25 = vsel %vm3912_vm12, %v3902_v34, %v3905_v2  ;;  %v3921_v54 = vsel %vm3915_vm13, %v3908_v56, 920167782 }
 0x2f8   : > { %v3925_v19 = vsel %vm3915_vm13, %v3911_v29, 1326507024  ;;  %v3916_v51 = vsel %vm3912_vm12, %v3896_v40, %v3899_v43  ;;  %v3922_v49 = vsel %vm3914_vm14, %v3905_v2, %v3921_v54  ;;  %v3918_v52 = vsel %vm3914_vm14, %v3902_v34, %v3917_v39 }
 0x2f9   : > { %v3926_v26 = vsel %vm3914_vm14, %v3908_v56, %v3925_v19  ;;  %v3923_v10 = vsel %vm3913_vm15, %v3920_v7, %v3922_v49  ;;  %v3721_v12 = vshll.u32 %v6685_v27, 30  ;;  %v3919_v4 = vsel %vm3913_vm15, %v3916_v51, %v3918_v52 }
 0x2fa   : > { %v3927_v58 = vsel %vm3913_vm15, %v3924_v25, %v3926_v26  ;;  %v6690_v1 = vmul.u32.u64.low %v3928_v45, %v3923_v10  ;;  %v6691_v61 = vmul.u32.u64.high %v3928_v45, %v3923_v10, %v6690_v1  ;;  %v3935_v57 = vmul.u32 %v3928_v45, %v3919_v4 }
 0x2fb   : > { %v6687_v16 = vmul.u32.u64.low %v3928_v45, %v3927_v58  ;;  %v6688_v6 = vmul.u32.u64.high %v3928_v45, %v3927_v58, %v6687_v16  ;;  %v3722_v22 = vsub.s32 %v3718_v33, %v3721_v12  ;;  %v4063_v18 = vshll.u32 %v4062_v46, 23 }
 0x2fc   : > { %v3938_v21 = vadd.s32 1, %v6691_v61  ;;  %v4059_v63 = vshrl.u32 %v4041_v47, %v4057_v28  ;;  %v4058_v45 = vshll.u32 %v6625_v37, %v6666_v8  ;;  %v3714_v3 = vadd.s32 %v6658_v13, %v6664_v17 }
 0x2fd   : > { %vm3937_vm0 = vc.u32 %v6688_v6, %v6690_v1  ;;  %v3724_v36 = vsub.s32 0, %v3722_v22  ;;  %v4064_v20 = vor.u32 4788187, %v4063_v18  ;;  %v3936_v52 = vadd.s32 %v6690_v1, %v6688_v6 }
 0x2fe   : > { %v3939_v23 = vsel %vm3937_vm0, %v3938_v21, %v6691_v61  ;;  %v4060_v15 = vor.u32 %v4059_v63, %v4058_v45  ;;  %v3744_v18 = vsub.s32 4, %v6685_v27 }
 0x2ff   : > { %v3940_v11 = vadd.s32 %v3939_v23, %v3935_v57  ;;  %v4373_v50 = vmin.u32 %v3724_v36, %v3722_v22  ;;  %v4065_v2 = vand.u32 2147483647, %v4064_v20 }
 0x300   : > { %v4067_v39 = vcvt.s32.f32 %v4060_v15  ;;  %v3745_v63 = vsel %vm3660_vm4, %v3744_v18, %v6685_v27 }
 0x301   : > { %v3941_v48 = vadd.s32 536870912, %v3940_v11  ;;  %v3726_v44 = vclz %v4373_v50  ;;  %v4071_v50 = vsub.s32 4, %v6619_v35  ;;  %v3747_v20 = vsel %vm6725_vm6, 0, %v3745_v63 }
 0x302   : > { %v4068_v25 = vmul.f32 %v4067_v39, %v4065_v2  ;;  %v3751_v31 = vadd.s32 3, %v3747_v20 }
 0x303   : > { %v6700_v14 = vshrl.u32 %v3941_v48, 30  ;;  %v4374_v24 = vadd.s32 4294967294, %v3726_v44  ;;  %v4072_v48 = vsel %vm3987_vm3, %v4071_v50, %v6619_v35 }
 0x304   : > { %v4069_v26 = vxor.u32 2147483648, %v4068_v25  ;;  %v4074_v35 = vsel %vm6716_vm5, 0, %v4072_v48 }
 0x305   : > { %v3943_v42 = vshll.u32 %v6700_v14, 30  ;;  %vm4375_vm1 = vcmp.lt.s32.totalorder %v4374_v24, 0  ;;  %v4182_v27 = vadd.s32 3, %v4074_v35 }
 0x306   : > { %v3729_v53 = vsel %vm4375_vm1, 0, %v4374_v24  ;;  %v4070_v61 = vsel %vm3987_vm3, %v4069_v26, %v4068_v25 }
 0x307   : > { %v3944_v43 = vsub.s32 %v3940_v11, %v3943_v42  ;;  %v3730_v30 = vsub.s32 32, %v3729_v53  ;;  %v3734_v34 = vsub.s32 4294967266, %v3729_v53  ;;  %v3731_v56 = vshll.u32 %v3722_v22, %v3729_v53 }
 0x308   : > { %v4073_v6 = vsel %vm6716_vm5, %v6517_v41, %v4070_v61  ;;  %v3966_v42 = vsub.s32 4, %v6700_v14 }
 0x309   : > { %v3946_v33 = vsub.s32 0, %v3944_v43  ;;  %v3732_v29 = vshrl.u32 %v3714_v3, %v3730_v30  ;;  %v3735_v40 = vadd.s32 127, %v3734_v34  ;;  %4510 = vcosq.f32 %v4073_v6 }
 0x30a   : > { %v4078_v30 = vand.u32 3, %v4074_v35 }
 0x30b   : > { %v4383_v7 = vmin.u32 %v3946_v33, %v3944_v43  ;;  %v3733_v37 = vor.u32 %v3732_v29, %v3731_v56  ;;  %v3736_v8 = vshll.u32 %v3735_v40, 23  ;;  %v4183_v33 = vand.u32 3, %v4182_v27 }
 0x30c   : > { %v3752_v56 = vand.u32 3, %v3751_v31  ;;  %v3855_v29 = vand.u32 3, %v3747_v20  ;;  %vm4079_vm9 = vcmp.lt.s32.totalorder %v4078_v30, 2  ;;  %vm4080_vm10 = vcmp.eq.s32.totalorder %v4078_v30, 0 }
 0x30d   : > { %v3948_v54 = vclz %v4383_v7  ;;  %v3737_v19 = vor.u32 4788187, %v3736_v8  ;;  %v3740_v49 = vcvt.s32.f32 %v3733_v37  ;;  %vm4083_vm11 = vcmp.eq.s32.totalorder %v4078_v30, 2 }
 0x30e   : > { %vm4185_vm12 = vcmp.eq.s32.totalorder %v4183_v33, 0  ;;  %vm4188_vm13 = vcmp.eq.s32.totalorder %v4183_v33, 2  ;;  %vm3754_vm14 = vcmp.eq.s32.totalorder %v3752_v56, 0  ;;  %vm3757_vm15 = vcmp.eq.s32.totalorder %v3752_v56, 2 }
 0x30f   : > { %v4384_v60 = vadd.s32 4294967294, %v3948_v54  ;;  %v3738_v51 = vand.u32 2147483647, %v3737_v19  ;;  %vm3857_vm0 = vcmp.eq.s32.totalorder %v3855_v29, 0  ;;  %vm3860_vm1 = vcmp.eq.s32.totalorder %v3855_v29, 2 }
 0x310   : > { %vm3856_vm3 = vcmp.lt.s32.totalorder %v3855_v29, 2 }
 0x311   : > { %vm4385_vm2 = vcmp.lt.s32.totalorder %v4384_v60, 0  ;;  %v3741_v13 = vmul.f32 %v3740_v49, %v3738_v51 }
 0x312   : > { %v3951_v17 = vsel %vm4385_vm2, 0, %v4384_v60  ;;  %vm3753_vm2 = vcmp.lt.s32.totalorder %v3752_v56, 2 }
 0x313   : > { %v3952_v10 = vsub.s32 32, %v3951_v17  ;;  %v3956_v58 = vsub.s32 4294967266, %v3951_v17  ;;  %v3742_v16 = vxor.u32 2147483648, %v3741_v13  ;;  %v3953_v12 = vshll.u32 %v3944_v43, %v3951_v17 }
 0x314   : > { %v3967_v43 = vsel %vm3882_vm7, %v3966_v42, %v6700_v14 }
 0x315   : > { %v3954_v4 = vshrl.u32 %v3936_v52, %v3952_v10  ;;  %v3957_v22 = vadd.s32 127, %v3956_v58  ;;  %v3743_v46 = vsel %vm3660_vm4, %v3742_v16, %v3741_v13  ;;  %v3969_v40 = vsel %vm6743_vm8, 0, %v3967_v43 }
 0x316   : > { %v3746_v28 = vsel %vm6725_vm6, %v6623_v32, %v3743_v46  ;;  %v4511_v15 = vpop.eup %4510  ;;  %v3973_v8 = vand.u32 3, %v3969_v40  ;;  %vm3750_vm6 = vweird.f32 %v6623_v32 }
 0x317   : > { %v3955_v1 = vor.u32 %v3954_v4, %v3953_v12  ;;  %v3958_v57 = vshll.u32 %v3957_v22, 23  ;;  %4512 = vcosq.f32 %v3746_v28  ;;  %v4084_v2 = vxor.u32 2147483648, %v4511_v15 }
 0x318   : > { %4514 = vsinq.f32 %v3746_v28  ;;  %vm3978_vm4 = vcmp.eq.s32.totalorder %v3973_v8, 2  ;;  %vm3975_vm5 = vcmp.eq.s32.totalorder %v3973_v8, 0  ;;  %v3443_v28 = vadd.f32 %v6519_v62, %v1455_v5 }
 0x319   : > { %v3959_v59 = vor.u32 4788187, %v3958_v57  ;;  %v3962_v11 = vcvt.s32.f32 %v3955_v1  ;;  %4516 = vsinq.f32 %v4073_v6 }
 0x31a   : > { %v3444_v50 = vmax.f32 %v3443_v28, 0.0 }
 0x31b   : > { %v3960_v23 = vand.u32 2147483647, %v3959_v59 }
 0x31d   : > { %v3963_v47 = vmul.f32 %v3962_v11, %v3960_v23  ;;  %v3445_v11 = vadd.f32 %v6546_v9, %v1458_v55 }
 0x31f   : > { %v3964_v0 = vxor.u32 2147483648, %v3963_v47 }
 0x321   : > { %v3965_v44 = vsel %vm3882_vm7, %v3964_v0, %v3963_v47  ;;  %vm3974_vm7 = vcmp.lt.s32.totalorder %v3973_v8, 2 }
 0x322   : > { %v3968_v45 = vsel %vm6743_vm8, %v6644_v38, %v3965_v44  ;;  %vm4184_vm8 = vcmp.lt.s32.totalorder %v4183_v33, 2 }
 0x323   : > { %4518 = vcosq.f32 %v3968_v45 }
 0x324   : > { %4520 = vsinq.f32 %v3968_v45  ;;  %v4513_v53 = vpop.eup %4512 }
 0x325   : > { %v4515_v3 = vpop.eup %4514  ;;  %v3758_v7 = vxor.u32 2147483648, %v4513_v53 }
 0x326   : > { %v4517_v34 = vpop.eup %4516  ;;  %v3755_v39 = vxor.u32 2147483648, %v4515_v3 }
 0x327   : > { %v4081_v37 = vxor.u32 2147483648, %v4517_v34  ;;  %v4085_v25 = vsel %vm4083_vm11, %v4084_v2, %v4517_v34  ;;  %v3759_v19 = vsel %vm3757_vm15, %v3758_v7, %v4515_v3  ;;  %v3862_v51 = vsel %vm3860_vm1, %v3758_v7, %v4515_v3 }
 0x328   : > { %v3756_v54 = vsel %vm3754_vm14, %v4513_v53, %v3755_v39  ;;  %v3859_v60 = vsel %vm3857_vm0, %v4513_v53, %v3755_v39  ;;  %v4190_v52 = vsel %vm4188_vm13, %v4084_v2, %v4517_v34  ;;  %vm3972_vm11 = vweird.f32 %v6644_v38 }
 0x329   : > { %v4082_v13 = vsel %vm4080_vm10, %v4511_v15, %v4081_v37  ;;  %v4187_v17 = vsel %vm4185_vm12, %v4511_v15, %v4081_v37  ;;  %v3760_v58 = vsel %vm3753_vm2, %v3756_v54, %v3759_v19  ;;  %v3863_v16 = vsel %vm3856_vm3, %v3859_v60, %v3862_v51 }
 0x32a   : > { %v4086_v22 = vsel %vm4079_vm9, %v4082_v13, %v4085_v25  ;;  %v4191_v46 = vsel %vm4184_vm8, %v4187_v17, %v4190_v52  ;;  %v3761_v21 = vsel %vm3750_vm6, nan, %v3760_v58  ;;  %v3864_v6 = vsel %vm3750_vm6, nan, %v3863_v16 }
 0x32b   : > { %vm4077_vm10 = vweird.f32 %v6517_v41  ;;  %v3446_v41 = vmax.f32 %v3445_v11, 0.0 }
 0x32c   : > { %v4087_v36 = vsel %vm4077_vm10, nan, %v4086_v22  ;;  %v4192_v32 = vsel %vm4077_vm10, nan, %v4191_v46 }
 0x32d   : > { %v4193_v59 = vmul.f32 %v4192_v32, %v3761_v21 }
 0x330   : > { %v4519_v14 = vpop.eup %4518 }
 0x331   : > { %v4521_v49 = vpop.eup %4520  ;;  %v3979_v26 = vxor.u32 2147483648, %v4519_v14 }
 0x332   : > { %v3976_v10 = vxor.u32 2147483648, %v4521_v49 }
 0x333   : > { %v3980_v61 = vsel %vm3978_vm4, %v3979_v26, %v4521_v49 }
 0x334   : > { %v3977_v12 = vsel %vm3975_vm5, %v4519_v14, %v3976_v10 }
 0x335   : > { %v3981_v4 = vsel %vm3974_vm7, %v3977_v12, %v3980_v61 }
 0x336   : > { %v3982_v1 = vsel %vm3972_vm11, nan, %v3981_v4 }
 0x337   : > { %v3984_v57 = vmul.f32 %v3982_v1, %v3864_v6 }
 0x339   : > { %v4088_v38 = vmul.f32 %v4087_v36, %v3984_v57 }
 0x33b   : > { %v4194_v23 = vadd.f32 %v4193_v59, %v4088_v38 }
 0x33d   : > { %v4195_v47 = vmax.f32 %v4194_v23, 0.0 }
 0x33f   : > { %v4196_v18 = vmul.f32 %v4195_v47, %v3444_v50 }
 0x341   : > { %v4197_v0 = vadd.f32 %v4196_v18, %v3446_v41 }
 0x343   : > { %4394 = vst [vmem:[%s6521_s29 + $0x8] sm:$0xff] %v4197_v0 }
 0x344   : > { %4550 = shalt.err (!%p4547_p2)
}
 0x345   : > { %s4551_s19 = scalar_lea.hbm %s4213_s7, 256  ;;  %s4555_s24 = scalar_lea.hbm %s6809_s3, 512 }
 0x346   : > { %p4552_p3 = scmp.ne.s32.totalorder %s4213_s7, %s4551_s19  ;;  %p4556_p8 = scmp.lt.s32.totalorder %s4213_s7, %s6809_s3 }
 0x347   : > { %p4557_p11 = scmp.lt.s32.totalorder %s4555_s24, %s4551_s19 }
 0x348   : > { %p4553_p4 = pnand %p4552_p3, %p4669_p5 }
 0x349   : > { %p4558_p9 = por %p4557_p11, %p4556_p8 }
 0x34a   : > { %p4554_p7 = pneg %p4553_p4 }
 0x34c   : > { %p4559_p10 = pnand %p4558_p9, %p4554_p7 }
 0x34e   : > { %4562 = shalt.err (!%p4559_p10)
}
 0x34f   : > { %4438 = dma.vmem_to_hbm [thread:$0]  (%p4669_p5), %s4216_s4, 256, %s4213_s7, %s4201_s8  }
 0x350 PF: > { %p4450_p12 = scmp.ge.s32.totalorder %s4601_s15, 2  ;;  %s4227_s27 = sand.u32 1, %s4589_s12  }
 0x351   : > { %s4228_s28 = scalar_lea.sflag [#allocation3], %s4227_s27 }
 0x352   : > { %p4445_p13 = pnand %p4450_p12, %p4673_p6 }
 0x354   : > { %p4446_p0 = pneg %p4445_p13 }
 0x356   : > { %4584 = dma.done.wait (%p4446_p0), %s4228_s28, 256  }
 0x357   : > { %4586 = vsyncadd (%p4446_p0), %s4228_s28, 4294967040  ;;  %p14_p1 = scmp.ge.s32.totalorder %s4656_s18, 4   ;;  %s7437_s12 = smov %s4593_s13 }
 0x358   : > { %s7438_s13 = smov %s4597_s14  ;;  %s7439_s14 = smov %s4667_s21 }
 0x359   : > { %s7440_s15 = smov %s4656_s18  ;;  %16 = sbr.rel (!%p14_p1) target bundleno = 4 (0x4), region = 75 }
 0x35e   :  { %4233 = vsyncpa [#allocation3], 1 }
 0x35f   :  { %4235 = vsyncpa [#allocation3 + $0x1], 1 }
 0x360   :  { %4236 = vsyncpa [#allocation4], 1 }
 0x361   :  { %4238 = vsyncpa [#allocation4 + $0x1], 1 }

</bundles_post_ra>
